<compile_context>
chip_gen: v5e
topology: v5e:2x2
jax: 0.10.0
libtpu: 0.0.40
codegen_flags: <defaults>
</compile_context>

<pallas_src>
import functools

import jax
import jax.numpy as jnp
from jax.experimental import pallas as pl
from jax.experimental.pallas import tpu as pltpu


def _round_up(x, m):
    return ((x + m - 1) // m) * m


# ----------------------------------------------------------------------------
# Tiled dense kernel:  (N, K) bf16 @ (K, M) bf16 + (1, M) f32  -> (N, M) f32
# Used for the hoisted LSTM input projection AND for the output head.
# Accumulates directly into the resident f32 output block (no acc scratch).
# ----------------------------------------------------------------------------
def _dense_kernel(x_ref, w_ref, b_ref, o_ref):
    k = pl.program_id(2)

    @pl.when(k == 0)
    def _():
        o_ref[...] = jnp.zeros_like(o_ref)

    o_ref[...] += jnp.dot(x_ref[...], w_ref[...],
                          preferred_element_type=jnp.float32)

    @pl.when(k == pl.num_programs(2) - 1)
    def _():
        o_ref[...] += b_ref[...]


def _choose_tk(K, cap=1024):
    """Return (tk, padded_K). Never returns a huge non-tiled contraction."""
    if K <= cap:
        return K, K                       # single k step; block == full K dim
    for tk in (1024, 512, 256, 128):
        if K % tk == 0:
            return tk, K
    # Non-divisible large K (e.g. vocab 50257): zero-pad, result is exact.
    return 512, _round_up(K, 512)


def dense(x2d, w, b2d, *, tm=512, tn=512):
    """x2d: (N, K) bf16, w: (K, M) bf16, b2d: (1, M) f32 -> (N, M) f32."""
    N, K = x2d.shape
    Kw, M = w.shape
    assert K == Kw
    x2d = x2d.astype(jnp.bfloat16)        # no-op when caller already passes bf16
    tk, Kp = _choose_tk(K)
    if Kp != K:
        x2d = jnp.pad(x2d, ((0, 0), (0, Kp - K)))
        w = jnp.pad(w, ((0, Kp - K), (0, 0)))
    tm = min(tm, N)
    tn = min(tn, M)
    grid = (pl.cdiv(N, tm), pl.cdiv(M, tn), Kp // tk)

    # double-buffered x/w/bias + resident/double-buffered f32 output
    bufs = 2 * (tm * tk * 2 + tk * tn * 2 + tn * 4 + tm * tn * 4)
    vmem_limit = int(min(64 << 20, max(2 * bufs, 16 << 20)))

    return pl.pallas_call(
        _dense_kernel,
        out_shape=jax.ShapeDtypeStruct((N, M), jnp.float32),
        grid_spec=pltpu.PrefetchScalarGridSpec(
            num_scalar_prefetch=0,
            grid=grid,
            in_specs=[
                pl.BlockSpec((tm, tk), lambda i, j, k: (i, k)),
                pl.BlockSpec((tk, tn), lambda i, j, k: (k, j)),
                pl.BlockSpec((1, tn), lambda i, j, k: (0, j)),
            ],
            out_specs=pl.BlockSpec((tm, tn), lambda i, j, k: (i, j)),
        ),
        compiler_params=pltpu.CompilerParams(
            dimension_semantics=("parallel", "parallel", "arbitrary"),
            vmem_limit_bytes=vmem_limit),
    )(x2d, w, b2d)


# ----------------------------------------------------------------------------
# Recurrent LSTM kernel (batch-major): grid = (batch blocks, timestep chunks).
# Per step only the h_prev @ W_hh matmul + gate nonlinearities (the input
# projection x @ W_ih + bias is precomputed for all timesteps by `dense`).
# ----------------------------------------------------------------------------
def _lstm_recur_kernel(gx_ref, whh_ref, h0_ref, c0_ref,
                       y_ref, hN_ref, cN_ref, h_scr, c_scr,
                       *, t_chunk, seq_len, hidden, unroll):
    chunk = pl.program_id(1)

    @pl.when(chunk == 0)
    def _():
        h_scr[...] = h0_ref[...]
        c_scr[...] = c0_ref[...]

    H = hidden
    tb = h_scr.shape[0]
    whh = whh_ref[...]                          # (H, 4H) bf16, resident weight

    def step(i, carry):
        h_prev, c_prev = carry
        gx_i = gx_ref[:, pl.ds(i, 1), :].reshape(tb, 4 * H)   # f32 pre-acts
        gates = gx_i + jnp.dot(h_prev.astype(jnp.bfloat16), whh,
                               preferred_element_type=jnp.float32)
        # NOTE: gate slices are lane-aligned (free) whenever H % 128 == 0.
        i_g = jax.nn.sigmoid(gates[:, 0 * H:1 * H])
        f_g = jax.nn.sigmoid(gates[:, 1 * H:2 * H])
        g_g = jnp.tanh(gates[:, 2 * H:3 * H])
        o_g = jax.nn.sigmoid(gates[:, 3 * H:4 * H])
        c_new = f_g * c_prev + i_g * g_g
        h_new = o_g * jnp.tanh(c_new)
        y_ref[:, pl.ds(i, 1), :] = h_new.astype(y_ref.dtype).reshape(tb, 1, H)
        if seq_len % t_chunk == 0:              # static: no masking needed
            return (h_new, c_new)
        valid = (chunk * t_chunk + i) < seq_len
        return (jnp.where(valid, h_new, h_prev),
                jnp.where(valid, c_new, c_prev))

    h_last, c_last = jax.lax.fori_loop(
        0, t_chunk, step, (h_scr[...], c_scr[...]), unroll=unroll)
    h_scr[...] = h_last
    c_scr[...] = c_last

    # Final-state stores only on the last chunk of each batch block.
    @pl.when(chunk == pl.num_programs(1) - 1)
    def _():
        hN_ref[...] = h_last
        cN_ref[...] = c_last


def _pick_tb(B):
    """Batch block: enables megacore batch-parallelism when B is large."""
    if B <= 8:
        return B
    for cand in (64, 32, 16, 8):
        if B % cand == 0:
            return cand
    return B


def _pick_t_chunk(T, tb, H, budget_bytes=24 << 20):
    """Timesteps per grid step, derived from a VMEM buffer budget."""
    per_t = tb * (2 * (4 * H) * 4 + 2 * H * 2)   # dbl-buffered gx f32 + y bf16
    tc = budget_bytes // max(per_t, 1)
    tc = min(tc, 64, T)
    if tc >= T:
        return T
    return max(8, (tc // 8) * 8)


def lstm_recurrent(gates_x, whh, h0, c0):
    """gates_x: (B, T, 4H) f32 precomputed x@Wih+bias; whh: (H, 4H) bf16.

    Returns (y (B, T, H) bf16, h_n (B, H) f32, c_n (B, H) f32).
    """
    B, T, G = gates_x.shape
    H = h0.shape[-1]
    tb = _pick_tb(B)
    t_chunk = _pick_t_chunk(T, tb, H)
    n_b = pl.cdiv(B, tb)
    n_c = pl.cdiv(T, t_chunk)
    unroll = min(t_chunk, 8)

    vmem_need = (2 * tb * t_chunk * G * 4        # gx, double-buffered, f32
                 + 2 * tb * t_chunk * H * 2      # y,  double-buffered, bf16
                 + 2 * H * G * 2                 # W_hh
                 + 8 * tb * H * 4)               # h0/c0/hN/cN/scratch
    vmem_limit = int(min(64 << 20, max(2 * vmem_need, 16 << 20)))

    kernel = functools.partial(_lstm_recur_kernel, t_chunk=t_chunk,
                               seq_len=T, hidden=H, unroll=unroll)
    return pl.pallas_call(
        kernel,
        out_shape=(jax.ShapeDtypeStruct((B, T, H), jnp.bfloat16),
                   jax.ShapeDtypeStruct((B, H), jnp.float32),
                   jax.ShapeDtypeStruct((B, H), jnp.float32)),
        grid_spec=pltpu.PrefetchScalarGridSpec(
            num_scalar_prefetch=0,
            grid=(n_b, n_c),
            in_specs=[
                pl.BlockSpec((tb, t_chunk, G), lambda b, c: (b, c, 0)),
                pl.BlockSpec((H, G), lambda b, c: (0, 0)),
                pl.BlockSpec((tb, H), lambda b, c: (b, 0)),
                pl.BlockSpec((tb, H), lambda b, c: (b, 0)),
            ],
            out_specs=(
                pl.BlockSpec((tb, t_chunk, H), lambda b, c: (b, c, 0)),
                pl.BlockSpec((tb, H), lambda b, c: (b, 0)),
                pl.BlockSpec((tb, H), lambda b, c: (b, 0)),
            ),
            scratch_shapes=[pltpu.VMEM((tb, H), jnp.float32),
                            pltpu.VMEM((tb, H), jnp.float32)],
        ),
        compiler_params=pltpu.CompilerParams(
            # batch blocks are independent (megacore), chunks are sequential
            dimension_semantics=("parallel", "arbitrary"),
            vmem_limit_bytes=vmem_limit),
    )(gates_x, whh, h0, c0)


# ----------------------------------------------------------------------------
# NNLM module (parameters + forward glue)
# ----------------------------------------------------------------------------
class NNLM:
    def __init__(self, key, *, size_of_oh, units_of_rnn, layers_of_rnn,
                 dropout_rate=0.0):
        self.param = dict(size_of_oh=size_of_oh, units_of_rnn=units_of_rnn,
                          layers_of_rnn=layers_of_rnn,
                          dropout_rate=dropout_rate)
        V, H, L = size_of_oh, units_of_rnn, layers_of_rnn
        bound = 1.0 / jnp.sqrt(jnp.float32(H))

        self.layers = []
        for l in range(L):
            D = V if l == 0 else H
            key, k1, k2, k3, k4 = jax.random.split(key, 5)
            # PyTorch stores (4H, D); keep transposed (D, 4H) for x @ W.
            wih = jax.random.uniform(k1, (D, 4 * H), jnp.float32,
                                     -bound, bound).astype(jnp.bfloat16)
            whh = jax.random.uniform(k2, (H, 4 * H), jnp.float32,
                                     -bound, bound).astype(jnp.bfloat16)
            bih = jax.random.uniform(k3, (4 * H,), jnp.float32, -bound, bound)
            bhh = jax.random.uniform(k4, (4 * H,), jnp.float32, -bound, bound)
            bias = (bih + bhh).reshape(1, 4 * H)          # f32
            self.layers.append((wih, whh, bias))

        key, k5, k6 = jax.random.split(key, 3)
        self.lin_w = jax.random.uniform(k5, (H, V), jnp.float32,
                                        -bound, bound).astype(jnp.bfloat16)
        self.lin_b = jax.random.uniform(k6, (1, V), jnp.float32, -bound, bound)

    def init_states(self, batch_size):
        L = self.param['layers_of_rnn']
        H = self.param['units_of_rnn']
        return (jnp.zeros((L, batch_size, H), jnp.float32),
                jnp.zeros((L, batch_size, H), jnp.float32))

    def forward(self, inp, hidden):
        """inp: (B, T, V) float32, hidden: (h0, c0) each (L, B, H)."""
        h0_all, c0_all = hidden
        L = self.param['layers_of_rnn']
        H = self.param['units_of_rnn']
        B, T, _ = inp.shape

        # Batch-major layout end-to-end (no HBM transposes). Single one-time
        # bf16 cast of the layer-0 input; deeper layers receive bf16 y directly.
        x = inp.astype(jnp.bfloat16)                      # (B, T, V)

        h_finals, c_finals = [], []
        for l in range(L):
            wih, whh, bias = self.layers[l]
            D = x.shape[-1]
            # Hoisted input projection: one big batched matmul over all steps.
            gx = dense(x.reshape(B * T, D), wih, bias).reshape(B, T, 4 * H)
            y, hN, cN = lstm_recurrent(gx, whh, h0_all[l], c0_all[l])
            h_finals.append(hN)
            c_finals.append(cN)
            x = y                                          # (B, T, H) bf16

        h_n = jnp.stack(h_finals, axis=0)                  # (L, B, H)
        c_n = jnp.stack(c_finals, axis=0)                  # (L, B, H)

        # batch_first reshape(-1, H) row order == batch-major reshape: free.
        logits = dense(x.reshape(B * T, H), self.lin_w, self.lin_b)  # (B*T, V)
        return logits, (h_n, c_n)


# ----------------------------------------------------------------------------
if __name__ == "__main__":
    key = jax.random.PRNGKey(0)
    B, T = 2, 8
    size_of_oh = 32       # vocab / one-hot size
    units_of_rnn = 32
    layers_of_rnn = 2

    model = NNLM(key,
                 size_of_oh=size_of_oh,
                 units_of_rnn=units_of_rnn,
                 layers_of_rnn=layers_of_rnn,
                 dropout_rate=0.1)

    key, kin = jax.random.split(key)
    inp = jax.random.normal(kin, (B, T, size_of_oh), jnp.float32)
    hidden = model.init_states(B)

    fwd = jax.jit(model.forward)
    logits, (h_n, c_n) = fwd(inp, hidden)
    jax.block_until_ready((logits, h_n, c_n))

    assert logits.shape == (B * T, size_of_oh)
    assert h_n.shape == (layers_of_rnn, B, units_of_rnn)
    assert c_n.shape == (layers_of_rnn, B, units_of_rnn)
    assert bool(jnp.all(jnp.isfinite(logits)))
    print("KERNEL_OK")
</pallas_src>

<mosaic_0001>
module attributes {stable_mosaic.version = 11 : i64} {
  func.func @_dense_kernel(%arg0: i32, %arg1: i32, %arg2: i32, %arg3: memref<16x32xbf16, #tpu.memory_space<vmem>>, %arg4: memref<32x128xbf16, #tpu.memory_space<vmem>>, %arg5: memref<1x128xf32, #tpu.memory_space<vmem>>, %arg6: memref<16x128xf32, #tpu.memory_space<vmem>>) attributes {dimension_semantics = [#tpu.dimension_semantics<parallel>, #tpu.dimension_semantics<parallel>, #tpu.dimension_semantics<arbitrary>], iteration_bounds = array<i64: 1, 1, 1>, scalar_prefetch = 0 : i64, scratch_operands = 0 : i64, tpu.core_type = #tpu.core_type<tc>, window_params = [{transform_indices = @transform_0, window_bounds = array<i64: 16, 32>}, {transform_indices = @transform_1, window_bounds = array<i64: 32, 128>}, {transform_indices = @transform_2, window_bounds = array<i64: 1, 128>}, {transform_indices = @transform_3, window_bounds = array<i64: 16, 128>}]} {
    %c0_i32 = arith.constant 0 : i32
    %0 = arith.cmpi eq, %arg2, %c0_i32 : i32
    %1 = arith.extui %0 : i1 to i32
    %c0_i32_0 = arith.constant 0 : i32
    %2 = arith.cmpi ne, %1, %c0_i32_0 : i32
    scf.if %2 {
      %cst_10 = arith.constant 0.000000e+00 : f32
      %12 = vector.broadcast %cst_10 : f32 to vector<16x128xf32>
      %c0_11 = arith.constant 0 : index
      %c0_12 = arith.constant 0 : index
      %13 = vector.load %arg6[%c0_11, %c0_12] : memref<16x128xf32, #tpu.memory_space<vmem>>, vector<16x128xf32>
      tpu.vector_store %arg6[%c0_11, %c0_12], %12 {strides = array<i32>} : memref<16x128xf32, #tpu.memory_space<vmem>>, vector<16x128xf32>,
    } else {
    }
    %c0 = arith.constant 0 : index
    %c0_1 = arith.constant 0 : index
    %3 = vector.load %arg6[%c0, %c0_1] : memref<16x128xf32, #tpu.memory_space<vmem>>, vector<16x128xf32>
    %c0_2 = arith.constant 0 : index
    %c0_3 = arith.constant 0 : index
    %4 = vector.load %arg3[%c0_2, %c0_3] : memref<16x32xbf16, #tpu.memory_space<vmem>>, vector<16x32xbf16>
    %c0_4 = arith.constant 0 : index
    %c0_5 = arith.constant 0 : index
    %5 = vector.load %arg4[%c0_4, %c0_5] : memref<32x128xbf16, #tpu.memory_space<vmem>>, vector<32x128xbf16>
    %cst = arith.constant dense<0.000000e+00> : vector<16x128xf32>
    %6 = tpu.matmul %4, %5, %cst {dimension_numbers = #tpu.dot_dimension_numbers<[1], [0], [0], [1], [0, 0, 1, 1], [], []>} : vector<16x32xbf16>, vector<32x128xbf16>, vector<16x128xf32> -> vector<16x128xf32>
    %7 = arith.addf %3, %6 : vector<16x128xf32>
    %c0_6 = arith.constant 0 : index
    %c0_7 = arith.constant 0 : index
    %8 = vector.load %arg6[%c0_6, %c0_7] : memref<16x128xf32, #tpu.memory_space<vmem>>, vector<16x128xf32>
    tpu.vector_store %arg6[%c0_6, %c0_7], %7 {strides = array<i32>} : memref<16x128xf32, #tpu.memory_space<vmem>>, vector<16x128xf32>,
    %c0_i32_8 = arith.constant 0 : i32
    %9 = arith.cmpi eq, %arg2, %c0_i32_8 : i32
    %10 = arith.extui %9 : i1 to i32
    %c0_i32_9 = arith.constant 0 : i32
    %11 = arith.cmpi ne, %10, %c0_i32_9 : i32
    scf.if %11 {
      %c0_10 = arith.constant 0 : index
      %c0_11 = arith.constant 0 : index
      %12 = vector.load %arg6[%c0_10, %c0_11] : memref<16x128xf32, #tpu.memory_space<vmem>>, vector<16x128xf32>
      %c0_12 = arith.constant 0 : index
      %c0_13 = arith.constant 0 : index
      %13 = vector.load %arg5[%c0_12, %c0_13] : memref<1x128xf32, #tpu.memory_space<vmem>>, vector<1x128xf32>
      %14 = vector.broadcast %13 : vector<1x128xf32> to vector<16x128xf32>
      %15 = arith.addf %12, %14 : vector<16x128xf32>
      %c0_14 = arith.constant 0 : index
      %c0_15 = arith.constant 0 : index
      %16 = vector.load %arg6[%c0_14, %c0_15] : memref<16x128xf32, #tpu.memory_space<vmem>>, vector<16x128xf32>
      tpu.vector_store %arg6[%c0_14, %c0_15], %15 {strides = array<i32>} : memref<16x128xf32, #tpu.memory_space<vmem>>, vector<16x128xf32>,
    } else {
    }
    return
  }
  func.func @transform_0(%arg0: i32, %arg1: i32, %arg2: i32) -> (i32, i32) {
    %c0_i32 = arith.constant 0 : i32
    return %arg0, %arg2 : i32, i32
  }
  func.func @transform_1(%arg0: i32, %arg1: i32, %arg2: i32) -> (i32, i32) {
    %c0_i32 = arith.constant 0 : i32
    return %arg2, %arg1 : i32, i32
  }
  func.func @transform_2(%arg0: i32, %arg1: i32, %arg2: i32) -> (i32, i32) {
    %c0_i32 = arith.constant 0 : i32
    %c0_i32_0 = arith.constant 0 : i32
    return %c0_i32, %arg1 : i32, i32
  }
  func.func @transform_3(%arg0: i32, %arg1: i32, %arg2: i32) -> (i32, i32) {
    %c0_i32 = arith.constant 0 : i32
    return %arg0, %arg1 : i32, i32
  }
}

module attributes {stable_mosaic.version = 11 : i64} {
  func.func @_dense_kernel(%arg0: i32, %arg1: i32, %arg2: i32, %arg3: memref<16x32xbf16, #tpu.memory_space<vmem>>, %arg4: memref<32x128xbf16, #tpu.memory_space<vmem>>, %arg5: memref<1x128xf32, #tpu.memory_space<vmem>>, %arg6: memref<16x128xf32, #tpu.memory_space<vmem>>) attributes {dimension_semantics = [#tpu.dimension_semantics<parallel>, #tpu.dimension_semantics<parallel>, #tpu.dimension_semantics<arbitrary>], iteration_bounds = array<i64: 1, 1, 1>, scalar_prefetch = 0 : i64, scratch_operands = 0 : i64, tpu.core_type = #tpu.core_type<tc>, window_params = [{transform_indices = @transform_0, window_bounds = array<i64: 16, 32>}, {transform_indices = @transform_1, window_bounds = array<i64: 32, 128>}, {transform_indices = @transform_2, window_bounds = array<i64: 1, 128>}, {transform_indices = @transform_3, window_bounds = array<i64: 16, 128>}]} {
    %c0_i32 = arith.constant 0 : i32
    %0 = arith.cmpi eq, %arg2, %c0_i32 : i32
    %1 = arith.extui %0 : i1 to i32
    %c0_i32_0 = arith.constant 0 : i32
    %2 = arith.cmpi ne, %1, %c0_i32_0 : i32
    scf.if %2 {
      %cst_10 = arith.constant 0.000000e+00 : f32
      %12 = vector.broadcast %cst_10 : f32 to vector<16x128xf32>
      %c0_11 = arith.constant 0 : index
      %c0_12 = arith.constant 0 : index
      %13 = vector.load %arg6[%c0_11, %c0_12] : memref<16x128xf32, #tpu.memory_space<vmem>>, vector<16x128xf32>
      tpu.vector_store %arg6[%c0_11, %c0_12], %12 {strides = array<i32>} : memref<16x128xf32, #tpu.memory_space<vmem>>, vector<16x128xf32>,
    } else {
    }
    %c0 = arith.constant 0 : index
    %c0_1 = arith.constant 0 : index
    %3 = vector.load %arg6[%c0, %c0_1] : memref<16x128xf32, #tpu.memory_space<vmem>>, vector<16x128xf32>
    %c0_2 = arith.constant 0 : index
    %c0_3 = arith.constant 0 : index
    %4 = vector.load %arg3[%c0_2, %c0_3] : memref<16x32xbf16, #tpu.memory_space<vmem>>, vector<16x32xbf16>
    %c0_4 = arith.constant 0 : index
    %c0_5 = arith.constant 0 : index
    %5 = vector.load %arg4[%c0_4, %c0_5] : memref<32x128xbf16, #tpu.memory_space<vmem>>, vector<32x128xbf16>
    %cst = arith.constant dense<0.000000e+00> : vector<16x128xf32>
    %6 = tpu.matmul %4, %5, %cst {dimension_numbers = #tpu.dot_dimension_numbers<[1], [0], [0], [1], [0, 0, 1, 1], [], []>} : vector<16x32xbf16>, vector<32x128xbf16>, vector<16x128xf32> -> vector<16x128xf32>
    %7 = arith.addf %3, %6 : vector<16x128xf32>
    %c0_6 = arith.constant 0 : index
    %c0_7 = arith.constant 0 : index
    %8 = vector.load %arg6[%c0_6, %c0_7] : memref<16x128xf32, #tpu.memory_space<vmem>>, vector<16x128xf32>
    tpu.vector_store %arg6[%c0_6, %c0_7], %7 {strides = array<i32>} : memref<16x128xf32, #tpu.memory_space<vmem>>, vector<16x128xf32>,
    %c0_i32_8 = arith.constant 0 : i32
    %9 = arith.cmpi eq, %arg2, %c0_i32_8 : i32
    %10 = arith.extui %9 : i1 to i32
    %c0_i32_9 = arith.constant 0 : i32
    %11 = arith.cmpi ne, %10, %c0_i32_9 : i32
    scf.if %11 {
      %c0_10 = arith.constant 0 : index
      %c0_11 = arith.constant 0 : index
      %12 = vector.load %arg6[%c0_10, %c0_11] : memref<16x128xf32, #tpu.memory_space<vmem>>, vector<16x128xf32>
      %c0_12 = arith.constant 0 : index
      %c0_13 = arith.constant 0 : index
      %13 = vector.load %arg5[%c0_12, %c0_13] : memref<1x128xf32, #tpu.memory_space<vmem>>, vector<1x128xf32>
      %14 = vector.broadcast %13 : vector<1x128xf32> to vector<16x128xf32>
      %15 = arith.addf %12, %14 : vector<16x128xf32>
      %c0_14 = arith.constant 0 : index
      %c0_15 = arith.constant 0 : index
      %16 = vector.load %arg6[%c0_14, %c0_15] : memref<16x128xf32, #tpu.memory_space<vmem>>, vector<16x128xf32>
      tpu.vector_store %arg6[%c0_14, %c0_15], %15 {strides = array<i32>} : memref<16x128xf32, #tpu.memory_space<vmem>>, vector<16x128xf32>,
    } else {
    }
    return
  }
  func.func @transform_0(%arg0: i32, %arg1: i32, %arg2: i32) -> (i32, i32) {
    %c0_i32 = arith.constant 0 : i32
    return %arg0, %arg2 : i32, i32
  }
  func.func @transform_1(%arg0: i32, %arg1: i32, %arg2: i32) -> (i32, i32) {
    %c0_i32 = arith.constant 0 : i32
    return %arg2, %arg1 : i32, i32
  }
  func.func @transform_2(%arg0: i32, %arg1: i32, %arg2: i32) -> (i32, i32) {
    %c0_i32 = arith.constant 0 : i32
    %c0_i32_0 = arith.constant 0 : i32
    return %c0_i32, %arg1 : i32, i32
  }
  func.func @transform_3(%arg0: i32, %arg1: i32, %arg2: i32) -> (i32, i32) {
    %c0_i32 = arith.constant 0 : i32
    return %arg0, %arg1 : i32, i32
  }
}

module attributes {stable_mosaic.version = 11 : i64} {
  func.func @_lstm_recur_kernel(%arg0: i32, %arg1: i32, %arg2: memref<2x8x128xf32, #tpu.memory_space<vmem>>, %arg3: memref<32x128xbf16, #tpu.memory_space<vmem>>, %arg4: memref<2x32xf32, #tpu.memory_space<vmem>>, %arg5: memref<2x32xf32, #tpu.memory_space<vmem>>, %arg6: memref<2x8x32xbf16, #tpu.memory_space<vmem>>, %arg7: memref<2x32xf32, #tpu.memory_space<vmem>>, %arg8: memref<2x32xf32, #tpu.memory_space<vmem>>, %arg9: memref<2x32xf32, #tpu.memory_space<vmem>>, %arg10: memref<2x32xf32, #tpu.memory_space<vmem>>) attributes {dimension_semantics = [#tpu.dimension_semantics<parallel>, #tpu.dimension_semantics<arbitrary>], iteration_bounds = array<i64: 1, 1>, scalar_prefetch = 0 : i64, scratch_operands = 2 : i64, tpu.core_type = #tpu.core_type<tc>, window_params = [{transform_indices = @transform_0, window_bounds = array<i64: 2, 8, 128>}, {pipeline_mode = #tpu.pipeline_mode<synchronous>, transform_indices = @transform_1, window_bounds = array<i64: 32, 128>}, {transform_indices = @transform_2, window_bounds = array<i64: 2, 32>}, {transform_indices = @transform_3, window_bounds = array<i64: 2, 32>}, {transform_indices = @transform_4, window_bounds = array<i64: 2, 8, 32>}, {transform_indices = @transform_5, window_bounds = array<i64: 2, 32>}, {transform_indices = @transform_6, window_bounds = array<i64: 2, 32>}]} {
    %c0_i32 = arith.constant 0 : i32
    %0 = arith.cmpi eq, %arg1, %c0_i32 : i32
    %1 = arith.extui %0 : i1 to i32
    %c0_i32_0 = arith.constant 0 : i32
    %2 = arith.cmpi ne, %1, %c0_i32_0 : i32
    scf.if %2 {
      %c0_76 = arith.constant 0 : index
      %c0_77 = arith.constant 0 : index
      %291 = vector.load %arg4[%c0_76, %c0_77] : memref<2x32xf32, #tpu.memory_space<vmem>>, vector<2x32xf32>
      %c0_78 = arith.constant 0 : index
      %c0_79 = arith.constant 0 : index
      %292 = vector.load %arg9[%c0_78, %c0_79] : memref<2x32xf32, #tpu.memory_space<vmem>>, vector<2x32xf32>
      tpu.vector_store %arg9[%c0_78, %c0_79], %291 {strides = array<i32>} : memref<2x32xf32, #tpu.memory_space<vmem>>, vector<2x32xf32>,
      %c0_80 = arith.constant 0 : index
      %c0_81 = arith.constant 0 : index
      %293 = vector.load %arg5[%c0_80, %c0_81] : memref<2x32xf32, #tpu.memory_space<vmem>>, vector<2x32xf32>
      %c0_82 = arith.constant 0 : index
      %c0_83 = arith.constant 0 : index
      %294 = vector.load %arg10[%c0_82, %c0_83] : memref<2x32xf32, #tpu.memory_space<vmem>>, vector<2x32xf32>
      tpu.vector_store %arg10[%c0_82, %c0_83], %293 {strides = array<i32>} : memref<2x32xf32, #tpu.memory_space<vmem>>, vector<2x32xf32>,
    } else {
    }
    %c0 = arith.constant 0 : index
    %c0_1 = arith.constant 0 : index
    %3 = vector.load %arg3[%c0, %c0_1] : memref<32x128xbf16, #tpu.memory_space<vmem>>, vector<32x128xbf16>
    %c0_2 = arith.constant 0 : index
    %c0_3 = arith.constant 0 : index
    %4 = vector.load %arg9[%c0_2, %c0_3] : memref<2x32xf32, #tpu.memory_space<vmem>>, vector<2x32xf32>
    %c0_4 = arith.constant 0 : index
    %c0_5 = arith.constant 0 : index
    %5 = vector.load %arg10[%c0_4, %c0_5] : memref<2x32xf32, #tpu.memory_space<vmem>>, vector<2x32xf32>
    %c0_i32_6 = arith.constant 0 : i32
    %c0_7 = arith.constant 0 : index
    %6 = arith.index_cast %c0_i32_6 : i32 to index
    %c0_8 = arith.constant 0 : index
    %7 = vector.load %arg2[%c0_7, %6, %c0_8] : memref<2x8x128xf32, #tpu.memory_space<vmem>>, vector<2x1x128xf32>
    %8 = vector.shape_cast %7 : vector<2x1x128xf32> to vector<2x128xf32>
    %9 = arith.truncf %4 : vector<2x32xf32> to vector<2x32xbf16>
    %cst = arith.constant dense<0.000000e+00> : vector<2x128xf32>
    %10 = tpu.matmul %9, %3, %cst {dimension_numbers = #tpu.dot_dimension_numbers<[1], [0], [0], [1], [0, 0, 1, 1], [], []>} : vector<2x32xbf16>, vector<32x128xbf16>, vector<2x128xf32> -> vector<2x128xf32>
    %11 = arith.addf %8, %10 : vector<2x128xf32>
    %12 = vector.extract_strided_slice %11 {offsets = [0, 0], sizes = [2, 32], strides = [1, 1]} : vector<2x128xf32> to vector<2x32xf32>
    %13 = arith.negf %12 : vector<2x32xf32>
    %14 = math.exp %13 : vector<2x32xf32>
    %cst_9 = arith.constant 1.000000e+00 : f32
    %15 = vector.broadcast %cst_9 : f32 to vector<2x32xf32>
    %16 = arith.addf %15, %14 : vector<2x32xf32>
    %17 = arith.divf %15, %16 : vector<2x32xf32>
    %18 = vector.extract_strided_slice %11 {offsets = [0, 32], sizes = [2, 32], strides = [1, 1]} : vector<2x128xf32> to vector<2x32xf32>
    %19 = arith.negf %18 : vector<2x32xf32>
    %20 = math.exp %19 : vector<2x32xf32>
    %cst_10 = arith.constant 1.000000e+00 : f32
    %21 = vector.broadcast %cst_10 : f32 to vector<2x32xf32>
    %22 = arith.addf %21, %20 : vector<2x32xf32>
    %23 = arith.divf %21, %22 : vector<2x32xf32>
    %24 = vector.extract_strided_slice %11 {offsets = [0, 64], sizes = [2, 32], strides = [1, 1]} : vector<2x128xf32> to vector<2x32xf32>
    %25 = math.tanh %24 : vector<2x32xf32>
    %26 = vector.extract_strided_slice %11 {offsets = [0, 96], sizes = [2, 32], strides = [1, 1]} : vector<2x128xf32> to vector<2x32xf32>
    %27 = arith.negf %26 : vector<2x32xf32>
    %28 = math.exp %27 : vector<2x32xf32>
    %cst_11 = arith.constant 1.000000e+00 : f32
    %29 = vector.broadcast %cst_11 : f32 to vector<2x32xf32>
    %30 = arith.addf %29, %28 : vector<2x32xf32>
    %31 = arith.divf %29, %30 : vector<2x32xf32>
    %32 = arith.mulf %23, %5 : vector<2x32xf32>
    %33 = arith.mulf %17, %25 : vector<2x32xf32>
    %34 = arith.addf %32, %33 : vector<2x32xf32>
    %35 = math.tanh %34 : vector<2x32xf32>
    %36 = arith.mulf %31, %35 : vector<2x32xf32>
    %37 = arith.truncf %36 : vector<2x32xf32> to vector<2x32xbf16>
    %38 = vector.shape_cast %37 : vector<2x32xbf16> to vector<2x1x32xbf16>
    %c0_12 = arith.constant 0 : index
    %39 = arith.index_cast %c0_i32_6 : i32 to index
    %c0_13 = arith.constant 0 : index
    %40 = vector.load %arg6[%c0_12, %39, %c0_13] : memref<2x8x32xbf16, #tpu.memory_space<vmem>>, vector<2x1x32xbf16>
    tpu.vector_store %arg6[%c0_12, %39, %c0_13], %38 {strides = array<i32>} : memref<2x8x32xbf16, #tpu.memory_space<vmem>>, vector<2x1x32xbf16>,
    %c1_i32 = arith.constant 1 : i32
    %c0_14 = arith.constant 0 : index
    %41 = arith.index_cast %c1_i32 : i32 to index
    %c0_15 = arith.constant 0 : index
    %42 = vector.load %arg2[%c0_14, %41, %c0_15] : memref<2x8x128xf32, #tpu.memory_space<vmem>>, vector<2x1x128xf32>
    %43 = vector.shape_cast %42 : vector<2x1x128xf32> to vector<2x128xf32>
    %44 = arith.truncf %36 : vector<2x32xf32> to vector<2x32xbf16>
    %cst_16 = arith.constant dense<0.000000e+00> : vector<2x128xf32>
    %45 = tpu.matmul %44, %3, %cst_16 {dimension_numbers = #tpu.dot_dimension_numbers<[1], [0], [0], [1], [0, 0, 1, 1], [], []>} : vector<2x32xbf16>, vector<32x128xbf16>, vector<2x128xf32> -> vector<2x128xf32>
    %46 = arith.addf %43, %45 : vector<2x128xf32>
    %47 = vector.extract_strided_slice %46 {offsets = [0, 0], sizes = [2, 32], strides = [1, 1]} : vector<2x128xf32> to vector<2x32xf32>
    %48 = arith.negf %47 : vector<2x32xf32>
    %49 = math.exp %48 : vector<2x32xf32>
    %cst_17 = arith.constant 1.000000e+00 : f32
    %50 = vector.broadcast %cst_17 : f32 to vector<2x32xf32>
    %51 = arith.addf %50, %49 : vector<2x32xf32>
    %52 = arith.divf %50, %51 : vector<2x32xf32>
    %53 = vector.extract_strided_slice %46 {offsets = [0, 32], sizes = [2, 32], strides = [1, 1]} : vector<2x128xf32> to vector<2x32xf32>
    %54 = arith.negf %53 : vector<2x32xf32>
    %55 = math.exp %54 : vector<2x32xf32>
    %cst_18 = arith.constant 1.000000e+00 : f32
    %56 = vector.broadcast %cst_18 : f32 to vector<2x32xf32>
    %57 = arith.addf %56, %55 : vector<2x32xf32>
    %58 = arith.divf %56, %57 : vector<2x32xf32>
    %59 = vector.extract_strided_slice %46 {offsets = [0, 64], sizes = [2, 32], strides = [1, 1]} : vector<2x128xf32> to vector<2x32xf32>
    %60 = math.tanh %59 : vector<2x32xf32>
    %61 = vector.extract_strided_slice %46 {offsets = [0, 96], sizes = [2, 32], strides = [1, 1]} : vector<2x128xf32> to vector<2x32xf32>
    %62 = arith.negf %61 : vector<2x32xf32>
    %63 = math.exp %62 : vector<2x32xf32>
    %cst_19 = arith.constant 1.000000e+00 : f32
    %64 = vector.broadcast %cst_19 : f32 to vector<2x32xf32>
    %65 = arith.addf %64, %63 : vector<2x32xf32>
    %66 = arith.divf %64, %65 : vector<2x32xf32>
    %67 = arith.mulf %58, %34 : vector<2x32xf32>
    %68 = arith.mulf %52, %60 : vector<2x32xf32>
    %69 = arith.addf %67, %68 : vector<2x32xf32>
    %70 = math.tanh %69 : vector<2x32xf32>
    %71 = arith.mulf %66, %70 : vector<2x32xf32>
    %72 = arith.truncf %71 : vector<2x32xf32> to vector<2x32xbf16>
    %73 = vector.shape_cast %72 : vector<2x32xbf16> to vector<2x1x32xbf16>
    %c0_20 = arith.constant 0 : index
    %74 = arith.index_cast %c1_i32 : i32 to index
    %c0_21 = arith.constant 0 : index
    %75 = vector.load %arg6[%c0_20, %74, %c0_21] : memref<2x8x32xbf16, #tpu.memory_space<vmem>>, vector<2x1x32xbf16>
    tpu.vector_store %arg6[%c0_20, %74, %c0_21], %73 {strides = array<i32>} : memref<2x8x32xbf16, #tpu.memory_space<vmem>>, vector<2x1x32xbf16>,
    %c2_i32 = arith.constant 2 : i32
    %c0_22 = arith.constant 0 : index
    %76 = arith.index_cast %c2_i32 : i32 to index
    %c0_23 = arith.constant 0 : index
    %77 = vector.load %arg2[%c0_22, %76, %c0_23] : memref<2x8x128xf32, #tpu.memory_space<vmem>>, vector<2x1x128xf32>
    %78 = vector.shape_cast %77 : vector<2x1x128xf32> to vector<2x128xf32>
    %79 = arith.truncf %71 : vector<2x32xf32> to vector<2x32xbf16>
    %cst_24 = arith.constant dense<0.000000e+00> : vector<2x128xf32>
    %80 = tpu.matmul %79, %3, %cst_24 {dimension_numbers = #tpu.dot_dimension_numbers<[1], [0], [0], [1], [0, 0, 1, 1], [], []>} : vector<2x32xbf16>, vector<32x128xbf16>, vector<2x128xf32> -> vector<2x128xf32>
    %81 = arith.addf %78, %80 : vector<2x128xf32>
    %82 = vector.extract_strided_slice %81 {offsets = [0, 0], sizes = [2, 32], strides = [1, 1]} : vector<2x128xf32> to vector<2x32xf32>
    %83 = arith.negf %82 : vector<2x32xf32>
    %84 = math.exp %83 : vector<2x32xf32>
    %cst_25 = arith.constant 1.000000e+00 : f32
    %85 = vector.broadcast %cst_25 : f32 to vector<2x32xf32>
    %86 = arith.addf %85, %84 : vector<2x32xf32>
    %87 = arith.divf %85, %86 : vector<2x32xf32>
    %88 = vector.extract_strided_slice %81 {offsets = [0, 32], sizes = [2, 32], strides = [1, 1]} : vector<2x128xf32> to vector<2x32xf32>
    %89 = arith.negf %88 : vector<2x32xf32>
    %90 = math.exp %89 : vector<2x32xf32>
    %cst_26 = arith.constant 1.000000e+00 : f32
    %91 = vector.broadcast %cst_26 : f32 to vector<2x32xf32>
    %92 = arith.addf %91, %90 : vector<2x32xf32>
    %93 = arith.divf %91, %92 : vector<2x32xf32>
    %94 = vector.extract_strided_slice %81 {offsets = [0, 64], sizes = [2, 32], strides = [1, 1]} : vector<2x128xf32> to vector<2x32xf32>
    %95 = math.tanh %94 : vector<2x32xf32>
    %96 = vector.extract_strided_slice %81 {offsets = [0, 96], sizes = [2, 32], strides = [1, 1]} : vector<2x128xf32> to vector<2x32xf32>
    %97 = arith.negf %96 : vector<2x32xf32>
    %98 = math.exp %97 : vector<2x32xf32>
    %cst_27 = arith.constant 1.000000e+00 : f32
    %99 = vector.broadcast %cst_27 : f32 to vector<2x32xf32>
    %100 = arith.addf %99, %98 : vector<2x32xf32>
    %101 = arith.divf %99, %100 : vector<2x32xf32>
    %102 = arith.mulf %93, %69 : vector<2x32xf32>
    %103 = arith.mulf %87, %95 : vector<2x32xf32>
    %104 = arith.addf %102, %103 : vector<2x32xf32>
    %105 = math.tanh %104 : vector<2x32xf32>
    %106 = arith.mulf %101, %105 : vector<2x32xf32>
    %107 = arith.truncf %106 : vector<2x32xf32> to vector<2x32xbf16>
    %108 = vector.shape_cast %107 : vector<2x32xbf16> to vector<2x1x32xbf16>
    %c0_28 = arith.constant 0 : index
    %109 = arith.index_cast %c2_i32 : i32 to index
    %c0_29 = arith.constant 0 : index
    %110 = vector.load %arg6[%c0_28, %109, %c0_29] : memref<2x8x32xbf16, #tpu.memory_space<vmem>>, vector<2x1x32xbf16>
    tpu.vector_store %arg6[%c0_28, %109, %c0_29], %108 {strides = array<i32>} : memref<2x8x32xbf16, #tpu.memory_space<vmem>>, vector<2x1x32xbf16>,
    %c3_i32 = arith.constant 3 : i32
    %c0_30 = arith.constant 0 : index
    %111 = arith.index_cast %c3_i32 : i32 to index
    %c0_31 = arith.constant 0 : index
    %112 = vector.load %arg2[%c0_30, %111, %c0_31] : memref<2x8x128xf32, #tpu.memory_space<vmem>>, vector<2x1x128xf32>
    %113 = vector.shape_cast %112 : vector<2x1x128xf32> to vector<2x128xf32>
    %114 = arith.truncf %106 : vector<2x32xf32> to vector<2x32xbf16>
    %cst_32 = arith.constant dense<0.000000e+00> : vector<2x128xf32>
    %115 = tpu.matmul %114, %3, %cst_32 {dimension_numbers = #tpu.dot_dimension_numbers<[1], [0], [0], [1], [0, 0, 1, 1], [], []>} : vector<2x32xbf16>, vector<32x128xbf16>, vector<2x128xf32> -> vector<2x128xf32>
    %116 = arith.addf %113, %115 : vector<2x128xf32>
    %117 = vector.extract_strided_slice %116 {offsets = [0, 0], sizes = [2, 32], strides = [1, 1]} : vector<2x128xf32> to vector<2x32xf32>
    %118 = arith.negf %117 : vector<2x32xf32>
    %119 = math.exp %118 : vector<2x32xf32>
    %cst_33 = arith.constant 1.000000e+00 : f32
    %120 = vector.broadcast %cst_33 : f32 to vector<2x32xf32>
    %121 = arith.addf %120, %119 : vector<2x32xf32>
    %122 = arith.divf %120, %121 : vector<2x32xf32>
    %123 = vector.extract_strided_slice %116 {offsets = [0, 32], sizes = [2, 32], strides = [1, 1]} : vector<2x128xf32> to vector<2x32xf32>
    %124 = arith.negf %123 : vector<2x32xf32>
    %125 = math.exp %124 : vector<2x32xf32>
    %cst_34 = arith.constant 1.000000e+00 : f32
    %126 = vector.broadcast %cst_34 : f32 to vector<2x32xf32>
    %127 = arith.addf %126, %125 : vector<2x32xf32>
    %128 = arith.divf %126, %127 : vector<2x32xf32>
    %129 = vector.extract_strided_slice %116 {offsets = [0, 64], sizes = [2, 32], strides = [1, 1]} : vector<2x128xf32> to vector<2x32xf32>
    %130 = math.tanh %129 : vector<2x32xf32>
    %131 = vector.extract_strided_slice %116 {offsets = [0, 96], sizes = [2, 32], strides = [1, 1]} : vector<2x128xf32> to vector<2x32xf32>
    %132 = arith.negf %131 : vector<2x32xf32>
    %133 = math.exp %132 : vector<2x32xf32>
    %cst_35 = arith.constant 1.000000e+00 : f32
    %134 = vector.broadcast %cst_35 : f32 to vector<2x32xf32>
    %135 = arith.addf %134, %133 : vector<2x32xf32>
    %136 = arith.divf %134, %135 : vector<2x32xf32>
    %137 = arith.mulf %128, %104 : vector<2x32xf32>
    %138 = arith.mulf %122, %130 : vector<2x32xf32>
    %139 = arith.addf %137, %138 : vector<2x32xf32>
    %140 = math.tanh %139 : vector<2x32xf32>
    %141 = arith.mulf %136, %140 : vector<2x32xf32>
    %142 = arith.truncf %141 : vector<2x32xf32> to vector<2x32xbf16>
    %143 = vector.shape_cast %142 : vector<2x32xbf16> to vector<2x1x32xbf16>
    %c0_36 = arith.constant 0 : index
    %144 = arith.index_cast %c3_i32 : i32 to index
    %c0_37 = arith.constant 0 : index
    %145 = vector.load %arg6[%c0_36, %144, %c0_37] : memref<2x8x32xbf16, #tpu.memory_space<vmem>>, vector<2x1x32xbf16>
    tpu.vector_store %arg6[%c0_36, %144, %c0_37], %143 {strides = array<i32>} : memref<2x8x32xbf16, #tpu.memory_space<vmem>>, vector<2x1x32xbf16>,
    %c4_i32 = arith.constant 4 : i32
    %c0_38 = arith.constant 0 : index
    %146 = arith.index_cast %c4_i32 : i32 to index
    %c0_39 = arith.constant 0 : index
    %147 = vector.load %arg2[%c0_38, %146, %c0_39] : memref<2x8x128xf32, #tpu.memory_space<vmem>>, vector<2x1x128xf32>
    %148 = vector.shape_cast %147 : vector<2x1x128xf32> to vector<2x128xf32>
    %149 = arith.truncf %141 : vector<2x32xf32> to vector<2x32xbf16>
    %cst_40 = arith.constant dense<0.000000e+00> : vector<2x128xf32>
    %150 = tpu.matmul %149, %3, %cst_40 {dimension_numbers = #tpu.dot_dimension_numbers<[1], [0], [0], [1], [0, 0, 1, 1], [], []>} : vector<2x32xbf16>, vector<32x128xbf16>, vector<2x128xf32> -> vector<2x128xf32>
    %151 = arith.addf %148, %150 : vector<2x128xf32>
    %152 = vector.extract_strided_slice %151 {offsets = [0, 0], sizes = [2, 32], strides = [1, 1]} : vector<2x128xf32> to vector<2x32xf32>
    %153 = arith.negf %152 : vector<2x32xf32>
    %154 = math.exp %153 : vector<2x32xf32>
    %cst_41 = arith.constant 1.000000e+00 : f32
    %155 = vector.broadcast %cst_41 : f32 to vector<2x32xf32>
    %156 = arith.addf %155, %154 : vector<2x32xf32>
    %157 = arith.divf %155, %156 : vector<2x32xf32>
    %158 = vector.extract_strided_slice %151 {offsets = [0, 32], sizes = [2, 32], strides = [1, 1]} : vector<2x128xf32> to vector<2x32xf32>
    %159 = arith.negf %158 : vector<2x32xf32>
    %160 = math.exp %159 : vector<2x32xf32>
    %cst_42 = arith.constant 1.000000e+00 : f32
    %161 = vector.broadcast %cst_42 : f32 to vector<2x32xf32>
    %162 = arith.addf %161, %160 : vector<2x32xf32>
    %163 = arith.divf %161, %162 : vector<2x32xf32>
    %164 = vector.extract_strided_slice %151 {offsets = [0, 64], sizes = [2, 32], strides = [1, 1]} : vector<2x128xf32> to vector<2x32xf32>
    %165 = math.tanh %164 : vector<2x32xf32>
    %166 = vector.extract_strided_slice %151 {offsets = [0, 96], sizes = [2, 32], strides = [1, 1]} : vector<2x128xf32> to vector<2x32xf32>
    %167 = arith.negf %166 : vector<2x32xf32>
    %168 = math.exp %167 : vector<2x32xf32>
    %cst_43 = arith.constant 1.000000e+00 : f32
    %169 = vector.broadcast %cst_43 : f32 to vector<2x32xf32>
    %170 = arith.addf %169, %168 : vector<2x32xf32>
    %171 = arith.divf %169, %170 : vector<2x32xf32>
    %172 = arith.mulf %163, %139 : vector<2x32xf32>
    %173 = arith.mulf %157, %165 : vector<2x32xf32>
    %174 = arith.addf %172, %173 : vector<2x32xf32>
    %175 = math.tanh %174 : vector<2x32xf32>
    %176 = arith.mulf %171, %175 : vector<2x32xf32>
    %177 = arith.truncf %176 : vector<2x32xf32> to vector<2x32xbf16>
    %178 = vector.shape_cast %177 : vector<2x32xbf16> to vector<2x1x32xbf16>
    %c0_44 = arith.constant 0 : index
    %179 = arith.index_cast %c4_i32 : i32 to index
    %c0_45 = arith.constant 0 : index
    %180 = vector.load %arg6[%c0_44, %179, %c0_45] : memref<2x8x32xbf16, #tpu.memory_space<vmem>>, vector<2x1x32xbf16>
    tpu.vector_store %arg6[%c0_44, %179, %c0_45], %178 {strides = array<i32>} : memref<2x8x32xbf16, #tpu.memory_space<vmem>>, vector<2x1x32xbf16>,
    %c5_i32 = arith.constant 5 : i32
    %c0_46 = arith.constant 0 : index
    %181 = arith.index_cast %c5_i32 : i32 to index
    %c0_47 = arith.constant 0 : index
    %182 = vector.load %arg2[%c0_46, %181, %c0_47] : memref<2x8x128xf32, #tpu.memory_space<vmem>>, vector<2x1x128xf32>
    %183 = vector.shape_cast %182 : vector<2x1x128xf32> to vector<2x128xf32>
    %184 = arith.truncf %176 : vector<2x32xf32> to vector<2x32xbf16>
    %cst_48 = arith.constant dense<0.000000e+00> : vector<2x128xf32>
    %185 = tpu.matmul %184, %3, %cst_48 {dimension_numbers = #tpu.dot_dimension_numbers<[1], [0], [0], [1], [0, 0, 1, 1], [], []>} : vector<2x32xbf16>, vector<32x128xbf16>, vector<2x128xf32> -> vector<2x128xf32>
    %186 = arith.addf %183, %185 : vector<2x128xf32>
    %187 = vector.extract_strided_slice %186 {offsets = [0, 0], sizes = [2, 32], strides = [1, 1]} : vector<2x128xf32> to vector<2x32xf32>
    %188 = arith.negf %187 : vector<2x32xf32>
    %189 = math.exp %188 : vector<2x32xf32>
    %cst_49 = arith.constant 1.000000e+00 : f32
    %190 = vector.broadcast %cst_49 : f32 to vector<2x32xf32>
    %191 = arith.addf %190, %189 : vector<2x32xf32>
    %192 = arith.divf %190, %191 : vector<2x32xf32>
    %193 = vector.extract_strided_slice %186 {offsets = [0, 32], sizes = [2, 32], strides = [1, 1]} : vector<2x128xf32> to vector<2x32xf32>
    %194 = arith.negf %193 : vector<2x32xf32>
    %195 = math.exp %194 : vector<2x32xf32>
    %cst_50 = arith.constant 1.000000e+00 : f32
    %196 = vector.broadcast %cst_50 : f32 to vector<2x32xf32>
    %197 = arith.addf %196, %195 : vector<2x32xf32>
    %198 = arith.divf %196, %197 : vector<2x32xf32>
    %199 = vector.extract_strided_slice %186 {offsets = [0, 64], sizes = [2, 32], strides = [1, 1]} : vector<2x128xf32> to vector<2x32xf32>
    %200 = math.tanh %199 : vector<2x32xf32>
    %201 = vector.extract_strided_slice %186 {offsets = [0, 96], sizes = [2, 32], strides = [1, 1]} : vector<2x128xf32> to vector<2x32xf32>
    %202 = arith.negf %201 : vector<2x32xf32>
    %203 = math.exp %202 : vector<2x32xf32>
    %cst_51 = arith.constant 1.000000e+00 : f32
    %204 = vector.broadcast %cst_51 : f32 to vector<2x32xf32>
    %205 = arith.addf %204, %203 : vector<2x32xf32>
    %206 = arith.divf %204, %205 : vector<2x32xf32>
    %207 = arith.mulf %198, %174 : vector<2x32xf32>
    %208 = arith.mulf %192, %200 : vector<2x32xf32>
    %209 = arith.addf %207, %208 : vector<2x32xf32>
    %210 = math.tanh %209 : vector<2x32xf32>
    %211 = arith.mulf %206, %210 : vector<2x32xf32>
    %212 = arith.truncf %211 : vector<2x32xf32> to vector<2x32xbf16>
    %213 = vector.shape_cast %212 : vector<2x32xbf16> to vector<2x1x32xbf16>
    %c0_52 = arith.constant 0 : index
    %214 = arith.index_cast %c5_i32 : i32 to index
    %c0_53 = arith.constant 0 : index
    %215 = vector.load %arg6[%c0_52, %214, %c0_53] : memref<2x8x32xbf16, #tpu.memory_space<vmem>>, vector<2x1x32xbf16>
    tpu.vector_store %arg6[%c0_52, %214, %c0_53], %213 {strides = array<i32>} : memref<2x8x32xbf16, #tpu.memory_space<vmem>>, vector<2x1x32xbf16>,
    %c6_i32 = arith.constant 6 : i32
    %c0_54 = arith.constant 0 : index
    %216 = arith.index_cast %c6_i32 : i32 to index
    %c0_55 = arith.constant 0 : index
    %217 = vector.load %arg2[%c0_54, %216, %c0_55] : memref<2x8x128xf32, #tpu.memory_space<vmem>>, vector<2x1x128xf32>
    %218 = vector.shape_cast %217 : vector<2x1x128xf32> to vector<2x128xf32>
    %219 = arith.truncf %211 : vector<2x32xf32> to vector<2x32xbf16>
    %cst_56 = arith.constant dense<0.000000e+00> : vector<2x128xf32>
    %220 = tpu.matmul %219, %3, %cst_56 {dimension_numbers = #tpu.dot_dimension_numbers<[1], [0], [0], [1], [0, 0, 1, 1], [], []>} : vector<2x32xbf16>, vector<32x128xbf16>, vector<2x128xf32> -> vector<2x128xf32>
    %221 = arith.addf %218, %220 : vector<2x128xf32>
    %222 = vector.extract_strided_slice %221 {offsets = [0, 0], sizes = [2, 32], strides = [1, 1]} : vector<2x128xf32> to vector<2x32xf32>
    %223 = arith.negf %222 : vector<2x32xf32>
    %224 = math.exp %223 : vector<2x32xf32>
    %cst_57 = arith.constant 1.000000e+00 : f32
    %225 = vector.broadcast %cst_57 : f32 to vector<2x32xf32>
    %226 = arith.addf %225, %224 : vector<2x32xf32>
    %227 = arith.divf %225, %226 : vector<2x32xf32>
    %228 = vector.extract_strided_slice %221 {offsets = [0, 32], sizes = [2, 32], strides = [1, 1]} : vector<2x128xf32> to vector<2x32xf32>
    %229 = arith.negf %228 : vector<2x32xf32>
    %230 = math.exp %229 : vector<2x32xf32>
    %cst_58 = arith.constant 1.000000e+00 : f32
    %231 = vector.broadcast %cst_58 : f32 to vector<2x32xf32>
    %232 = arith.addf %231, %230 : vector<2x32xf32>
    %233 = arith.divf %231, %232 : vector<2x32xf32>
    %234 = vector.extract_strided_slice %221 {offsets = [0, 64], sizes = [2, 32], strides = [1, 1]} : vector<2x128xf32> to vector<2x32xf32>
    %235 = math.tanh %234 : vector<2x32xf32>
    %236 = vector.extract_strided_slice %221 {offsets = [0, 96], sizes = [2, 32], strides = [1, 1]} : vector<2x128xf32> to vector<2x32xf32>
    %237 = arith.negf %236 : vector<2x32xf32>
    %238 = math.exp %237 : vector<2x32xf32>
    %cst_59 = arith.constant 1.000000e+00 : f32
    %239 = vector.broadcast %cst_59 : f32 to vector<2x32xf32>
    %240 = arith.addf %239, %238 : vector<2x32xf32>
    %241 = arith.divf %239, %240 : vector<2x32xf32>
    %242 = arith.mulf %233, %209 : vector<2x32xf32>
    %243 = arith.mulf %227, %235 : vector<2x32xf32>
    %244 = arith.addf %242, %243 : vector<2x32xf32>
    %245 = math.tanh %244 : vector<2x32xf32>
    %246 = arith.mulf %241, %245 : vector<2x32xf32>
    %247 = arith.truncf %246 : vector<2x32xf32> to vector<2x32xbf16>
    %248 = vector.shape_cast %247 : vector<2x32xbf16> to vector<2x1x32xbf16>
    %c0_60 = arith.constant 0 : index
    %249 = arith.index_cast %c6_i32 : i32 to index
    %c0_61 = arith.constant 0 : index
    %250 = vector.load %arg6[%c0_60, %249, %c0_61] : memref<2x8x32xbf16, #tpu.memory_space<vmem>>, vector<2x1x32xbf16>
    tpu.vector_store %arg6[%c0_60, %249, %c0_61], %248 {strides = array<i32>} : memref<2x8x32xbf16, #tpu.memory_space<vmem>>, vector<2x1x32xbf16>,
    %c7_i32 = arith.constant 7 : i32
    %c0_62 = arith.constant 0 : index
    %251 = arith.index_cast %c7_i32 : i32 to index
    %c0_63 = arith.constant 0 : index
    %252 = vector.load %arg2[%c0_62, %251, %c0_63] : memref<2x8x128xf32, #tpu.memory_space<vmem>>, vector<2x1x128xf32>
    %253 = vector.shape_cast %252 : vector<2x1x128xf32> to vector<2x128xf32>
    %254 = arith.truncf %246 : vector<2x32xf32> to vector<2x32xbf16>
    %cst_64 = arith.constant dense<0.000000e+00> : vector<2x128xf32>
    %255 = tpu.matmul %254, %3, %cst_64 {dimension_numbers = #tpu.dot_dimension_numbers<[1], [0], [0], [1], [0, 0, 1, 1], [], []>} : vector<2x32xbf16>, vector<32x128xbf16>, vector<2x128xf32> -> vector<2x128xf32>
    %256 = arith.addf %253, %255 : vector<2x128xf32>
    %257 = vector.extract_strided_slice %256 {offsets = [0, 0], sizes = [2, 32], strides = [1, 1]} : vector<2x128xf32> to vector<2x32xf32>
    %258 = arith.negf %257 : vector<2x32xf32>
    %259 = math.exp %258 : vector<2x32xf32>
    %cst_65 = arith.constant 1.000000e+00 : f32
    %260 = vector.broadcast %cst_65 : f32 to vector<2x32xf32>
    %261 = arith.addf %260, %259 : vector<2x32xf32>
    %262 = arith.divf %260, %261 : vector<2x32xf32>
    %263 = vector.extract_strided_slice %256 {offsets = [0, 32], sizes = [2, 32], strides = [1, 1]} : vector<2x128xf32> to vector<2x32xf32>
    %264 = arith.negf %263 : vector<2x32xf32>
    %265 = math.exp %264 : vector<2x32xf32>
    %cst_66 = arith.constant 1.000000e+00 : f32
    %266 = vector.broadcast %cst_66 : f32 to vector<2x32xf32>
    %267 = arith.addf %266, %265 : vector<2x32xf32>
    %268 = arith.divf %266, %267 : vector<2x32xf32>
    %269 = vector.extract_strided_slice %256 {offsets = [0, 64], sizes = [2, 32], strides = [1, 1]} : vector<2x128xf32> to vector<2x32xf32>
    %270 = math.tanh %269 : vector<2x32xf32>
    %271 = vector.extract_strided_slice %256 {offsets = [0, 96], sizes = [2, 32], strides = [1, 1]} : vector<2x128xf32> to vector<2x32xf32>
    %272 = arith.negf %271 : vector<2x32xf32>
    %273 = math.exp %272 : vector<2x32xf32>
    %cst_67 = arith.constant 1.000000e+00 : f32
    %274 = vector.broadcast %cst_67 : f32 to vector<2x32xf32>
    %275 = arith.addf %274, %273 : vector<2x32xf32>
    %276 = arith.divf %274, %275 : vector<2x32xf32>
    %277 = arith.mulf %268, %244 : vector<2x32xf32>
    %278 = arith.mulf %262, %270 : vector<2x32xf32>
    %279 = arith.addf %277, %278 : vector<2x32xf32>
    %280 = math.tanh %279 : vector<2x32xf32>
    %281 = arith.mulf %276, %280 : vector<2x32xf32>
    %282 = arith.truncf %281 : vector<2x32xf32> to vector<2x32xbf16>
    %283 = vector.shape_cast %282 : vector<2x32xbf16> to vector<2x1x32xbf16>
    %c0_68 = arith.constant 0 : index
    %284 = arith.index_cast %c7_i32 : i32 to index
    %c0_69 = arith.constant 0 : index
    %285 = vector.load %arg6[%c0_68, %284, %c0_69] : memref<2x8x32xbf16, #tpu.memory_space<vmem>>, vector<2x1x32xbf16>
    tpu.vector_store %arg6[%c0_68, %284, %c0_69], %283 {strides = array<i32>} : memref<2x8x32xbf16, #tpu.memory_space<vmem>>, vector<2x1x32xbf16>,
    %c8_i32 = arith.constant 8 : i32
    %c0_70 = arith.constant 0 : index
    %c0_71 = arith.constant 0 : index
    %286 = vector.load %arg9[%c0_70, %c0_71] : memref<2x32xf32, #tpu.memory_space<vmem>>, vector<2x32xf32>
    tpu.vector_store %arg9[%c0_70, %c0_71], %281 {strides = array<i32>} : memref<2x32xf32, #tpu.memory_space<vmem>>, vector<2x32xf32>,
    %c0_72 = arith.constant 0 : index
    %c0_73 = arith.constant 0 : index
    %287 = vector.load %arg10[%c0_72, %c0_73] : memref<2x32xf32, #tpu.memory_space<vmem>>, vector<2x32xf32>
    tpu.vector_store %arg10[%c0_72, %c0_73], %279 {strides = array<i32>} : memref<2x32xf32, #tpu.memory_space<vmem>>, vector<2x32xf32>,
    %c0_i32_74 = arith.constant 0 : i32
    %288 = arith.cmpi eq, %arg1, %c0_i32_74 : i32
    %289 = arith.extui %288 : i1 to i32
    %c0_i32_75 = arith.constant 0 : i32
    %290 = arith.cmpi ne, %289, %c0_i32_75 : i32
    scf.if %290 {
      %c0_76 = arith.constant 0 : index
      %c0_77 = arith.constant 0 : index
      %291 = vector.load %arg7[%c0_76, %c0_77] : memref<2x32xf32, #tpu.memory_space<vmem>>, vector<2x32xf32>
      tpu.vector_store %arg7[%c0_76, %c0_77], %281 {strides = array<i32>} : memref<2x32xf32, #tpu.memory_space<vmem>>, vector<2x32xf32>,
      %c0_78 = arith.constant 0 : index
      %c0_79 = arith.constant 0 : index
      %292 = vector.load %arg8[%c0_78, %c0_79] : memref<2x32xf32, #tpu.memory_space<vmem>>, vector<2x32xf32>
      tpu.vector_store %arg8[%c0_78, %c0_79], %279 {strides = array<i32>} : memref<2x32xf32, #tpu.memory_space<vmem>>, vector<2x32xf32>,
    } else {
    }
    return
  }
  func.func @transform_0(%arg0: i32, %arg1: i32) -> (i32, i32, i32) {
    %c0_i32 = arith.constant 0 : i32
    %c0_i32_0 = arith.constant 0 : i32
    return %arg0, %arg1, %c0_i32 : i32, i32, i32
  }
  func.func @transform_1(%arg0: i32, %arg1: i32) -> (i32, i32) {
    %c0_i32 = arith.constant 0 : i32
    %c0_i32_0 = arith.constant 0 : i32
    %c0_i32_1 = arith.constant 0 : i32
    return %c0_i32, %c0_i32_0 : i32, i32
  }
  func.func @transform_2(%arg0: i32, %arg1: i32) -> (i32, i32) {
    %c0_i32 = arith.constant 0 : i32
    %c0_i32_0 = arith.constant 0 : i32
    return %arg0, %c0_i32 : i32, i32
  }
  func.func @transform_3(%arg0: i32, %arg1: i32) -> (i32, i32) {
    %c0_i32 = arith.constant 0 : i32
    %c0_i32_0 = arith.constant 0 : i32
    return %arg0, %c0_i32 : i32, i32
  }
  func.func @transform_4(%arg0: i32, %arg1: i32) -> (i32, i32, i32) {
    %c0_i32 = arith.constant 0 : i32
    %c0_i32_0 = arith.constant 0 : i32
    return %arg0, %arg1, %c0_i32 : i32, i32, i32
  }
  func.func @transform_5(%arg0: i32, %arg1: i32) -> (i32, i32) {
    %c0_i32 = arith.constant 0 : i32
    %c0_i32_0 = arith.constant 0 : i32
    return %arg0, %c0_i32 : i32, i32
  }
  func.func @transform_6(%arg0: i32, %arg1: i32) -> (i32, i32) {
    %c0_i32 = arith.constant 0 : i32
    %c0_i32_0 = arith.constant 0 : i32
    return %arg0, %c0_i32 : i32, i32
  }
}

module attributes {stable_mosaic.version = 11 : i64} {
  func.func @_lstm_recur_kernel(%arg0: i32, %arg1: i32, %arg2: memref<2x8x128xf32, #tpu.memory_space<vmem>>, %arg3: memref<32x128xbf16, #tpu.memory_space<vmem>>, %arg4: memref<2x32xf32, #tpu.memory_space<vmem>>, %arg5: memref<2x32xf32, #tpu.memory_space<vmem>>, %arg6: memref<2x8x32xbf16, #tpu.memory_space<vmem>>, %arg7: memref<2x32xf32, #tpu.memory_space<vmem>>, %arg8: memref<2x32xf32, #tpu.memory_space<vmem>>, %arg9: memref<2x32xf32, #tpu.memory_space<vmem>>, %arg10: memref<2x32xf32, #tpu.memory_space<vmem>>) attributes {dimension_semantics = [#tpu.dimension_semantics<parallel>, #tpu.dimension_semantics<arbitrary>], iteration_bounds = array<i64: 1, 1>, scalar_prefetch = 0 : i64, scratch_operands = 2 : i64, tpu.core_type = #tpu.core_type<tc>, window_params = [{transform_indices = @transform_0, window_bounds = array<i64: 2, 8, 128>}, {pipeline_mode = #tpu.pipeline_mode<synchronous>, transform_indices = @transform_1, window_bounds = array<i64: 32, 128>}, {transform_indices = @transform_2, window_bounds = array<i64: 2, 32>}, {transform_indices = @transform_3, window_bounds = array<i64: 2, 32>}, {transform_indices = @transform_4, window_bounds = array<i64: 2, 8, 32>}, {transform_indices = @transform_5, window_bounds = array<i64: 2, 32>}, {transform_indices = @transform_6, window_bounds = array<i64: 2, 32>}]} {
    %c0_i32 = arith.constant 0 : i32
    %0 = arith.cmpi eq, %arg1, %c0_i32 : i32
    %1 = arith.extui %0 : i1 to i32
    %c0_i32_0 = arith.constant 0 : i32
    %2 = arith.cmpi ne, %1, %c0_i32_0 : i32
    scf.if %2 {
      %c0_76 = arith.constant 0 : index
      %c0_77 = arith.constant 0 : index
      %291 = vector.load %arg4[%c0_76, %c0_77] : memref<2x32xf32, #tpu.memory_space<vmem>>, vector<2x32xf32>
      %c0_78 = arith.constant 0 : index
      %c0_79 = arith.constant 0 : index
      %292 = vector.load %arg9[%c0_78, %c0_79] : memref<2x32xf32, #tpu.memory_space<vmem>>, vector<2x32xf32>
      tpu.vector_store %arg9[%c0_78, %c0_79], %291 {strides = array<i32>} : memref<2x32xf32, #tpu.memory_space<vmem>>, vector<2x32xf32>,
      %c0_80 = arith.constant 0 : index
      %c0_81 = arith.constant 0 : index
      %293 = vector.load %arg5[%c0_80, %c0_81] : memref<2x32xf32, #tpu.memory_space<vmem>>, vector<2x32xf32>
      %c0_82 = arith.constant 0 : index
      %c0_83 = arith.constant 0 : index
      %294 = vector.load %arg10[%c0_82, %c0_83] : memref<2x32xf32, #tpu.memory_space<vmem>>, vector<2x32xf32>
      tpu.vector_store %arg10[%c0_82, %c0_83], %293 {strides = array<i32>} : memref<2x32xf32, #tpu.memory_space<vmem>>, vector<2x32xf32>,
    } else {
    }
    %c0 = arith.constant 0 : index
    %c0_1 = arith.constant 0 : index
    %3 = vector.load %arg3[%c0, %c0_1] : memref<32x128xbf16, #tpu.memory_space<vmem>>, vector<32x128xbf16>
    %c0_2 = arith.constant 0 : index
    %c0_3 = arith.constant 0 : index
    %4 = vector.load %arg9[%c0_2, %c0_3] : memref<2x32xf32, #tpu.memory_space<vmem>>, vector<2x32xf32>
    %c0_4 = arith.constant 0 : index
    %c0_5 = arith.constant 0 : index
    %5 = vector.load %arg10[%c0_4, %c0_5] : memref<2x32xf32, #tpu.memory_space<vmem>>, vector<2x32xf32>
    %c0_i32_6 = arith.constant 0 : i32
    %c0_7 = arith.constant 0 : index
    %6 = arith.index_cast %c0_i32_6 : i32 to index
    %c0_8 = arith.constant 0 : index
    %7 = vector.load %arg2[%c0_7, %6, %c0_8] : memref<2x8x128xf32, #tpu.memory_space<vmem>>, vector<2x1x128xf32>
    %8 = vector.shape_cast %7 : vector<2x1x128xf32> to vector<2x128xf32>
    %9 = arith.truncf %4 : vector<2x32xf32> to vector<2x32xbf16>
    %cst = arith.constant dense<0.000000e+00> : vector<2x128xf32>
    %10 = tpu.matmul %9, %3, %cst {dimension_numbers = #tpu.dot_dimension_numbers<[1], [0], [0], [1], [0, 0, 1, 1], [], []>} : vector<2x32xbf16>, vector<32x128xbf16>, vector<2x128xf32> -> vector<2x128xf32>
    %11 = arith.addf %8, %10 : vector<2x128xf32>
    %12 = vector.extract_strided_slice %11 {offsets = [0, 0], sizes = [2, 32], strides = [1, 1]} : vector<2x128xf32> to vector<2x32xf32>
    %13 = arith.negf %12 : vector<2x32xf32>
    %14 = math.exp %13 : vector<2x32xf32>
    %cst_9 = arith.constant 1.000000e+00 : f32
    %15 = vector.broadcast %cst_9 : f32 to vector<2x32xf32>
    %16 = arith.addf %15, %14 : vector<2x32xf32>
    %17 = arith.divf %15, %16 : vector<2x32xf32>
    %18 = vector.extract_strided_slice %11 {offsets = [0, 32], sizes = [2, 32], strides = [1, 1]} : vector<2x128xf32> to vector<2x32xf32>
    %19 = arith.negf %18 : vector<2x32xf32>
    %20 = math.exp %19 : vector<2x32xf32>
    %cst_10 = arith.constant 1.000000e+00 : f32
    %21 = vector.broadcast %cst_10 : f32 to vector<2x32xf32>
    %22 = arith.addf %21, %20 : vector<2x32xf32>
    %23 = arith.divf %21, %22 : vector<2x32xf32>
    %24 = vector.extract_strided_slice %11 {offsets = [0, 64], sizes = [2, 32], strides = [1, 1]} : vector<2x128xf32> to vector<2x32xf32>
    %25 = math.tanh %24 : vector<2x32xf32>
    %26 = vector.extract_strided_slice %11 {offsets = [0, 96], sizes = [2, 32], strides = [1, 1]} : vector<2x128xf32> to vector<2x32xf32>
    %27 = arith.negf %26 : vector<2x32xf32>
    %28 = math.exp %27 : vector<2x32xf32>
    %cst_11 = arith.constant 1.000000e+00 : f32
    %29 = vector.broadcast %cst_11 : f32 to vector<2x32xf32>
    %30 = arith.addf %29, %28 : vector<2x32xf32>
    %31 = arith.divf %29, %30 : vector<2x32xf32>
    %32 = arith.mulf %23, %5 : vector<2x32xf32>
    %33 = arith.mulf %17, %25 : vector<2x32xf32>
    %34 = arith.addf %32, %33 : vector<2x32xf32>
    %35 = math.tanh %34 : vector<2x32xf32>
    %36 = arith.mulf %31, %35 : vector<2x32xf32>
    %37 = arith.truncf %36 : vector<2x32xf32> to vector<2x32xbf16>
    %38 = vector.shape_cast %37 : vector<2x32xbf16> to vector<2x1x32xbf16>
    %c0_12 = arith.constant 0 : index
    %39 = arith.index_cast %c0_i32_6 : i32 to index
    %c0_13 = arith.constant 0 : index
    %40 = vector.load %arg6[%c0_12, %39, %c0_13] : memref<2x8x32xbf16, #tpu.memory_space<vmem>>, vector<2x1x32xbf16>
    tpu.vector_store %arg6[%c0_12, %39, %c0_13], %38 {strides = array<i32>} : memref<2x8x32xbf16, #tpu.memory_space<vmem>>, vector<2x1x32xbf16>,
    %c1_i32 = arith.constant 1 : i32
    %c0_14 = arith.constant 0 : index
    %41 = arith.index_cast %c1_i32 : i32 to index
    %c0_15 = arith.constant 0 : index
    %42 = vector.load %arg2[%c0_14, %41, %c0_15] : memref<2x8x128xf32, #tpu.memory_space<vmem>>, vector<2x1x128xf32>
    %43 = vector.shape_cast %42 : vector<2x1x128xf32> to vector<2x128xf32>
    %44 = arith.truncf %36 : vector<2x32xf32> to vector<2x32xbf16>
    %cst_16 = arith.constant dense<0.000000e+00> : vector<2x128xf32>
    %45 = tpu.matmul %44, %3, %cst_16 {dimension_numbers = #tpu.dot_dimension_numbers<[1], [0], [0], [1], [0, 0, 1, 1], [], []>} : vector<2x32xbf16>, vector<32x128xbf16>, vector<2x128xf32> -> vector<2x128xf32>
    %46 = arith.addf %43, %45 : vector<2x128xf32>
    %47 = vector.extract_strided_slice %46 {offsets = [0, 0], sizes = [2, 32], strides = [1, 1]} : vector<2x128xf32> to vector<2x32xf32>
    %48 = arith.negf %47 : vector<2x32xf32>
    %49 = math.exp %48 : vector<2x32xf32>
    %cst_17 = arith.constant 1.000000e+00 : f32
    %50 = vector.broadcast %cst_17 : f32 to vector<2x32xf32>
    %51 = arith.addf %50, %49 : vector<2x32xf32>
    %52 = arith.divf %50, %51 : vector<2x32xf32>
    %53 = vector.extract_strided_slice %46 {offsets = [0, 32], sizes = [2, 32], strides = [1, 1]} : vector<2x128xf32> to vector<2x32xf32>
    %54 = arith.negf %53 : vector<2x32xf32>
    %55 = math.exp %54 : vector<2x32xf32>
    %cst_18 = arith.constant 1.000000e+00 : f32
    %56 = vector.broadcast %cst_18 : f32 to vector<2x32xf32>
    %57 = arith.addf %56, %55 : vector<2x32xf32>
    %58 = arith.divf %56, %57 : vector<2x32xf32>
    %59 = vector.extract_strided_slice %46 {offsets = [0, 64], sizes = [2, 32], strides = [1, 1]} : vector<2x128xf32> to vector<2x32xf32>
    %60 = math.tanh %59 : vector<2x32xf32>
    %61 = vector.extract_strided_slice %46 {offsets = [0, 96], sizes = [2, 32], strides = [1, 1]} : vector<2x128xf32> to vector<2x32xf32>
    %62 = arith.negf %61 : vector<2x32xf32>
    %63 = math.exp %62 : vector<2x32xf32>
    %cst_19 = arith.constant 1.000000e+00 : f32
    %64 = vector.broadcast %cst_19 : f32 to vector<2x32xf32>
    %65 = arith.addf %64, %63 : vector<2x32xf32>
    %66 = arith.divf %64, %65 : vector<2x32xf32>
    %67 = arith.mulf %58, %34 : vector<2x32xf32>
    %68 = arith.mulf %52, %60 : vector<2x32xf32>
    %69 = arith.addf %67, %68 : vector<2x32xf32>
    %70 = math.tanh %69 : vector<2x32xf32>
    %71 = arith.mulf %66, %70 : vector<2x32xf32>
    %72 = arith.truncf %71 : vector<2x32xf32> to vector<2x32xbf16>
    %73 = vector.shape_cast %72 : vector<2x32xbf16> to vector<2x1x32xbf16>
    %c0_20 = arith.constant 0 : index
    %74 = arith.index_cast %c1_i32 : i32 to index
    %c0_21 = arith.constant 0 : index
    %75 = vector.load %arg6[%c0_20, %74, %c0_21] : memref<2x8x32xbf16, #tpu.memory_space<vmem>>, vector<2x1x32xbf16>
    tpu.vector_store %arg6[%c0_20, %74, %c0_21], %73 {strides = array<i32>} : memref<2x8x32xbf16, #tpu.memory_space<vmem>>, vector<2x1x32xbf16>,
    %c2_i32 = arith.constant 2 : i32
    %c0_22 = arith.constant 0 : index
    %76 = arith.index_cast %c2_i32 : i32 to index
    %c0_23 = arith.constant 0 : index
    %77 = vector.load %arg2[%c0_22, %76, %c0_23] : memref<2x8x128xf32, #tpu.memory_space<vmem>>, vector<2x1x128xf32>
    %78 = vector.shape_cast %77 : vector<2x1x128xf32> to vector<2x128xf32>
    %79 = arith.truncf %71 : vector<2x32xf32> to vector<2x32xbf16>
    %cst_24 = arith.constant dense<0.000000e+00> : vector<2x128xf32>
    %80 = tpu.matmul %79, %3, %cst_24 {dimension_numbers = #tpu.dot_dimension_numbers<[1], [0], [0], [1], [0, 0, 1, 1], [], []>} : vector<2x32xbf16>, vector<32x128xbf16>, vector<2x128xf32> -> vector<2x128xf32>
    %81 = arith.addf %78, %80 : vector<2x128xf32>
    %82 = vector.extract_strided_slice %81 {offsets = [0, 0], sizes = [2, 32], strides = [1, 1]} : vector<2x128xf32> to vector<2x32xf32>
    %83 = arith.negf %82 : vector<2x32xf32>
    %84 = math.exp %83 : vector<2x32xf32>
    %cst_25 = arith.constant 1.000000e+00 : f32
    %85 = vector.broadcast %cst_25 : f32 to vector<2x32xf32>
    %86 = arith.addf %85, %84 : vector<2x32xf32>
    %87 = arith.divf %85, %86 : vector<2x32xf32>
    %88 = vector.extract_strided_slice %81 {offsets = [0, 32], sizes = [2, 32], strides = [1, 1]} : vector<2x128xf32> to vector<2x32xf32>
    %89 = arith.negf %88 : vector<2x32xf32>
    %90 = math.exp %89 : vector<2x32xf32>
    %cst_26 = arith.constant 1.000000e+00 : f32
    %91 = vector.broadcast %cst_26 : f32 to vector<2x32xf32>
    %92 = arith.addf %91, %90 : vector<2x32xf32>
    %93 = arith.divf %91, %92 : vector<2x32xf32>
    %94 = vector.extract_strided_slice %81 {offsets = [0, 64], sizes = [2, 32], strides = [1, 1]} : vector<2x128xf32> to vector<2x32xf32>
    %95 = math.tanh %94 : vector<2x32xf32>
    %96 = vector.extract_strided_slice %81 {offsets = [0, 96], sizes = [2, 32], strides = [1, 1]} : vector<2x128xf32> to vector<2x32xf32>
    %97 = arith.negf %96 : vector<2x32xf32>
    %98 = math.exp %97 : vector<2x32xf32>
    %cst_27 = arith.constant 1.000000e+00 : f32
    %99 = vector.broadcast %cst_27 : f32 to vector<2x32xf32>
    %100 = arith.addf %99, %98 : vector<2x32xf32>
    %101 = arith.divf %99, %100 : vector<2x32xf32>
    %102 = arith.mulf %93, %69 : vector<2x32xf32>
    %103 = arith.mulf %87, %95 : vector<2x32xf32>
    %104 = arith.addf %102, %103 : vector<2x32xf32>
    %105 = math.tanh %104 : vector<2x32xf32>
    %106 = arith.mulf %101, %105 : vector<2x32xf32>
    %107 = arith.truncf %106 : vector<2x32xf32> to vector<2x32xbf16>
    %108 = vector.shape_cast %107 : vector<2x32xbf16> to vector<2x1x32xbf16>
    %c0_28 = arith.constant 0 : index
    %109 = arith.index_cast %c2_i32 : i32 to index
    %c0_29 = arith.constant 0 : index
    %110 = vector.load %arg6[%c0_28, %109, %c0_29] : memref<2x8x32xbf16, #tpu.memory_space<vmem>>, vector<2x1x32xbf16>
    tpu.vector_store %arg6[%c0_28, %109, %c0_29], %108 {strides = array<i32>} : memref<2x8x32xbf16, #tpu.memory_space<vmem>>, vector<2x1x32xbf16>,
    %c3_i32 = arith.constant 3 : i32
    %c0_30 = arith.constant 0 : index
    %111 = arith.index_cast %c3_i32 : i32 to index
    %c0_31 = arith.constant 0 : index
    %112 = vector.load %arg2[%c0_30, %111, %c0_31] : memref<2x8x128xf32, #tpu.memory_space<vmem>>, vector<2x1x128xf32>
    %113 = vector.shape_cast %112 : vector<2x1x128xf32> to vector<2x128xf32>
    %114 = arith.truncf %106 : vector<2x32xf32> to vector<2x32xbf16>
    %cst_32 = arith.constant dense<0.000000e+00> : vector<2x128xf32>
    %115 = tpu.matmul %114, %3, %cst_32 {dimension_numbers = #tpu.dot_dimension_numbers<[1], [0], [0], [1], [0, 0, 1, 1], [], []>} : vector<2x32xbf16>, vector<32x128xbf16>, vector<2x128xf32> -> vector<2x128xf32>
    %116 = arith.addf %113, %115 : vector<2x128xf32>
    %117 = vector.extract_strided_slice %116 {offsets = [0, 0], sizes = [2, 32], strides = [1, 1]} : vector<2x128xf32> to vector<2x32xf32>
    %118 = arith.negf %117 : vector<2x32xf32>
    %119 = math.exp %118 : vector<2x32xf32>
    %cst_33 = arith.constant 1.000000e+00 : f32
    %120 = vector.broadcast %cst_33 : f32 to vector<2x32xf32>
    %121 = arith.addf %120, %119 : vector<2x32xf32>
    %122 = arith.divf %120, %121 : vector<2x32xf32>
    %123 = vector.extract_strided_slice %116 {offsets = [0, 32], sizes = [2, 32], strides = [1, 1]} : vector<2x128xf32> to vector<2x32xf32>
    %124 = arith.negf %123 : vector<2x32xf32>
    %125 = math.exp %124 : vector<2x32xf32>
    %cst_34 = arith.constant 1.000000e+00 : f32
    %126 = vector.broadcast %cst_34 : f32 to vector<2x32xf32>
    %127 = arith.addf %126, %125 : vector<2x32xf32>
    %128 = arith.divf %126, %127 : vector<2x32xf32>
    %129 = vector.extract_strided_slice %116 {offsets = [0, 64], sizes = [2, 32], strides = [1, 1]} : vector<2x128xf32> to vector<2x32xf32>
    %130 = math.tanh %129 : vector<2x32xf32>
    %131 = vector.extract_strided_slice %116 {offsets = [0, 96], sizes = [2, 32], strides = [1, 1]} : vector<2x128xf32> to vector<2x32xf32>
    %132 = arith.negf %131 : vector<2x32xf32>
    %133 = math.exp %132 : vector<2x32xf32>
    %cst_35 = arith.constant 1.000000e+00 : f32
    %134 = vector.broadcast %cst_35 : f32 to vector<2x32xf32>
    %135 = arith.addf %134, %133 : vector<2x32xf32>
    %136 = arith.divf %134, %135 : vector<2x32xf32>
    %137 = arith.mulf %128, %104 : vector<2x32xf32>
    %138 = arith.mulf %122, %130 : vector<2x32xf32>
    %139 = arith.addf %137, %138 : vector<2x32xf32>
    %140 = math.tanh %139 : vector<2x32xf32>
    %141 = arith.mulf %136, %140 : vector<2x32xf32>
    %142 = arith.truncf %141 : vector<2x32xf32> to vector<2x32xbf16>
    %143 = vector.shape_cast %142 : vector<2x32xbf16> to vector<2x1x32xbf16>
    %c0_36 = arith.constant 0 : index
    %144 = arith.index_cast %c3_i32 : i32 to index
    %c0_37 = arith.constant 0 : index
    %145 = vector.load %arg6[%c0_36, %144, %c0_37] : memref<2x8x32xbf16, #tpu.memory_space<vmem>>, vector<2x1x32xbf16>
    tpu.vector_store %arg6[%c0_36, %144, %c0_37], %143 {strides = array<i32>} : memref<2x8x32xbf16, #tpu.memory_space<vmem>>, vector<2x1x32xbf16>,
    %c4_i32 = arith.constant 4 : i32
    %c0_38 = arith.constant 0 : index
    %146 = arith.index_cast %c4_i32 : i32 to index
    %c0_39 = arith.constant 0 : index
    %147 = vector.load %arg2[%c0_38, %146, %c0_39] : memref<2x8x128xf32, #tpu.memory_space<vmem>>, vector<2x1x128xf32>
    %148 = vector.shape_cast %147 : vector<2x1x128xf32> to vector<2x128xf32>
    %149 = arith.truncf %141 : vector<2x32xf32> to vector<2x32xbf16>
    %cst_40 = arith.constant dense<0.000000e+00> : vector<2x128xf32>
    %150 = tpu.matmul %149, %3, %cst_40 {dimension_numbers = #tpu.dot_dimension_numbers<[1], [0], [0], [1], [0, 0, 1, 1], [], []>} : vector<2x32xbf16>, vector<32x128xbf16>, vector<2x128xf32> -> vector<2x128xf32>
    %151 = arith.addf %148, %150 : vector<2x128xf32>
    %152 = vector.extract_strided_slice %151 {offsets = [0, 0], sizes = [2, 32], strides = [1, 1]} : vector<2x128xf32> to vector<2x32xf32>
    %153 = arith.negf %152 : vector<2x32xf32>
    %154 = math.exp %153 : vector<2x32xf32>
    %cst_41 = arith.constant 1.000000e+00 : f32
    %155 = vector.broadcast %cst_41 : f32 to vector<2x32xf32>
    %156 = arith.addf %155, %154 : vector<2x32xf32>
    %157 = arith.divf %155, %156 : vector<2x32xf32>
    %158 = vector.extract_strided_slice %151 {offsets = [0, 32], sizes = [2, 32], strides = [1, 1]} : vector<2x128xf32> to vector<2x32xf32>
    %159 = arith.negf %158 : vector<2x32xf32>
    %160 = math.exp %159 : vector<2x32xf32>
    %cst_42 = arith.constant 1.000000e+00 : f32
    %161 = vector.broadcast %cst_42 : f32 to vector<2x32xf32>
    %162 = arith.addf %161, %160 : vector<2x32xf32>
    %163 = arith.divf %161, %162 : vector<2x32xf32>
    %164 = vector.extract_strided_slice %151 {offsets = [0, 64], sizes = [2, 32], strides = [1, 1]} : vector<2x128xf32> to vector<2x32xf32>
    %165 = math.tanh %164 : vector<2x32xf32>
    %166 = vector.extract_strided_slice %151 {offsets = [0, 96], sizes = [2, 32], strides = [1, 1]} : vector<2x128xf32> to vector<2x32xf32>
    %167 = arith.negf %166 : vector<2x32xf32>
    %168 = math.exp %167 : vector<2x32xf32>
    %cst_43 = arith.constant 1.000000e+00 : f32
    %169 = vector.broadcast %cst_43 : f32 to vector<2x32xf32>
    %170 = arith.addf %169, %168 : vector<2x32xf32>
    %171 = arith.divf %169, %170 : vector<2x32xf32>
    %172 = arith.mulf %163, %139 : vector<2x32xf32>
    %173 = arith.mulf %157, %165 : vector<2x32xf32>
    %174 = arith.addf %172, %173 : vector<2x32xf32>
    %175 = math.tanh %174 : vector<2x32xf32>
    %176 = arith.mulf %171, %175 : vector<2x32xf32>
    %177 = arith.truncf %176 : vector<2x32xf32> to vector<2x32xbf16>
    %178 = vector.shape_cast %177 : vector<2x32xbf16> to vector<2x1x32xbf16>
    %c0_44 = arith.constant 0 : index
    %179 = arith.index_cast %c4_i32 : i32 to index
    %c0_45 = arith.constant 0 : index
    %180 = vector.load %arg6[%c0_44, %179, %c0_45] : memref<2x8x32xbf16, #tpu.memory_space<vmem>>, vector<2x1x32xbf16>
    tpu.vector_store %arg6[%c0_44, %179, %c0_45], %178 {strides = array<i32>} : memref<2x8x32xbf16, #tpu.memory_space<vmem>>, vector<2x1x32xbf16>,
    %c5_i32 = arith.constant 5 : i32
    %c0_46 = arith.constant 0 : index
    %181 = arith.index_cast %c5_i32 : i32 to index
    %c0_47 = arith.constant 0 : index
    %182 = vector.load %arg2[%c0_46, %181, %c0_47] : memref<2x8x128xf32, #tpu.memory_space<vmem>>, vector<2x1x128xf32>
    %183 = vector.shape_cast %182 : vector<2x1x128xf32> to vector<2x128xf32>
    %184 = arith.truncf %176 : vector<2x32xf32> to vector<2x32xbf16>
    %cst_48 = arith.constant dense<0.000000e+00> : vector<2x128xf32>
    %185 = tpu.matmul %184, %3, %cst_48 {dimension_numbers = #tpu.dot_dimension_numbers<[1], [0], [0], [1], [0, 0, 1, 1], [], []>} : vector<2x32xbf16>, vector<32x128xbf16>, vector<2x128xf32> -> vector<2x128xf32>
    %186 = arith.addf %183, %185 : vector<2x128xf32>
    %187 = vector.extract_strided_slice %186 {offsets = [0, 0], sizes = [2, 32], strides = [1, 1]} : vector<2x128xf32> to vector<2x32xf32>
    %188 = arith.negf %187 : vector<2x32xf32>
    %189 = math.exp %188 : vector<2x32xf32>
    %cst_49 = arith.constant 1.000000e+00 : f32
    %190 = vector.broadcast %cst_49 : f32 to vector<2x32xf32>
    %191 = arith.addf %190, %189 : vector<2x32xf32>
    %192 = arith.divf %190, %191 : vector<2x32xf32>
    %193 = vector.extract_strided_slice %186 {offsets = [0, 32], sizes = [2, 32], strides = [1, 1]} : vector<2x128xf32> to vector<2x32xf32>
    %194 = arith.negf %193 : vector<2x32xf32>
    %195 = math.exp %194 : vector<2x32xf32>
    %cst_50 = arith.constant 1.000000e+00 : f32
    %196 = vector.broadcast %cst_50 : f32 to vector<2x32xf32>
    %197 = arith.addf %196, %195 : vector<2x32xf32>
    %198 = arith.divf %196, %197 : vector<2x32xf32>
    %199 = vector.extract_strided_slice %186 {offsets = [0, 64], sizes = [2, 32], strides = [1, 1]} : vector<2x128xf32> to vector<2x32xf32>
    %200 = math.tanh %199 : vector<2x32xf32>
    %201 = vector.extract_strided_slice %186 {offsets = [0, 96], sizes = [2, 32], strides = [1, 1]} : vector<2x128xf32> to vector<2x32xf32>
    %202 = arith.negf %201 : vector<2x32xf32>
    %203 = math.exp %202 : vector<2x32xf32>
    %cst_51 = arith.constant 1.000000e+00 : f32
    %204 = vector.broadcast %cst_51 : f32 to vector<2x32xf32>
    %205 = arith.addf %204, %203 : vector<2x32xf32>
    %206 = arith.divf %204, %205 : vector<2x32xf32>
    %207 = arith.mulf %198, %174 : vector<2x32xf32>
    %208 = arith.mulf %192, %200 : vector<2x32xf32>
    %209 = arith.addf %207, %208 : vector<2x32xf32>
    %210 = math.tanh %209 : vector<2x32xf32>
    %211 = arith.mulf %206, %210 : vector<2x32xf32>
    %212 = arith.truncf %211 : vector<2x32xf32> to vector<2x32xbf16>
    %213 = vector.shape_cast %212 : vector<2x32xbf16> to vector<2x1x32xbf16>
    %c0_52 = arith.constant 0 : index
    %214 = arith.index_cast %c5_i32 : i32 to index
    %c0_53 = arith.constant 0 : index
    %215 = vector.load %arg6[%c0_52, %214, %c0_53] : memref<2x8x32xbf16, #tpu.memory_space<vmem>>, vector<2x1x32xbf16>
    tpu.vector_store %arg6[%c0_52, %214, %c0_53], %213 {strides = array<i32>} : memref<2x8x32xbf16, #tpu.memory_space<vmem>>, vector<2x1x32xbf16>,
    %c6_i32 = arith.constant 6 : i32
    %c0_54 = arith.constant 0 : index
    %216 = arith.index_cast %c6_i32 : i32 to index
    %c0_55 = arith.constant 0 : index
    %217 = vector.load %arg2[%c0_54, %216, %c0_55] : memref<2x8x128xf32, #tpu.memory_space<vmem>>, vector<2x1x128xf32>
    %218 = vector.shape_cast %217 : vector<2x1x128xf32> to vector<2x128xf32>
    %219 = arith.truncf %211 : vector<2x32xf32> to vector<2x32xbf16>
    %cst_56 = arith.constant dense<0.000000e+00> : vector<2x128xf32>
    %220 = tpu.matmul %219, %3, %cst_56 {dimension_numbers = #tpu.dot_dimension_numbers<[1], [0], [0], [1], [0, 0, 1, 1], [], []>} : vector<2x32xbf16>, vector<32x128xbf16>, vector<2x128xf32> -> vector<2x128xf32>
    %221 = arith.addf %218, %220 : vector<2x128xf32>
    %222 = vector.extract_strided_slice %221 {offsets = [0, 0], sizes = [2, 32], strides = [1, 1]} : vector<2x128xf32> to vector<2x32xf32>
    %223 = arith.negf %222 : vector<2x32xf32>
    %224 = math.exp %223 : vector<2x32xf32>
    %cst_57 = arith.constant 1.000000e+00 : f32
    %225 = vector.broadcast %cst_57 : f32 to vector<2x32xf32>
    %226 = arith.addf %225, %224 : vector<2x32xf32>
    %227 = arith.divf %225, %226 : vector<2x32xf32>
    %228 = vector.extract_strided_slice %221 {offsets = [0, 32], sizes = [2, 32], strides = [1, 1]} : vector<2x128xf32> to vector<2x32xf32>
    %229 = arith.negf %228 : vector<2x32xf32>
    %230 = math.exp %229 : vector<2x32xf32>
    %cst_58 = arith.constant 1.000000e+00 : f32
    %231 = vector.broadcast %cst_58 : f32 to vector<2x32xf32>
    %232 = arith.addf %231, %230 : vector<2x32xf32>
    %233 = arith.divf %231, %232 : vector<2x32xf32>
    %234 = vector.extract_strided_slice %221 {offsets = [0, 64], sizes = [2, 32], strides = [1, 1]} : vector<2x128xf32> to vector<2x32xf32>
    %235 = math.tanh %234 : vector<2x32xf32>
    %236 = vector.extract_strided_slice %221 {offsets = [0, 96], sizes = [2, 32], strides = [1, 1]} : vector<2x128xf32> to vector<2x32xf32>
    %237 = arith.negf %236 : vector<2x32xf32>
    %238 = math.exp %237 : vector<2x32xf32>
    %cst_59 = arith.constant 1.000000e+00 : f32
    %239 = vector.broadcast %cst_59 : f32 to vector<2x32xf32>
    %240 = arith.addf %239, %238 : vector<2x32xf32>
    %241 = arith.divf %239, %240 : vector<2x32xf32>
    %242 = arith.mulf %233, %209 : vector<2x32xf32>
    %243 = arith.mulf %227, %235 : vector<2x32xf32>
    %244 = arith.addf %242, %243 : vector<2x32xf32>
    %245 = math.tanh %244 : vector<2x32xf32>
    %246 = arith.mulf %241, %245 : vector<2x32xf32>
    %247 = arith.truncf %246 : vector<2x32xf32> to vector<2x32xbf16>
    %248 = vector.shape_cast %247 : vector<2x32xbf16> to vector<2x1x32xbf16>
    %c0_60 = arith.constant 0 : index
    %249 = arith.index_cast %c6_i32 : i32 to index
    %c0_61 = arith.constant 0 : index
    %250 = vector.load %arg6[%c0_60, %249, %c0_61] : memref<2x8x32xbf16, #tpu.memory_space<vmem>>, vector<2x1x32xbf16>
    tpu.vector_store %arg6[%c0_60, %249, %c0_61], %248 {strides = array<i32>} : memref<2x8x32xbf16, #tpu.memory_space<vmem>>, vector<2x1x32xbf16>,
    %c7_i32 = arith.constant 7 : i32
    %c0_62 = arith.constant 0 : index
    %251 = arith.index_cast %c7_i32 : i32 to index
    %c0_63 = arith.constant 0 : index
    %252 = vector.load %arg2[%c0_62, %251, %c0_63] : memref<2x8x128xf32, #tpu.memory_space<vmem>>, vector<2x1x128xf32>
    %253 = vector.shape_cast %252 : vector<2x1x128xf32> to vector<2x128xf32>
    %254 = arith.truncf %246 : vector<2x32xf32> to vector<2x32xbf16>
    %cst_64 = arith.constant dense<0.000000e+00> : vector<2x128xf32>
    %255 = tpu.matmul %254, %3, %cst_64 {dimension_numbers = #tpu.dot_dimension_numbers<[1], [0], [0], [1], [0, 0, 1, 1], [], []>} : vector<2x32xbf16>, vector<32x128xbf16>, vector<2x128xf32> -> vector<2x128xf32>
    %256 = arith.addf %253, %255 : vector<2x128xf32>
    %257 = vector.extract_strided_slice %256 {offsets = [0, 0], sizes = [2, 32], strides = [1, 1]} : vector<2x128xf32> to vector<2x32xf32>
    %258 = arith.negf %257 : vector<2x32xf32>
    %259 = math.exp %258 : vector<2x32xf32>
    %cst_65 = arith.constant 1.000000e+00 : f32
    %260 = vector.broadcast %cst_65 : f32 to vector<2x32xf32>
    %261 = arith.addf %260, %259 : vector<2x32xf32>
    %262 = arith.divf %260, %261 : vector<2x32xf32>
    %263 = vector.extract_strided_slice %256 {offsets = [0, 32], sizes = [2, 32], strides = [1, 1]} : vector<2x128xf32> to vector<2x32xf32>
    %264 = arith.negf %263 : vector<2x32xf32>
    %265 = math.exp %264 : vector<2x32xf32>
    %cst_66 = arith.constant 1.000000e+00 : f32
    %266 = vector.broadcast %cst_66 : f32 to vector<2x32xf32>
    %267 = arith.addf %266, %265 : vector<2x32xf32>
    %268 = arith.divf %266, %267 : vector<2x32xf32>
    %269 = vector.extract_strided_slice %256 {offsets = [0, 64], sizes = [2, 32], strides = [1, 1]} : vector<2x128xf32> to vector<2x32xf32>
    %270 = math.tanh %269 : vector<2x32xf32>
    %271 = vector.extract_strided_slice %256 {offsets = [0, 96], sizes = [2, 32], strides = [1, 1]} : vector<2x128xf32> to vector<2x32xf32>
    %272 = arith.negf %271 : vector<2x32xf32>
    %273 = math.exp %272 : vector<2x32xf32>
    %cst_67 = arith.constant 1.000000e+00 : f32
    %274 = vector.broadcast %cst_67 : f32 to vector<2x32xf32>
    %275 = arith.addf %274, %273 : vector<2x32xf32>
    %276 = arith.divf %274, %275 : vector<2x32xf32>
    %277 = arith.mulf %268, %244 : vector<2x32xf32>
    %278 = arith.mulf %262, %270 : vector<2x32xf32>
    %279 = arith.addf %277, %278 : vector<2x32xf32>
    %280 = math.tanh %279 : vector<2x32xf32>
    %281 = arith.mulf %276, %280 : vector<2x32xf32>
    %282 = arith.truncf %281 : vector<2x32xf32> to vector<2x32xbf16>
    %283 = vector.shape_cast %282 : vector<2x32xbf16> to vector<2x1x32xbf16>
    %c0_68 = arith.constant 0 : index
    %284 = arith.index_cast %c7_i32 : i32 to index
    %c0_69 = arith.constant 0 : index
    %285 = vector.load %arg6[%c0_68, %284, %c0_69] : memref<2x8x32xbf16, #tpu.memory_space<vmem>>, vector<2x1x32xbf16>
    tpu.vector_store %arg6[%c0_68, %284, %c0_69], %283 {strides = array<i32>} : memref<2x8x32xbf16, #tpu.memory_space<vmem>>, vector<2x1x32xbf16>,
    %c8_i32 = arith.constant 8 : i32
    %c0_70 = arith.constant 0 : index
    %c0_71 = arith.constant 0 : index
    %286 = vector.load %arg9[%c0_70, %c0_71] : memref<2x32xf32, #tpu.memory_space<vmem>>, vector<2x32xf32>
    tpu.vector_store %arg9[%c0_70, %c0_71], %281 {strides = array<i32>} : memref<2x32xf32, #tpu.memory_space<vmem>>, vector<2x32xf32>,
    %c0_72 = arith.constant 0 : index
    %c0_73 = arith.constant 0 : index
    %287 = vector.load %arg10[%c0_72, %c0_73] : memref<2x32xf32, #tpu.memory_space<vmem>>, vector<2x32xf32>
    tpu.vector_store %arg10[%c0_72, %c0_73], %279 {strides = array<i32>} : memref<2x32xf32, #tpu.memory_space<vmem>>, vector<2x32xf32>,
    %c0_i32_74 = arith.constant 0 : i32
    %288 = arith.cmpi eq, %arg1, %c0_i32_74 : i32
    %289 = arith.extui %288 : i1 to i32
    %c0_i32_75 = arith.constant 0 : i32
    %290 = arith.cmpi ne, %289, %c0_i32_75 : i32
    scf.if %290 {
      %c0_76 = arith.constant 0 : index
      %c0_77 = arith.constant 0 : index
      %291 = vector.load %arg7[%c0_76, %c0_77] : memref<2x32xf32, #tpu.memory_space<vmem>>, vector<2x32xf32>
      tpu.vector_store %arg7[%c0_76, %c0_77], %281 {strides = array<i32>} : memref<2x32xf32, #tpu.memory_space<vmem>>, vector<2x32xf32>,
      %c0_78 = arith.constant 0 : index
      %c0_79 = arith.constant 0 : index
      %292 = vector.load %arg8[%c0_78, %c0_79] : memref<2x32xf32, #tpu.memory_space<vmem>>, vector<2x32xf32>
      tpu.vector_store %arg8[%c0_78, %c0_79], %279 {strides = array<i32>} : memref<2x32xf32, #tpu.memory_space<vmem>>, vector<2x32xf32>,
    } else {
    }
    return
  }
  func.func @transform_0(%arg0: i32, %arg1: i32) -> (i32, i32, i32) {
    %c0_i32 = arith.constant 0 : i32
    %c0_i32_0 = arith.constant 0 : i32
    return %arg0, %arg1, %c0_i32 : i32, i32, i32
  }
  func.func @transform_1(%arg0: i32, %arg1: i32) -> (i32, i32) {
    %c0_i32 = arith.constant 0 : i32
    %c0_i32_0 = arith.constant 0 : i32
    %c0_i32_1 = arith.constant 0 : i32
    return %c0_i32, %c0_i32_0 : i32, i32
  }
  func.func @transform_2(%arg0: i32, %arg1: i32) -> (i32, i32) {
    %c0_i32 = arith.constant 0 : i32
    %c0_i32_0 = arith.constant 0 : i32
    return %arg0, %c0_i32 : i32, i32
  }
  func.func @transform_3(%arg0: i32, %arg1: i32) -> (i32, i32) {
    %c0_i32 = arith.constant 0 : i32
    %c0_i32_0 = arith.constant 0 : i32
    return %arg0, %c0_i32 : i32, i32
  }
  func.func @transform_4(%arg0: i32, %arg1: i32) -> (i32, i32, i32) {
    %c0_i32 = arith.constant 0 : i32
    %c0_i32_0 = arith.constant 0 : i32
    return %arg0, %arg1, %c0_i32 : i32, i32, i32
  }
  func.func @transform_5(%arg0: i32, %arg1: i32) -> (i32, i32) {
    %c0_i32 = arith.constant 0 : i32
    %c0_i32_0 = arith.constant 0 : i32
    return %arg0, %c0_i32 : i32, i32
  }
  func.func @transform_6(%arg0: i32, %arg1: i32) -> (i32, i32) {
    %c0_i32 = arith.constant 0 : i32
    %c0_i32_0 = arith.constant 0 : i32
    return %arg0, %c0_i32 : i32, i32
  }
}

module attributes {stable_mosaic.version = 11 : i64} {
  func.func @_dense_kernel(%arg0: i32, %arg1: i32, %arg2: i32, %arg3: memref<16x32xbf16, #tpu.memory_space<vmem>>, %arg4: memref<32x32xbf16, #tpu.memory_space<vmem>>, %arg5: memref<1x32xf32, #tpu.memory_space<vmem>>, %arg6: memref<16x32xf32, #tpu.memory_space<vmem>>) attributes {dimension_semantics = [#tpu.dimension_semantics<parallel>, #tpu.dimension_semantics<parallel>, #tpu.dimension_semantics<arbitrary>], iteration_bounds = array<i64: 1, 1, 1>, scalar_prefetch = 0 : i64, scratch_operands = 0 : i64, tpu.core_type = #tpu.core_type<tc>, window_params = [{transform_indices = @transform_0, window_bounds = array<i64: 16, 32>}, {transform_indices = @transform_1, window_bounds = array<i64: 32, 32>}, {transform_indices = @transform_2, window_bounds = array<i64: 1, 32>}, {transform_indices = @transform_3, window_bounds = array<i64: 16, 32>}]} {
    %c0_i32 = arith.constant 0 : i32
    %0 = arith.cmpi eq, %arg2, %c0_i32 : i32
    %1 = arith.extui %0 : i1 to i32
    %c0_i32_0 = arith.constant 0 : i32
    %2 = arith.cmpi ne, %1, %c0_i32_0 : i32
    scf.if %2 {
      %cst_10 = arith.constant 0.000000e+00 : f32
      %12 = vector.broadcast %cst_10 : f32 to vector<16x32xf32>
      %c0_11 = arith.constant 0 : index
      %c0_12 = arith.constant 0 : index
      %13 = vector.load %arg6[%c0_11, %c0_12] : memref<16x32xf32, #tpu.memory_space<vmem>>, vector<16x32xf32>
      tpu.vector_store %arg6[%c0_11, %c0_12], %12 {strides = array<i32>} : memref<16x32xf32, #tpu.memory_space<vmem>>, vector<16x32xf32>,
    } else {
    }
    %c0 = arith.constant 0 : index
    %c0_1 = arith.constant 0 : index
    %3 = vector.load %arg6[%c0, %c0_1] : memref<16x32xf32, #tpu.memory_space<vmem>>, vector<16x32xf32>
    %c0_2 = arith.constant 0 : index
    %c0_3 = arith.constant 0 : index
    %4 = vector.load %arg3[%c0_2, %c0_3] : memref<16x32xbf16, #tpu.memory_space<vmem>>, vector<16x32xbf16>
    %c0_4 = arith.constant 0 : index
    %c0_5 = arith.constant 0 : index
    %5 = vector.load %arg4[%c0_4, %c0_5] : memref<32x32xbf16, #tpu.memory_space<vmem>>, vector<32x32xbf16>
    %cst = arith.constant dense<0.000000e+00> : vector<16x32xf32>
    %6 = tpu.matmul %4, %5, %cst {dimension_numbers = #tpu.dot_dimension_numbers<[1], [0], [0], [1], [0, 0, 1, 1], [], []>} : vector<16x32xbf16>, vector<32x32xbf16>, vector<16x32xf32> -> vector<16x32xf32>
    %7 = arith.addf %3, %6 : vector<16x32xf32>
    %c0_6 = arith.constant 0 : index
    %c0_7 = arith.constant 0 : index
    %8 = vector.load %arg6[%c0_6, %c0_7] : memref<16x32xf32, #tpu.memory_space<vmem>>, vector<16x32xf32>
    tpu.vector_store %arg6[%c0_6, %c0_7], %7 {strides = array<i32>} : memref<16x32xf32, #tpu.memory_space<vmem>>, vector<16x32xf32>,
    %c0_i32_8 = arith.constant 0 : i32
    %9 = arith.cmpi eq, %arg2, %c0_i32_8 : i32
    %10 = arith.extui %9 : i1 to i32
    %c0_i32_9 = arith.constant 0 : i32
    %11 = arith.cmpi ne, %10, %c0_i32_9 : i32
    scf.if %11 {
      %c0_10 = arith.constant 0 : index
      %c0_11 = arith.constant 0 : index
      %12 = vector.load %arg6[%c0_10, %c0_11] : memref<16x32xf32, #tpu.memory_space<vmem>>, vector<16x32xf32>
      %c0_12 = arith.constant 0 : index
      %c0_13 = arith.constant 0 : index
      %13 = vector.load %arg5[%c0_12, %c0_13] : memref<1x32xf32, #tpu.memory_space<vmem>>, vector<1x32xf32>
      %14 = vector.broadcast %13 : vector<1x32xf32> to vector<16x32xf32>
      %15 = arith.addf %12, %14 : vector<16x32xf32>
      %c0_14 = arith.constant 0 : index
      %c0_15 = arith.constant 0 : index
      %16 = vector.load %arg6[%c0_14, %c0_15] : memref<16x32xf32, #tpu.memory_space<vmem>>, vector<16x32xf32>
      tpu.vector_store %arg6[%c0_14, %c0_15], %15 {strides = array<i32>} : memref<16x32xf32, #tpu.memory_space<vmem>>, vector<16x32xf32>,
    } else {
    }
    return
  }
  func.func @transform_0(%arg0: i32, %arg1: i32, %arg2: i32) -> (i32, i32) {
    %c0_i32 = arith.constant 0 : i32
    return %arg0, %arg2 : i32, i32
  }
  func.func @transform_1(%arg0: i32, %arg1: i32, %arg2: i32) -> (i32, i32) {
    %c0_i32 = arith.constant 0 : i32
    return %arg2, %arg1 : i32, i32
  }
  func.func @transform_2(%arg0: i32, %arg1: i32, %arg2: i32) -> (i32, i32) {
    %c0_i32 = arith.constant 0 : i32
    %c0_i32_0 = arith.constant 0 : i32
    return %c0_i32, %arg1 : i32, i32
  }
  func.func @transform_3(%arg0: i32, %arg1: i32, %arg2: i32) -> (i32, i32) {
    %c0_i32 = arith.constant 0 : i32
    return %arg0, %arg1 : i32, i32
  }
}

</mosaic_0001>

<bundles_post_ra>
// kernel: forward.5
= control target key start
LH: loop header
LB: loop body
LE: loop exit
PB: predicated region body
PF: predicated region fallthrough
CT: control target
= control target key end

     0   :  { %8 = vsyncpa [#allocation3], 0  ;;  %s149_s15 = smov [#allocation2]   ;;  %s150_s17 = smov 64   ;;  %s187_s0 = inlined_call_operand.vmem [shape: bf16[16,32], index: 0, kind: input, shape index: {}]   ;;  %s188_s1 = inlined_call_operand.hbm [shape: bf16[32,128], index: 1, kind: input, shape index: {}]   ;;  %s189_s2 = inlined_call_operand.vmem [shape: f32[1,128], index: 2, kind: input, shape index: {}]   ;;  %s190_s3 = inlined_call_operand.vmem [shape: f32[16,128], index: 3, kind: output, shape index: {}]  }
   0x1   :  { %s15_s14 = sshll.u32 %s188_s1, 4  ;;  %s17_s16 = sshll.u32 %s149_s15, 4  ;;  %s16_s14 = int_to_ptr.hbm [resolvable:$true] %s15_s14  ;;  %s18_s16 = int_to_ptr.vmem [resolvable:$true] %s17_s16 }
   0x2   :  { %s151_s18 = smov 4  }
   0x3   :  { %23 = dma.hbm_to_vmem [thread:$0]  %s16_s14, 256, %s18_s16, [#allocation3], %s150_s17, %s150_s17, %s151_s18  }
   0x4   :  { %147 = dma.done.wait [#allocation3], 256  }
   0x5   :  { %148 = vsyncadd [#allocation3], 4294967040  ;;  %v117_v0 = vld [vmem:[#allocation2 + $0x8] sm:$0xff]  ;;  %v116_v1 = vld [vmem:[#allocation2] sm:$0xff]  ;;  %vm62_vm0 = vcmask 261120  }
   0x6   :  { %72 = vmatpush.bf16.msra.mxu0 %v117_v0  ;;  %v115_v2 = vld [vmem:[%s187_s0] sm:$0xff] }
   0x7   :  { %v122_v3 = vld [vmem:[%s189_s2] ss:$0 sm:$0xff] }
   0xa   :  { %73 = vmatpush.bf16.msra.mxu0 %v116_v1 }
   0xd   :  { %114 = vmatmul.msk.bf16.vlgmr.msra.gmra.mxu0 %vm62_vm0, %v115_v2 }
  0x8a   :  { %v75_v4 = vpop.f32.mrf.mxu0 }
  0x8b   :  { %v93_v5 = vadd.f32 %v122_v3, %v75_v4 }
  0x8d   :  { %95 = vst [vmem:[%s190_s3] sm:$0xff] %v93_v5 }
  0x92   :  { %v77_v6 = vpop.f32.mrf.mxu0 }
  0x93   :  { %v94_v7 = vadd.f32 %v122_v3, %v77_v6 }
  0x95   :  { %96 = vst [vmem:[%s190_s3 + $0x8] sm:$0xff] %v94_v7 }
  0x96   :  { %101 = vsyncpa [#allocation3], 1 }

// kernel: forward.7
= control target key start
LH: loop header
LB: loop body
LE: loop exit
PB: predicated region body
PF: predicated region fallthrough
CT: control target
= control target key end

     0   :  { %vm46_vm0 = vcmask 261120   ;;  %s141_s1 = inlined_call_operand.vmem [shape: bf16[32,128], index: 1, kind: input, shape index: {}]   ;;  %s142_s2 = inlined_call_operand.vmem [shape: f32[1,128], index: 2, kind: input, shape index: {}]   ;;  %s143_s0 = inlined_call_operand.vmem [shape: bf16[16,32], index: 0, kind: input, shape index: {}]   ;;  %s144_s3 = inlined_call_operand.vmem [shape: f32[16,128], index: 3, kind: output, shape index: {}]  }
   0x1   :  { %v100_v0 = vld [vmem:[%s141_s1 + $0x8] sm:$0xff]  ;;  %v99_v1 = vld [vmem:[%s141_s1] sm:$0xff] }
   0x2   :  { %56 = vmatpush.bf16.msra.mxu0 %v100_v0  ;;  %v98_v2 = vld [vmem:[%s143_s0] sm:$0xff] }
   0x3   :  { %v102_v3 = vld [vmem:[%s142_s2] ss:$0 sm:$0xff] }
   0x6   :  { %57 = vmatpush.bf16.msra.mxu0 %v99_v1 }
   0x9   :  { %97 = vmatmul.msk.bf16.vlgmr.msra.gmra.mxu0 %vm46_vm0, %v98_v2 }
  0x86   :  { %v59_v4 = vpop.f32.mrf.mxu0 }
  0x87   :  { %v77_v5 = vadd.f32 %v102_v3, %v59_v4 }
  0x89   :  { %79 = vst [vmem:[%s144_s3] sm:$0xff] %v77_v5 }
  0x8e   :  { %v61_v6 = vpop.f32.mrf.mxu0 }
  0x8f   :  { %v78_v7 = vadd.f32 %v102_v3, %v61_v6 }
  0x91   :  { %80 = vst [vmem:[%s144_s3 + $0x8] sm:$0xff] %v78_v7 }

// kernel: forward.9
= control target key start
LH: loop header
LB: loop body
LE: loop exit
PB: predicated region body
PF: predicated region fallthrough
CT: control target
= control target key end

     0   :  { %vm20_vm0 = vcmask 261120   ;;  %v148_v1 = vmov 0.0   ;;  %s194_s0 = inlined_call_operand.vmem [shape: bf16[16,32], index: 0, kind: input, shape index: {}]   ;;  %s195_s1 = inlined_call_operand.vmem [shape: bf16[32,32], index: 1, kind: input, shape index: {}]   ;;  %s196_s2 = inlined_call_operand.vmem [shape: f32[1,32], index: 2, kind: input, shape index: {}]   ;;  %s197_s3 = inlined_call_operand.hbm [shape: f32[16,32], index: 3, kind: output, shape index: {}]  }
   0x1   :  { %v116_v0 = vld [vmem:[%s195_s1 + $0x8] sm:$0xff]  ;;  %21 = vst.msk [vmem:[#allocation2] sm:$0xff] %vm20_vm0, %v148_v1 }
   0x2   :  { %8 = vsyncpa [#allocation3], 0  ;;  %58 = vmatpush.bf16.msra.mxu0 %v116_v0  ;;  %v115_v2 = vld [vmem:[%s195_s1] sm:$0xff]  ;;  %22 = vst.msk [vmem:[#allocation2 + $0x8] sm:$0xff] %vm20_vm0, %v148_v1  ;;  %s89_s22 = sshll.u32 %s197_s3, 4  ;;  %s151_s23 = smov 8   ;;  %s90_s22 = int_to_ptr.hbm [resolvable:$true] %s89_s22 }
   0x3   :  { %v114_v3 = vld [vmem:[%s194_s0] sm:$0xff]  ;;  %s149_s0 = smov [#allocation2]  }
   0x4   :  { %v121_v8 = vld [vmem:[%s196_s2] ss:$0 sm:$0xff]  ;;  %s87_s1 = sshll.u32 %s149_s0, 4  ;;  %s150_s2 = smov 128   ;;  %s88_s1 = int_to_ptr.vmem [resolvable:$true] %s87_s1 }
   0x6   :  { %59 = vmatpush.bf16.msra.mxu0 %v115_v2 }
   0x8   :  { %v23_v4 = vld [vmem:[#allocation2] sm:$0xff] }
   0x9   :  { %113 = vmatmul.msk.bf16.vlgmr.msra.gmra.mxu0 %vm20_vm0, %v114_v3  ;;  %v24_v7 = vld [vmem:[#allocation2 + $0x8] sm:$0xff] }
  0x86   :  { %v61_v5 = vpop.f32.mrf.mxu0 }
  0x87   :  { %v66_v6 = vadd.f32 %v61_v5, %v23_v4 }
  0x89   :  { %68 = vst.msk [vmem:[#allocation2] sm:$0xff] %vm20_vm0, %v66_v6 }
  0x8e   :  { %v63_v9 = vpop.f32.mrf.mxu0 }
  0x8f   :  { %v67_v10 = vadd.f32 %v63_v9, %v24_v7 }
  0x90   :  { %v73_v11 = vld [vmem:[#allocation2] sm:$0xff] }
  0x91   :  { %v79_v12 = vadd.f32 %v121_v8, %v73_v11  ;;  %69 = vst.msk [vmem:[#allocation2 + $0x8] sm:$0xff] %vm20_vm0, %v67_v10 }
  0x93   :  { %81 = vst.msk [vmem:[#allocation2] sm:$0xff] %vm20_vm0, %v79_v12 }
  0x98   :  { %v74_v13 = vld [vmem:[#allocation2 + $0x8] sm:$0xff] }
  0x99   :  { %v80_v14 = vadd.f32 %v121_v8, %v74_v13 }
  0x9b   :  { %82 = vst.msk [vmem:[#allocation2 + $0x8] sm:$0xff] %vm20_vm0, %v80_v14 }
  0x9c   :  { %95 = dma.vmem_to_hbm [thread:$0]  %s88_s1, 256, %s90_s22, [#allocation3], %s150_s2, %s150_s2, %s151_s23  }
  0x9d   :  { %146 = dma.done.wait [#allocation3], 256  }
  0x9e   :  { %147 = vsyncadd [#allocation3], 4294967040 }
  0x9f   :  { %100 = vsyncpa [#allocation3], 1 }

// kernel: forward.6
= control target key start
LH: loop header
LB: loop body
LE: loop exit
PB: predicated region body
PF: predicated region fallthrough
CT: control target
= control target key end

     0   :  { %12 = vsyncpa [#allocation5], 0  ;;  %s1380_s24 = smov [#allocation4]   ;;  %s1381_s26 = smov 64   ;;  %s1833_s0 = inlined_call_operand.vmem [shape: f32[2,8,128], index: 0, kind: input, shape index: {}]   ;;  %s1834_s1 = inlined_call_operand.hbm [shape: bf16[32,128], index: 1, kind: input, shape index: {}]   ;;  %s1835_s2 = inlined_call_operand.vmem [shape: f32[2,32], index: 2, kind: input, shape index: {}]   ;;  %s1836_s3 = inlined_call_operand.vmem [shape: f32[2,32], index: 3, kind: input, shape index: {}]   ;;  %s1837_s4 = inlined_call_operand.vmem [shape: bf16[2,8,32], index: 4, kind: output, shape index: {0}]   ;;  %s1838_s5 = inlined_call_operand.vmem [shape: f32[2,32], index: 5, kind: output, shape index: {1}]   ;;  %s1839_s6 = inlined_call_operand.vmem [shape: f32[2,32], index: 6, kind: output, shape index: {2}]  }
   0x1   :  { %s19_s23 = sshll.u32 %s1834_s1, 4  ;;  %s21_s25 = sshll.u32 %s1380_s24, 4  ;;  %s20_s23 = int_to_ptr.hbm [resolvable:$true] %s19_s23  ;;  %s22_s25 = int_to_ptr.vmem [resolvable:$true] %s21_s25 }
   0x2   :  { %s1382_s27 = smov 4  }
   0x3   :  { %27 = dma.hbm_to_vmem [thread:$0]  %s20_s23, 256, %s22_s25, [#allocation5], %s1381_s26, %s1381_s26, %s1382_s27  }
   0x4   :  { %1378 = dma.done.wait [#allocation5], 256  }
   0x5   :  { %1379 = vsyncadd [#allocation5], 4294967040  ;;  %vm42_vm0 = vcmask 254976   ;;  %v1200_v0 = vld [vmem:[#allocation4 + $0x8] sm:$0xff]  ;;  %v41_v1 = vld [vmem:[%s1835_s2] sm:$0x3] }
   0x6   :  { %43 = vst.msk [vmem:[#allocation2] sm:$0x3] %vm42_vm0, %v41_v1  ;;  %v44_v2 = vld [vmem:[%s1836_s3] sm:$0x3]  ;;  %77 = vmatpush.bf16.msra.mxu0 %v1200_v0  ;;  %v1199_v3 = vld [vmem:[#allocation4] sm:$0xff]  ;;  %214 = vmatpush.bf16.msra.mxu1 %v1200_v0  ;;  %vm67_vm1 = vcmask 261120  }
   0x7   :  { %45 = vst.msk [vmem:[#allocation3] sm:$0x3] %vm42_vm0, %v44_v2  ;;  %347 = vmatpush.bf16.msra.mxu2 %v1200_v0  ;;  %477 = vmatpush.bf16.msra.mxu3 %v1200_v0  ;;  %s1383_s2 = smov 32   ;;  %v53_v9 = vld [vmem:[%s1833_s0 + $0x8] sm:$0x1]  ;;  %vm200_vm10 = vcmask 1041409  }
   0x8   :  { %v52_v12 = vld [vmem:[%s1833_s0] sm:$0x1]  ;;  %s1384_s21 = smov 96  }
   0xa   :  { %78 = vmatpush.bf16.msra.mxu0 %v1199_v3  ;;  %215 = vmatpush.bf16.msra.mxu1 %v1199_v3 }
   0xb   :  { %348 = vmatpush.bf16.msra.mxu2 %v1199_v3  ;;  %478 = vmatpush.bf16.msra.mxu3 %v1199_v3 }
   0xd   :  { %v50_v4 = vld [vmem:[#allocation2] sm:$0x3] }
   0xe   :  { %612 = vmatpush.bf16.msrb.mxu0 %v1200_v0  ;;  %742 = vmatpush.bf16.msrb.mxu1 %v1200_v0  ;;  %v54_v5 = vpack.c.bf16 %v50_v4, %v50_v4  ;;  %v51_v6 = vld [vmem:[#allocation3] sm:$0x3] }
   0xf   :  { %877 = vmatpush.bf16.msrb.mxu2 %v1200_v0  ;;  %1007 = vmatpush.bf16.msrb.mxu3 %v1200_v0  ;;  %v131_v7 = vrot.slane %v51_v6, 1 }
  0x10   :  { %1161 = vmatmul.msk.bf16.vlgmr.msra.gmra.mxu0 %vm67_vm1, %v54_v5 }
  0x11   :  { %134 = vrot.lane.b32.xlu1 %v131_v7, %s1383_s2  ;;  %v191_v7 = vld [vmem:[%s1833_s0 + $0x1] sm:$0x1] }
  0x12   :  { %613 = vmatpush.bf16.msrb.mxu0 %v1199_v3  ;;  %743 = vmatpush.bf16.msrb.mxu1 %v1199_v3 }
  0x13   :  { %878 = vmatpush.bf16.msrb.mxu2 %v1199_v3  ;;  %1008 = vmatpush.bf16.msrb.mxu3 %v1199_v3 }
  0x19   :  { %132 = vrot.lane.b32.xlu1 %v51_v6, %s1383_s2 }
  0x83   :  { %v135_v47 = vpop.permute.xlu1 %134 }
  0x8b   :  { %v133_v51 = vpop.permute.xlu1 %132 }
  0x8d   :  { %v80_v8 = vpop.f32.mrf.mxu0 }
  0x8e   :  { %v85_v10 = vrot.slane %v80_v8, 1  ;;  %v88_v14 = vadd.f32 %v80_v8, %v52_v12  ;;  %v192_v8 = vld [vmem:[%s1833_s0 + $0x9] sm:$0x1] }
  0x90   :  { %v89_v11 = vadd.f32 %v85_v10, %v53_v9  ;;  %v1162_v18 = vmul.f32 -1.442695, %v88_v14 }
  0x92   :  { %1226 = vtanh.f32 %v89_v11  ;;  %v1163_v17 = vmul.f32 -1.442695, %v89_v11 }
  0x93   :  { %1228 = vtanh.f32 %v88_v14 }
  0x94   :  { %1230 = vpow2.f32 %v1163_v17 }
  0x95   :  { %v82_v13 = vpop.f32.mrf.mxu0  ;;  %1232 = vpow2.f32 %v1162_v18 }
  0x98   :  { %v1227_v15 = vpop.eup %1226 }
  0x99   :  { %144 = vrot.lane.b32.xlu0 %v1227_v15, %s1381_s26  ;;  %v1229_v16 = vpop.eup %1228 }
  0x9a   :  { %v1231_v19 = vpop.eup %1230 }
  0x9b   :  { %v97_v20 = vadd.f32 1.0, %v1231_v19  ;;  %v1233_v21 = vpop.eup %1232 }
  0x9c   :  { %v96_v22 = vadd.f32 1.0, %v1233_v21 }
  0x9d   :  { %1234 = vrcp.f32 %v97_v20  ;;  %v124_v31 = vand.u32 2147483648, %v97_v20  ;;  %vm118_vm3 = vweird.f32 %v97_v20  ;;  %v122_v32 = vand.u32 2147483647, %v97_v20 }
  0x9e   :  { %1236 = vrcp.f32 %v96_v22  ;;  %v109_v40 = vand.u32 2147483648, %v96_v22  ;;  %vm103_vm7 = vweird.f32 %v96_v22  ;;  %v107_v41 = vand.u32 2147483647, %v96_v22 }
  0x9f   :  { %v125_v35 = vor.u32 1.1754944e-38, %v124_v31  ;;  %vm123_vm5 = vcmp.eq.f32.partialorder %v122_v32, 8.507059e+37 }
  0xa0   :  { %v110_v43 = vor.u32 1.1754944e-38, %v109_v40  ;;  %vm108_vm9 = vcmp.eq.f32.partialorder %v107_v41, 8.507059e+37 }
  0xa1   :  { %142 = vrot.lane.b32.xlu0 %v1229_v16, %s1381_s26 }
  0xa3   :  { %v1235_v23 = vpop.eup %1234 }
  0xa4   :  { %v114_v24 = vmul.f32 %v1235_v23, %v97_v20  ;;  %v1237_v26 = vpop.eup %1236  ;;  %vm119_vm2 = vweird.f32 %v1235_v23 }
  0xa5   :  { %v99_v28 = vmul.f32 %v1237_v26, %v96_v22  ;;  %vm120_vm4 = vmor %vm118_vm3, %vm119_vm2  ;;  %vm104_vm6 = vweird.f32 %v1237_v26 }
  0xa6   :  { %v115_v25 = vsub.f32 1.0, %v114_v24  ;;  %vm105_vm8 = vmor %vm103_vm7, %vm104_vm6 }
  0xa7   :  { %v100_v30 = vsub.f32 1.0, %v99_v28 }
  0xa8   :  { %v116_v27 = vmul.f32 %v1235_v23, %v115_v25 }
  0xa9   :  { %v101_v34 = vmul.f32 %v1237_v26, %v100_v30 }
  0xaa   :  { %v117_v29 = vadd.f32 %v1235_v23, %v116_v27 }
  0xab   :  { %v102_v38 = vadd.f32 %v1237_v26, %v101_v34 }
  0xac   :  { %v121_v33 = vsel %vm120_vm4, %v1235_v23, %v117_v29 }
  0xad   :  { %v126_v36 = vsel %vm123_vm5, %v125_v35, %v121_v33  ;;  %v106_v42 = vsel %vm105_vm8, %v1237_v26, %v102_v38 }
  0xae   :  { %v111_v44 = vsel %vm108_vm9, %v110_v43, %v106_v42  ;;  %v139_v48 = vmul.f32 %v135_v47, %v126_v36 }
  0xaf   :  { %v138_v52 = vmul.f32 %v133_v51, %v111_v44 }
 0x10b   :  { %v145_v37 = vpop.permute.xlu0 %144 }
 0x10c   :  { %v149_v39 = vmul.f32 %v145_v37, %v126_v36 }
 0x10e   :  { %154 = vrot.lane.b32.xlu2 %v149_v39, %s1383_s2 }
 0x113   :  { %v143_v45 = vpop.permute.xlu0 %142 }
 0x114   :  { %v148_v46 = vmul.f32 %v143_v45, %v111_v44 }
 0x116   :  { %152 = vrot.lane.b32.xlu2 %v148_v46, %s1383_s2 }
 0x168   :  { %v155_v49 = vpop.permute.xlu2 %154 }
 0x169   :  { %v1446_v50 = vadd.f32 %v155_v49, %v139_v48 }
 0x16b   :  { %1238 = vtanh.f32 %v1446_v50 }
 0x170   :  { %v153_v53 = vpop.permute.xlu2 %152 }
 0x171   :  { %v1239_v54 = vpop.eup %1238  ;;  %v1449_v55 = vadd.f32 %v153_v53, %v138_v52 }
 0x172   :  { %166 = vrot.lane.b32.xlu0 %v1239_v54, %s1381_s26 }
 0x173   :  { %1240 = vtanh.f32 %v1449_v55 }
 0x179   :  { %v1241_v56 = vpop.eup %1240 }
 0x17a   :  { %164 = vrot.lane.b32.xlu1 %v1241_v56, %s1381_s26 }
 0x1e4   :  { %v167_v57 = vpop.permute.xlu0 %166 }
 0x1e5   :  { %v171_v58 = vmul.f32 %v167_v57, %v126_v36 }
 0x1e7   :  { %v1454_v59 = vpack.c.bf16 %v171_v58, %v171_v58 }
 0x1e9   :  { %v194_v60 = vunpack.c.l.b16 %v1454_v59 }
 0x1eb   :  { %v1165_v63 = vunpack.i.l.s16 %v194_v60 }
 0x1ec   :  { %v165_v61 = vpop.permute.xlu1 %164 }
 0x1ed   :  { %v170_v62 = vmul.f32 %v165_v61, %v111_v44  ;;  %v199_v2 = vrot.slane %v1165_v63, 7 }
 0x1ef   :  { %v1457_v0 = vpack.c.bf16 %v170_v62, %v170_v62 }
 0x1f1   :  { %v193_v1 = vunpack.c.l.b16 %v1457_v0 }
 0x1f3   :  { %v1164_v3 = vunpack.i.l.s16 %v193_v1 }
 0x1f5   :  { %v201_v4 = vsel %vm200_vm10, %v199_v2, %v1164_v3 }
 0x1f6   :  { %v202_v5 = vpack.c.b16 %v201_v4, %v201_v4 }
 0x1f8   :  { %203 = vrot.lane.b32.xlu2 %v202_v5, %s1383_s2 }
 0x252   :  { %v204_v6 = vpop.permute.xlu2 %203 }
 0x253   :  { %1166 = vmatmul.msk.bf16.vlgmr.msra.gmra.mxu1 %vm67_vm1, %v204_v6 }
 0x2d0   :  { %v217_v9 = vpop.f32.mrf.mxu1 }
 0x2d1   :  { %v222_v10 = vrot.slane %v217_v9, 1  ;;  %v225_v11 = vadd.f32 %v217_v9, %v191_v7  ;;  %v323_v9 = vld [vmem:[%s1833_s0 + $0x2] sm:$0x1] }
 0x2d3   :  { %v226_v12 = vadd.f32 %v222_v10, %v192_v8  ;;  %1242 = vtanh.f32 %v225_v11  ;;  %v1167_v16 = vmul.f32 -1.442695, %v225_v11  ;;  %v324_v10 = vld [vmem:[%s1833_s0 + $0xa] sm:$0x1] }
 0x2d5   :  { %1244 = vtanh.f32 %v226_v12  ;;  %v1168_v17 = vmul.f32 -1.442695, %v226_v12 }
 0x2d6   :  { %1246 = vpow2.f32 %v1167_v16 }
 0x2d7   :  { %1248 = vpow2.f32 %v1168_v17 }
 0x2d8   :  { %v219_v13 = vpop.f32.mrf.mxu1 }
 0x2d9   :  { %v1243_v14 = vpop.eup %1242 }
 0x2da   :  { %271 = vrot.lane.b32.xlu1 %v1243_v14, %s1381_s26 }
 0x2db   :  { %v1245_v15 = vpop.eup %1244 }
 0x2dc   :  { %273 = vrot.lane.b32.xlu0 %v1245_v15, %s1381_s26  ;;  %v1247_v18 = vpop.eup %1246 }
 0x2dd   :  { %v1249_v19 = vpop.eup %1248  ;;  %v233_v20 = vadd.f32 1.0, %v1247_v18 }
 0x2de   :  { %v234_v21 = vadd.f32 1.0, %v1249_v19 }
 0x2df   :  { %1250 = vrcp.f32 %v233_v20  ;;  %v246_v31 = vand.u32 2147483648, %v233_v20  ;;  %vm240_vm12 = vweird.f32 %v233_v20  ;;  %v244_v32 = vand.u32 2147483647, %v233_v20 }
 0x2e0   :  { %1252 = vrcp.f32 %v234_v21  ;;  %v261_v35 = vand.u32 2147483648, %v234_v21  ;;  %vm255_vm15 = vweird.f32 %v234_v21  ;;  %v259_v37 = vand.u32 2147483647, %v234_v21 }
 0x2e1   :  { %v247_v36 = vor.u32 1.1754944e-38, %v246_v31  ;;  %vm245_vm2 = vcmp.eq.f32.partialorder %v244_v32, 8.507059e+37 }
 0x2e2   :  { %v262_v42 = vor.u32 1.1754944e-38, %v261_v35  ;;  %vm260_vm4 = vcmp.eq.f32.partialorder %v259_v37, 8.507059e+37 }
 0x2e5   :  { %v1251_v22 = vpop.eup %1250 }
 0x2e6   :  { %v1253_v23 = vpop.eup %1252  ;;  %v236_v24 = vmul.f32 %v1251_v22, %v233_v20  ;;  %vm241_vm11 = vweird.f32 %v1251_v22 }
 0x2e7   :  { %v251_v25 = vmul.f32 %v1253_v23, %v234_v21  ;;  %vm242_vm13 = vmor %vm240_vm12, %vm241_vm11  ;;  %vm256_vm14 = vweird.f32 %v1253_v23 }
 0x2e8   :  { %v237_v26 = vsub.f32 1.0, %v236_v24  ;;  %vm257_vm3 = vmor %vm255_vm15, %vm256_vm14 }
 0x2e9   :  { %v252_v27 = vsub.f32 1.0, %v251_v25 }
 0x2ea   :  { %v238_v28 = vmul.f32 %v1251_v22, %v237_v26 }
 0x2eb   :  { %v253_v29 = vmul.f32 %v1253_v23, %v252_v27 }
 0x2ec   :  { %v239_v30 = vadd.f32 %v1251_v22, %v238_v28 }
 0x2ed   :  { %v254_v33 = vadd.f32 %v1253_v23, %v253_v29 }
 0x2ee   :  { %v243_v34 = vsel %vm242_vm13, %v1251_v22, %v239_v30 }
 0x2ef   :  { %v248_v39 = vsel %vm245_vm2, %v247_v36, %v243_v34  ;;  %v258_v40 = vsel %vm257_vm3, %v1253_v23, %v254_v33 }
 0x2f0   :  { %v263_v44 = vsel %vm260_vm4, %v262_v42, %v258_v40  ;;  %v267_v51 = vmul.f32 %v248_v39, %v1449_v55 }
 0x2f1   :  { %v268_v46 = vmul.f32 %v263_v44, %v1446_v50 }
 0x34c   :  { %v272_v38 = vpop.permute.xlu1 %271 }
 0x34d   :  { %v277_v41 = vmul.f32 %v272_v38, %v248_v39 }
 0x34e   :  { %v274_v43 = vpop.permute.xlu0 %273 }
 0x34f   :  { %281 = vrot.lane.b32.xlu0 %v277_v41, %s1383_s2  ;;  %v278_v45 = vmul.f32 %v274_v43, %v263_v44 }
 0x351   :  { %283 = vrot.lane.b32.xlu2 %v278_v45, %s1383_s2 }
 0x3ab   :  { %v284_v47 = vpop.permute.xlu2 %283 }
 0x3ac   :  { %v1474_v48 = vadd.f32 %v284_v47, %v268_v46 }
 0x3ae   :  { %1254 = vtanh.f32 %v1474_v48 }
 0x3b4   :  { %v1255_v49 = vpop.eup %1254 }
 0x3b5   :  { %295 = vrot.lane.b32.xlu1 %v1255_v49, %s1381_s26 }
 0x3c1   :  { %v282_v52 = vpop.permute.xlu0 %281 }
 0x3c2   :  { %v1479_v53 = vadd.f32 %v282_v52, %v267_v51 }
 0x3c4   :  { %1256 = vtanh.f32 %v1479_v53 }
 0x3ca   :  { %v1257_v54 = vpop.eup %1256 }
 0x3cb   :  { %293 = vrot.lane.b32.xlu2 %v1257_v54, %s1381_s26 }
 0x425   :  { %v294_v56 = vpop.permute.xlu2 %293 }
 0x426   :  { %v299_v50 = vmul.f32 %v294_v56, %v248_v39 }
 0x427   :  { %v296_v57 = vpop.permute.xlu1 %295 }
 0x428   :  { %v301_v58 = vpack.c.bf16 %v299_v50, %v299_v50  ;;  %v300_v60 = vmul.f32 %v296_v57, %v263_v44 }
 0x42a   :  { %v302_v61 = vpack.c.bf16 %v300_v60, %v300_v60  ;;  %v304_v62 = vshll.u32 %v301_v58, 16  ;;  %v327_v63 = vunpack.c.l.b16 %v301_v58 }
 0x42c   :  { %v307_v1 = vshll.u32 %v302_v61, 16  ;;  %v328_v2 = vunpack.c.l.b16 %v302_v61  ;;  %v1169_v4 = vunpack.i.l.s16 %v327_v63 }
 0x42e   :  { %v1170_v3 = vunpack.i.l.s16 %v328_v2  ;;  %v1483_v55 = vpack.i.bf16 %v307_v1, %v304_v62 }
 0x430   :  { %v333_v5 = vrot.slane %v1170_v3, 7 }
 0x432   :  { %v334_v6 = vsel %vm200_vm10, %v333_v5, %v1169_v4 }
 0x433   :  { %v335_v7 = vpack.c.b16 %v334_v6, %v334_v6 }
 0x435   :  { %336 = vrot.lane.b32.xlu0 %v335_v7, %s1383_s2 }
 0x4a7   :  { %v337_v8 = vpop.permute.xlu0 %336 }
 0x4a8   :  { %1171 = vmatmul.msk.bf16.vlgmr.msra.gmra.mxu2 %vm67_vm1, %v337_v8 }
 0x52b   :  { %v350_v11 = vpop.f32.mrf.mxu2 }
 0x52c   :  { %v355_v12 = vrot.slane %v350_v11, 1  ;;  %v358_v13 = vadd.f32 %v350_v11, %v323_v9  ;;  %v455_v9 = vld [vmem:[%s1833_s0 + $0x3] sm:$0x1] }
 0x52e   :  { %v359_v14 = vadd.f32 %v355_v12, %v324_v10  ;;  %1258 = vtanh.f32 %v358_v13  ;;  %v1172_v18 = vmul.f32 -1.442695, %v358_v13  ;;  %v456_v10 = vld [vmem:[%s1833_s0 + $0xb] sm:$0x1] }
 0x530   :  { %1260 = vtanh.f32 %v359_v14  ;;  %v1173_v23 = vmul.f32 -1.442695, %v359_v14 }
 0x531   :  { %1262 = vpow2.f32 %v1172_v18 }
 0x533   :  { %v352_v15 = vpop.f32.mrf.mxu2 }
 0x534   :  { %v1259_v16 = vpop.eup %1258 }
 0x535   :  { %404 = vrot.lane.b32.xlu2 %v1259_v16, %s1381_s26 }
 0x536   :  { %v1261_v17 = vpop.eup %1260 }
 0x537   :  { %406 = vrot.lane.b32.xlu1 %v1261_v17, %s1381_s26  ;;  %v1263_v19 = vpop.eup %1262 }
 0x538   :  { %v366_v20 = vadd.f32 1.0, %v1263_v19 }
 0x53a   :  { %1264 = vrcp.f32 %v366_v20  ;;  %v379_v28 = vand.u32 2147483648, %v366_v20  ;;  %vm373_vm6 = vweird.f32 %v366_v20  ;;  %v377_v30 = vand.u32 2147483647, %v366_v20 }
 0x53b   :  { %1266 = vpow2.f32 %v1173_v23 }
 0x53c   :  { %v380_v32 = vor.u32 1.1754944e-38, %v379_v28  ;;  %vm378_vm8 = vcmp.eq.f32.partialorder %v377_v30, 8.507059e+37 }
 0x540   :  { %v1265_v21 = vpop.eup %1264 }
 0x541   :  { %v369_v22 = vmul.f32 %v1265_v21, %v366_v20  ;;  %v1267_v26 = vpop.eup %1266  ;;  %vm374_vm5 = vweird.f32 %v1265_v21 }
 0x542   :  { %v367_v29 = vadd.f32 1.0, %v1267_v26  ;;  %vm375_vm7 = vmor %vm373_vm6, %vm374_vm5 }
 0x543   :  { %v370_v24 = vsub.f32 1.0, %v369_v22 }
 0x544   :  { %1268 = vrcp.f32 %v367_v29  ;;  %v394_v41 = vand.u32 2147483648, %v367_v29  ;;  %vm388_vm11 = vweird.f32 %v367_v29  ;;  %v392_v42 = vand.u32 2147483647, %v367_v29 }
 0x545   :  { %v371_v25 = vmul.f32 %v1265_v21, %v370_v24 }
 0x546   :  { %v395_v44 = vor.u32 1.1754944e-38, %v394_v41  ;;  %vm393_vm13 = vcmp.eq.f32.partialorder %v392_v42, 8.507059e+37 }
 0x547   :  { %v372_v27 = vadd.f32 %v1265_v21, %v371_v25 }
 0x549   :  { %v376_v31 = vsel %vm375_vm7, %v1265_v21, %v372_v27 }
 0x54a   :  { %v381_v34 = vsel %vm378_vm8, %v380_v32, %v376_v31  ;;  %v1269_v36 = vpop.eup %1268 }
 0x54b   :  { %v384_v37 = vmul.f32 %v1269_v36, %v367_v29  ;;  %vm389_vm9 = vweird.f32 %v1269_v36  ;;  %v400_v49 = vmul.f32 %v381_v34, %v1479_v53 }
 0x54c   :  { %vm390_vm12 = vmor %vm388_vm11, %vm389_vm9 }
 0x54d   :  { %v385_v38 = vsub.f32 1.0, %v384_v37 }
 0x54f   :  { %v386_v39 = vmul.f32 %v1269_v36, %v385_v38 }
 0x551   :  { %v387_v40 = vadd.f32 %v1269_v36, %v386_v39 }
 0x553   :  { %v391_v43 = vsel %vm390_vm12, %v1269_v36, %v387_v40 }
 0x554   :  { %v396_v46 = vsel %vm393_vm13, %v395_v44, %v391_v43 }
 0x555   :  { %v401_v56 = vmul.f32 %v396_v46, %v1474_v48 }
 0x58f   :  { %v405_v33 = vpop.permute.xlu2 %404 }
 0x590   :  { %v410_v35 = vmul.f32 %v405_v33, %v381_v34 }
 0x592   :  { %414 = vrot.lane.b32.xlu1 %v410_v35, %s1383_s2 }
 0x5a9   :  { %v407_v45 = vpop.permute.xlu1 %406 }
 0x5aa   :  { %v411_v47 = vmul.f32 %v407_v45, %v396_v46 }
 0x5ac   :  { %416 = vrot.lane.b32.xlu0 %v411_v47, %s1383_s2 }
 0x604   :  { %v415_v51 = vpop.permute.xlu1 %414 }
 0x605   :  { %v1499_v52 = vadd.f32 %v415_v51, %v400_v49 }
 0x607   :  { %1270 = vtanh.f32 %v1499_v52 }
 0x60d   :  { %v1271_v54 = vpop.eup %1270 }
 0x60e   :  { %426 = vrot.lane.b32.xlu0 %v1271_v54, %s1381_s26 }
 0x61e   :  { %v417_v50 = vpop.permute.xlu0 %416 }
 0x61f   :  { %v1504_v57 = vadd.f32 %v417_v50, %v401_v56 }
 0x621   :  { %1272 = vtanh.f32 %v1504_v57 }
 0x627   :  { %v1273_v58 = vpop.eup %1272 }
 0x628   :  { %428 = vrot.lane.b32.xlu2 %v1273_v58, %s1381_s26 }
 0x680   :  { %v427_v60 = vpop.permute.xlu0 %426 }
 0x681   :  { %v432_v53 = vmul.f32 %v427_v60, %v381_v34 }
 0x682   :  { %v429_v61 = vpop.permute.xlu2 %428 }
 0x683   :  { %v1508_v62 = vpack.c.bf16 %v432_v53, %v432_v53  ;;  %v433_v63 = vmul.f32 %v429_v61, %v396_v46 }
 0x685   :  { %v1510_v1 = vpack.c.bf16 %v433_v63, %v433_v63  ;;  %v457_v2 = vunpack.c.l.b16 %v1508_v62 }
 0x687   :  { %v458_v48 = vunpack.c.l.b16 %v1510_v1  ;;  %v1174_v4 = vunpack.i.l.s16 %v457_v2 }
 0x689   :  { %v1175_v3 = vunpack.i.l.s16 %v458_v48 }
 0x68b   :  { %v463_v5 = vrot.slane %v1175_v3, 7 }
 0x68d   :  { %v464_v6 = vsel %vm200_vm10, %v463_v5, %v1174_v4 }
 0x68e   :  { %v465_v7 = vpack.c.b16 %v464_v6, %v464_v6 }
 0x690   :  { %466 = vrot.lane.b32.xlu1 %v465_v7, %s1383_s2 }
 0x702   :  { %v467_v8 = vpop.permute.xlu1 %466 }
 0x703   :  { %1176 = vmatmul.msk.bf16.vlgmr.msra.gmra.mxu3 %vm67_vm1, %v467_v8 }
 0x786   :  { %v480_v11 = vpop.f32.mrf.mxu3 }
 0x787   :  { %v485_v12 = vrot.slane %v480_v11, 1  ;;  %v488_v13 = vadd.f32 %v480_v11, %v455_v9 }
 0x789   :  { %v489_v14 = vadd.f32 %v485_v12, %v456_v10  ;;  %1274 = vtanh.f32 %v488_v13  ;;  %v1177_v21 = vmul.f32 -1.442695, %v488_v13 }
 0x78b   :  { %1276 = vtanh.f32 %v489_v14  ;;  %v1178_v18 = vmul.f32 -1.442695, %v489_v14 }
 0x78d   :  { %1278 = vpow2.f32 %v1178_v18 }
 0x78e   :  { %v482_v15 = vpop.f32.mrf.mxu3 }
 0x78f   :  { %v1275_v16 = vpop.eup %1274 }
 0x790   :  { %534 = vrot.lane.b32.xlu0 %v1275_v16, %s1381_s26  ;;  %v588_v16 = vld [vmem:[%s1833_s0 + $0x4] sm:$0x1] }
 0x791   :  { %v1277_v17 = vpop.eup %1276 }
 0x792   :  { %536 = vrot.lane.b32.xlu2 %v1277_v17, %s1381_s26  ;;  %v589_v17 = vld [vmem:[%s1833_s0 + $0xc] sm:$0x1] }
 0x793   :  { %v1279_v19 = vpop.eup %1278 }
 0x794   :  { %v497_v20 = vadd.f32 1.0, %v1279_v19 }
 0x796   :  { %1280 = vrcp.f32 %v497_v20  ;;  %v524_v29 = vand.u32 2147483648, %v497_v20  ;;  %vm518_vm15 = vweird.f32 %v497_v20  ;;  %v522_v30 = vand.u32 2147483647, %v497_v20 }
 0x797   :  { %1282 = vpow2.f32 %v1177_v21 }
 0x798   :  { %v525_v32 = vor.u32 1.1754944e-38, %v524_v29  ;;  %vm523_vm3 = vcmp.eq.f32.partialorder %v522_v30, 8.507059e+37 }
 0x79c   :  { %v1281_v22 = vpop.eup %1280 }
 0x79d   :  { %v514_v23 = vmul.f32 %v1281_v22, %v497_v20  ;;  %v1283_v25 = vpop.eup %1282  ;;  %vm519_vm14 = vweird.f32 %v1281_v22 }
 0x79e   :  { %v496_v26 = vadd.f32 1.0, %v1283_v25  ;;  %vm520_vm2 = vmor %vm518_vm15, %vm519_vm14 }
 0x79f   :  { %v515_v24 = vsub.f32 1.0, %v514_v23 }
 0x7a0   :  { %1284 = vrcp.f32 %v496_v26  ;;  %v509_v41 = vand.u32 2147483648, %v496_v26  ;;  %vm503_vm5 = vweird.f32 %v496_v26  ;;  %v507_v42 = vand.u32 2147483647, %v496_v26 }
 0x7a1   :  { %v516_v27 = vmul.f32 %v1281_v22, %v515_v24 }
 0x7a2   :  { %v510_v44 = vor.u32 1.1754944e-38, %v509_v41  ;;  %vm508_vm7 = vcmp.eq.f32.partialorder %v507_v42, 8.507059e+37 }
 0x7a3   :  { %v517_v28 = vadd.f32 %v1281_v22, %v516_v27 }
 0x7a5   :  { %v521_v31 = vsel %vm520_vm2, %v1281_v22, %v517_v28 }
 0x7a6   :  { %v1285_v33 = vpop.eup %1284  ;;  %v526_v35 = vsel %vm523_vm3, %v525_v32, %v521_v31 }
 0x7a7   :  { %v499_v37 = vmul.f32 %v1285_v33, %v496_v26  ;;  %vm504_vm4 = vweird.f32 %v1285_v33  ;;  %v531_v56 = vmul.f32 %v526_v35, %v1504_v57 }
 0x7a8   :  { %vm505_vm6 = vmor %vm503_vm5, %vm504_vm4 }
 0x7a9   :  { %v500_v38 = vsub.f32 1.0, %v499_v37 }
 0x7ab   :  { %v501_v39 = vmul.f32 %v1285_v33, %v500_v38 }
 0x7ad   :  { %v502_v40 = vadd.f32 %v1285_v33, %v501_v39 }
 0x7af   :  { %v506_v43 = vsel %vm505_vm6, %v1285_v33, %v502_v40 }
 0x7b0   :  { %v511_v46 = vsel %vm508_vm7, %v510_v44, %v506_v43 }
 0x7b1   :  { %v530_v49 = vmul.f32 %v511_v46, %v1499_v52 }
 0x7ec   :  { %v537_v34 = vpop.permute.xlu2 %536 }
 0x7ed   :  { %v541_v36 = vmul.f32 %v537_v34, %v526_v35 }
 0x7ef   :  { %546 = vrot.lane.b32.xlu1 %v541_v36, %s1383_s2 }
 0x802   :  { %v535_v45 = vpop.permute.xlu0 %534 }
 0x803   :  { %v540_v47 = vmul.f32 %v535_v45, %v511_v46 }
 0x805   :  { %544 = vrot.lane.b32.xlu2 %v540_v47, %s1383_s2 }
 0x85f   :  { %v545_v51 = vpop.permute.xlu2 %544 }
 0x860   :  { %v1528_v54 = vadd.f32 %v545_v51, %v530_v49 }
 0x861   :  { %v547_v50 = vpop.permute.xlu1 %546 }
 0x862   :  { %1286 = vtanh.f32 %v1528_v54  ;;  %v1532_v58 = vadd.f32 %v547_v50, %v531_v56 }
 0x864   :  { %1288 = vtanh.f32 %v1532_v58 }
 0x868   :  { %v1287_v60 = vpop.eup %1286 }
 0x869   :  { %556 = vrot.lane.b32.xlu1 %v1287_v60, %s1381_s26 }
 0x86a   :  { %v1289_v53 = vpop.eup %1288 }
 0x86b   :  { %558 = vrot.lane.b32.xlu0 %v1289_v53, %s1381_s26 }
 0x8db   :  { %v557_v61 = vpop.permute.xlu1 %556 }
 0x8dc   :  { %v562_v52 = vmul.f32 %v557_v61, %v511_v46 }
 0x8dd   :  { %v559_v2 = vpop.permute.xlu0 %558 }
 0x8de   :  { %v564_v63 = vpack.c.bf16 %v562_v52, %v562_v52  ;;  %v563_v48 = vmul.f32 %v559_v2, %v526_v35 }
 0x8e0   :  { %v567_v3 = vshll.u32 %v564_v63, 16  ;;  %v565_v57 = vpack.c.bf16 %v563_v48, %v563_v48  ;;  %v592_v4 = vunpack.c.l.b16 %v564_v63 }
 0x8e2   :  { %v571_v5 = vshll.u32 %v565_v57, 16  ;;  %v593_v6 = vunpack.c.l.b16 %v565_v57  ;;  %v1537_v7 = vrot.slane %v567_v3, 7  ;;  %v1179_v10 = vunpack.i.l.s16 %v592_v4 }
 0x8e4   :  { %v1539_v8 = vrot.slane %v571_v5, 7  ;;  %v1180_v9 = vunpack.i.l.s16 %v593_v6 }
 0x8e6   :  { %v598_v11 = vrot.slane %v1180_v9, 7  ;;  %v1211_v12 = vpack.i.bf16 %v1539_v8, %v1537_v7 }
 0x8e8   :  { %v599_v13 = vsel %vm200_vm10, %v598_v11, %v1179_v10 }
 0x8e9   :  { %v600_v14 = vpack.c.b16 %v599_v13, %v599_v13 }
 0x8eb   :  { %601 = vrot.lane.b32.xlu2 %v600_v14, %s1383_s2 }
 0x945   :  { %v602_v15 = vpop.permute.xlu2 %601 }
 0x946   :  { %1181 = vmatmul.msk.bf16.vlgmr.msrb.gmra.mxu0 %vm67_vm1, %v602_v15 }
 0x9c3   :  { %v615_v18 = vpop.f32.mrf.mxu0 }
 0x9c4   :  { %v620_v19 = vrot.slane %v615_v18, 1  ;;  %v623_v20 = vadd.f32 %v615_v18, %v588_v16 }
 0x9c6   :  { %v624_v21 = vadd.f32 %v620_v19, %v589_v17  ;;  %1290 = vtanh.f32 %v623_v20  ;;  %v1182_v25 = vmul.f32 -1.442695, %v623_v20 }
 0x9c8   :  { %1292 = vtanh.f32 %v624_v21  ;;  %v1183_v26 = vmul.f32 -1.442695, %v624_v21  ;;  %v720_v21 = vld [vmem:[%s1833_s0 + $0x5] sm:$0x1] }
 0x9c9   :  { %1294 = vpow2.f32 %v1182_v25 }
 0x9ca   :  { %1296 = vpow2.f32 %v1183_v26 }
 0x9cb   :  { %v617_v22 = vpop.f32.mrf.mxu0 }
 0x9cc   :  { %v1291_v23 = vpop.eup %1290  ;;  %v721_v22 = vld [vmem:[%s1833_s0 + $0xd] sm:$0x1] }
 0x9cd   :  { %669 = vrot.lane.b32.xlu1 %v1291_v23, %s1381_s26 }
 0x9ce   :  { %v1293_v24 = vpop.eup %1292 }
 0x9cf   :  { %671 = vrot.lane.b32.xlu0 %v1293_v24, %s1381_s26  ;;  %v1295_v27 = vpop.eup %1294 }
 0x9d0   :  { %v1297_v28 = vpop.eup %1296  ;;  %v631_v29 = vadd.f32 1.0, %v1295_v27 }
 0x9d1   :  { %v632_v30 = vadd.f32 1.0, %v1297_v28 }
 0x9d2   :  { %1298 = vrcp.f32 %v631_v29  ;;  %v644_v40 = vand.u32 2147483648, %v631_v29  ;;  %vm638_vm9 = vweird.f32 %v631_v29  ;;  %v642_v41 = vand.u32 2147483647, %v631_v29 }
 0x9d3   :  { %1300 = vrcp.f32 %v632_v30  ;;  %v659_v44 = vand.u32 2147483648, %v632_v30  ;;  %vm653_vm13 = vweird.f32 %v632_v30  ;;  %v657_v46 = vand.u32 2147483647, %v632_v30 }
 0x9d4   :  { %v645_v45 = vor.u32 1.1754944e-38, %v644_v40  ;;  %vm643_vm14 = vcmp.eq.f32.partialorder %v642_v41, 8.507059e+37 }
 0x9d5   :  { %v660_v50 = vor.u32 1.1754944e-38, %v659_v44  ;;  %vm658_vm2 = vcmp.eq.f32.partialorder %v657_v46, 8.507059e+37 }
 0x9d8   :  { %v1299_v31 = vpop.eup %1298 }
 0x9d9   :  { %v1301_v32 = vpop.eup %1300  ;;  %v634_v33 = vmul.f32 %v1299_v31, %v631_v29  ;;  %vm639_vm8 = vweird.f32 %v1299_v31 }
 0x9da   :  { %v649_v34 = vmul.f32 %v1301_v32, %v632_v30  ;;  %vm640_vm11 = vmor %vm638_vm9, %vm639_vm8  ;;  %vm654_vm12 = vweird.f32 %v1301_v32 }
 0x9db   :  { %v635_v35 = vsub.f32 1.0, %v634_v33  ;;  %vm655_vm15 = vmor %vm653_vm13, %vm654_vm12 }
 0x9dc   :  { %v650_v36 = vsub.f32 1.0, %v649_v34 }
 0x9dd   :  { %v636_v37 = vmul.f32 %v1299_v31, %v635_v35 }
 0x9de   :  { %v651_v38 = vmul.f32 %v1301_v32, %v650_v36 }
 0x9df   :  { %v637_v39 = vadd.f32 %v1299_v31, %v636_v37 }
 0x9e0   :  { %v652_v42 = vadd.f32 %v1301_v32, %v651_v38 }
 0x9e1   :  { %v641_v43 = vsel %vm640_vm11, %v1299_v31, %v637_v39 }
 0x9e2   :  { %v646_v49 = vsel %vm643_vm14, %v645_v45, %v641_v43  ;;  %v656_v51 = vsel %vm655_vm15, %v1301_v32, %v652_v42 }
 0x9e3   :  { %v661_v53 = vsel %vm658_vm2, %v660_v50, %v656_v51  ;;  %v665_v3 = vmul.f32 %v646_v49, %v1528_v54 }
 0x9e4   :  { %v666_v52 = vmul.f32 %v661_v53, %v1532_v58 }
 0xa3f   :  { %v670_v47 = vpop.permute.xlu1 %669 }
 0xa40   :  { %v675_v56 = vmul.f32 %v670_v47, %v646_v49 }
 0xa41   :  { %v672_v60 = vpop.permute.xlu0 %671 }
 0xa42   :  { %679 = vrot.lane.b32.xlu0 %v675_v56, %s1383_s2  ;;  %v676_v61 = vmul.f32 %v672_v60, %v661_v53 }
 0xa44   :  { %681 = vrot.lane.b32.xlu2 %v676_v61, %s1383_s2 }
 0xa9e   :  { %v682_v63 = vpop.permute.xlu2 %681 }
 0xa9f   :  { %v1557_v2 = vadd.f32 %v682_v63, %v666_v52 }
 0xaa1   :  { %1302 = vtanh.f32 %v1557_v2 }
 0xaa7   :  { %v1303_v48 = vpop.eup %1302 }
 0xaa8   :  { %693 = vrot.lane.b32.xlu1 %v1303_v48, %s1381_s26 }
 0xab4   :  { %v680_v57 = vpop.permute.xlu0 %679 }
 0xab5   :  { %v1562_v4 = vadd.f32 %v680_v57, %v665_v3 }
 0xab7   :  { %1304 = vtanh.f32 %v1562_v4 }
 0xabd   :  { %v1305_v5 = vpop.eup %1304 }
 0xabe   :  { %691 = vrot.lane.b32.xlu2 %v1305_v5, %s1381_s26 }
 0xb18   :  { %v692_v6 = vpop.permute.xlu2 %691 }
 0xb19   :  { %v697_v58 = vmul.f32 %v692_v6, %v646_v49 }
 0xb1a   :  { %v694_v9 = vpop.permute.xlu1 %693 }
 0xb1b   :  { %v1566_v10 = vpack.c.bf16 %v697_v58, %v697_v58  ;;  %v698_v11 = vmul.f32 %v694_v9, %v661_v53 }
 0xb1d   :  { %v1568_v13 = vpack.c.bf16 %v698_v11, %v698_v11  ;;  %v722_v14 = vunpack.c.l.b16 %v1566_v10 }
 0xb1f   :  { %v723_v54 = vunpack.c.l.b16 %v1568_v13  ;;  %v1184_v16 = vunpack.i.l.s16 %v722_v14 }
 0xb21   :  { %v1185_v15 = vunpack.i.l.s16 %v723_v54 }
 0xb23   :  { %v728_v17 = vrot.slane %v1185_v15, 7 }
 0xb25   :  { %v729_v18 = vsel %vm200_vm10, %v728_v17, %v1184_v16 }
 0xb26   :  { %v730_v19 = vpack.c.b16 %v729_v18, %v729_v18 }
 0xb28   :  { %731 = vrot.lane.b32.xlu0 %v730_v19, %s1383_s2 }
 0xb9a   :  { %v732_v20 = vpop.permute.xlu0 %731 }
 0xb9b   :  { %1186 = vmatmul.msk.bf16.vlgmr.msrb.gmra.mxu1 %vm67_vm1, %v732_v20 }
 0xc18   :  { %v745_v23 = vpop.f32.mrf.mxu1 }
 0xc19   :  { %v750_v24 = vrot.slane %v745_v23, 1  ;;  %v753_v25 = vadd.f32 %v745_v23, %v720_v21 }
 0xc1b   :  { %v754_v26 = vadd.f32 %v750_v24, %v721_v22  ;;  %1306 = vtanh.f32 %v753_v25  ;;  %v1187_v30 = vmul.f32 -1.442695, %v753_v25 }
 0xc1d   :  { %1308 = vtanh.f32 %v754_v26  ;;  %v1188_v35 = vmul.f32 -1.442695, %v754_v26 }
 0xc1e   :  { %1310 = vpow2.f32 %v1187_v30 }
 0xc20   :  { %v747_v27 = vpop.f32.mrf.mxu1 }
 0xc21   :  { %v1307_v28 = vpop.eup %1306 }
 0xc22   :  { %799 = vrot.lane.b32.xlu2 %v1307_v28, %s1381_s26 }
 0xc23   :  { %v1309_v29 = vpop.eup %1308 }
 0xc24   :  { %801 = vrot.lane.b32.xlu1 %v1309_v29, %s1381_s26  ;;  %v1311_v31 = vpop.eup %1310 }
 0xc25   :  { %v761_v32 = vadd.f32 1.0, %v1311_v31 }
 0xc27   :  { %1312 = vrcp.f32 %v761_v32  ;;  %v774_v40 = vand.u32 2147483648, %v761_v32  ;;  %vm768_vm4 = vweird.f32 %v761_v32  ;;  %v772_v42 = vand.u32 2147483647, %v761_v32 }
 0xc28   :  { %1314 = vpow2.f32 %v1188_v35 }
 0xc29   :  { %v775_v44 = vor.u32 1.1754944e-38, %v774_v40  ;;  %vm773_vm6 = vcmp.eq.f32.partialorder %v772_v42, 8.507059e+37 }
 0xc2d   :  { %v1313_v33 = vpop.eup %1312 }
 0xc2e   :  { %v764_v34 = vmul.f32 %v1313_v33, %v761_v32  ;;  %v1315_v38 = vpop.eup %1314  ;;  %vm769_vm3 = vweird.f32 %v1313_v33 }
 0xc2f   :  { %v762_v41 = vadd.f32 1.0, %v1315_v38  ;;  %vm770_vm5 = vmor %vm768_vm4, %vm769_vm3 }
 0xc30   :  { %v765_v36 = vsub.f32 1.0, %v764_v34  ;;  %v854_v34 = vld [vmem:[%s1833_s0 + $0xe] sm:$0x1] }
 0xc31   :  { %1316 = vrcp.f32 %v762_v41  ;;  %v789_v53 = vand.u32 2147483648, %v762_v41  ;;  %vm783_vm8 = vweird.f32 %v762_v41  ;;  %v787_v61 = vand.u32 2147483647, %v762_v41 }
 0xc32   :  { %v766_v37 = vmul.f32 %v1313_v33, %v765_v36 }
 0xc33   :  { %v790_v63 = vor.u32 1.1754944e-38, %v789_v53  ;;  %vm788_vm11 = vcmp.eq.f32.partialorder %v787_v61, 8.507059e+37 }
 0xc34   :  { %v767_v39 = vadd.f32 %v1313_v33, %v766_v37 }
 0xc36   :  { %v771_v43 = vsel %vm770_vm5, %v1313_v33, %v767_v39  ;;  %v853_v33 = vld [vmem:[%s1833_s0 + $0x6] sm:$0x1] }
 0xc37   :  { %v776_v46 = vsel %vm773_vm6, %v775_v44, %v771_v43  ;;  %v1317_v49 = vpop.eup %1316 }
 0xc38   :  { %v779_v51 = vmul.f32 %v1317_v49, %v762_v41  ;;  %vm784_vm7 = vweird.f32 %v1317_v49  ;;  %v795_v5 = vmul.f32 %v776_v46, %v1562_v4 }
 0xc39   :  { %vm785_vm9 = vmor %vm783_vm8, %vm784_vm7 }
 0xc3a   :  { %v780_v56 = vsub.f32 1.0, %v779_v51 }
 0xc3c   :  { %v781_v50 = vmul.f32 %v1317_v49, %v780_v56 }
 0xc3e   :  { %v782_v60 = vadd.f32 %v1317_v49, %v781_v50 }
 0xc40   :  { %v786_v52 = vsel %vm785_vm9, %v1317_v49, %v782_v60 }
 0xc41   :  { %v791_v3 = vsel %vm788_vm11, %v790_v63, %v786_v52 }
 0xc42   :  { %v796_v11 = vmul.f32 %v791_v3, %v1557_v2 }
 0xc7c   :  { %v800_v45 = vpop.permute.xlu2 %799 }
 0xc7d   :  { %v805_v47 = vmul.f32 %v800_v45, %v776_v46 }
 0xc7f   :  { %809 = vrot.lane.b32.xlu1 %v805_v47, %s1383_s2 }
 0xc96   :  { %v802_v48 = vpop.permute.xlu1 %801 }
 0xc97   :  { %v806_v57 = vmul.f32 %v802_v48, %v791_v3 }
 0xc99   :  { %811 = vrot.lane.b32.xlu0 %v806_v57, %s1383_s2 }
 0xcf1   :  { %v810_v6 = vpop.permute.xlu1 %809 }
 0xcf2   :  { %v1586_v58 = vadd.f32 %v810_v6, %v795_v5 }
 0xcf4   :  { %1318 = vtanh.f32 %v1586_v58 }
 0xcfa   :  { %v1319_v9 = vpop.eup %1318 }
 0xcfb   :  { %821 = vrot.lane.b32.xlu0 %v1319_v9, %s1381_s26 }
 0xd0b   :  { %v812_v14 = vpop.permute.xlu0 %811 }
 0xd0c   :  { %v1591_v54 = vadd.f32 %v812_v14, %v796_v11 }
 0xd0e   :  { %1320 = vtanh.f32 %v1591_v54 }
 0xd14   :  { %v1321_v15 = vpop.eup %1320 }
 0xd15   :  { %823 = vrot.lane.b32.xlu2 %v1321_v15, %s1381_s26 }
 0xd6d   :  { %v822_v16 = vpop.permute.xlu0 %821 }
 0xd6e   :  { %v827_v4 = vmul.f32 %v822_v16, %v776_v46 }
 0xd6f   :  { %v824_v18 = vpop.permute.xlu2 %823 }
 0xd70   :  { %v829_v17 = vpack.c.bf16 %v827_v4, %v827_v4  ;;  %v828_v19 = vmul.f32 %v824_v18, %v791_v3 }
 0xd72   :  { %v832_v20 = vshll.u32 %v829_v17, 16  ;;  %v830_v21 = vpack.c.bf16 %v828_v19, %v828_v19  ;;  %v857_v22 = vunpack.c.l.b16 %v829_v17 }
 0xd74   :  { %v836_v23 = vshll.u32 %v830_v21, 16  ;;  %v858_v24 = vunpack.c.l.b16 %v830_v21  ;;  %v1595_v25 = vrot.slane %v832_v20, 6  ;;  %v1189_v27 = vunpack.i.l.s16 %v857_v22 }
 0xd76   :  { %v1597_v2 = vrot.slane %v836_v23, 6  ;;  %v1190_v26 = vunpack.i.l.s16 %v858_v24 }
 0xd78   :  { %v863_v28 = vrot.slane %v1190_v26, 7  ;;  %v1216_v29 = vpack.i.bf16 %v1597_v2, %v1595_v25  ;;  %v704_v2 = vrot.slane %v1568_v13, 6 }
 0xd7a   :  { %v864_v30 = vsel %vm200_vm10, %v863_v28, %v1189_v27 }
 0xd7b   :  { %v865_v31 = vpack.c.b16 %v864_v30, %v864_v30 }
 0xd7d   :  { %866 = vrot.lane.b32.xlu1 %v865_v31, %s1383_s2 }
 0xdef   :  { %v867_v32 = vpop.permute.xlu1 %866 }
 0xdf0   :  { %1191 = vmatmul.msk.bf16.vlgmr.msrb.gmra.mxu2 %vm67_vm1, %v867_v32 }
 0xe73   :  { %v880_v35 = vpop.f32.mrf.mxu2 }
 0xe74   :  { %v885_v36 = vrot.slane %v880_v35, 1  ;;  %v888_v37 = vadd.f32 %v880_v35, %v853_v33 }
 0xe76   :  { %v889_v38 = vadd.f32 %v885_v36, %v854_v34  ;;  %1322 = vtanh.f32 %v888_v37  ;;  %v1192_v45 = vmul.f32 -1.442695, %v888_v37 }
 0xe78   :  { %1324 = vtanh.f32 %v889_v38  ;;  %v1193_v42 = vmul.f32 -1.442695, %v889_v38 }
 0xe7a   :  { %1326 = vpow2.f32 %v1193_v42 }
 0xe7b   :  { %v882_v39 = vpop.f32.mrf.mxu2 }
 0xe7c   :  { %v1323_v40 = vpop.eup %1322 }
 0xe7d   :  { %934 = vrot.lane.b32.xlu0 %v1323_v40, %s1381_s26 }
 0xe7e   :  { %v1325_v41 = vpop.eup %1324 }
 0xe7f   :  { %936 = vrot.lane.b32.xlu2 %v1325_v41, %s1381_s26 }
 0xe80   :  { %v1327_v43 = vpop.eup %1326 }
 0xe81   :  { %v897_v44 = vadd.f32 1.0, %v1327_v43  ;;  %v985_v43 = vld [vmem:[%s1833_s0 + $0x7] sm:$0x1] }
 0xe83   :  { %1328 = vrcp.f32 %v897_v44  ;;  %v924_v53 = vand.u32 2147483648, %v897_v44  ;;  %vm918_vm13 = vweird.f32 %v897_v44  ;;  %v922_v61 = vand.u32 2147483647, %v897_v44 }
 0xe84   :  { %1330 = vpow2.f32 %v1192_v45 }
 0xe85   :  { %v925_v63 = vor.u32 1.1754944e-38, %v924_v53  ;;  %vm923_vm15 = vcmp.eq.f32.partialorder %v922_v61, 8.507059e+37 }
 0xe89   :  { %v1329_v46 = vpop.eup %1328 }
 0xe8a   :  { %v914_v47 = vmul.f32 %v1329_v46, %v897_v44  ;;  %v1331_v51 = vpop.eup %1330  ;;  %vm919_vm12 = vweird.f32 %v1329_v46  ;;  %v986_v44 = vld [vmem:[%s1833_s0 + $0xf] sm:$0x1] }
 0xe8b   :  { %v896_v56 = vadd.f32 1.0, %v1331_v51  ;;  %vm920_vm14 = vmor %vm918_vm13, %vm919_vm12 }
 0xe8c   :  { %v915_v49 = vsub.f32 1.0, %v914_v47 }
 0xe8d   :  { %1332 = vrcp.f32 %v896_v56  ;;  %v909_v15 = vand.u32 2147483648, %v896_v56  ;;  %vm903_vm3 = vweird.f32 %v896_v56  ;;  %v907_v16 = vand.u32 2147483647, %v896_v56 }
 0xe8e   :  { %v916_v50 = vmul.f32 %v1329_v46, %v915_v49 }
 0xe8f   :  { %v910_v17 = vor.u32 1.1754944e-38, %v909_v15  ;;  %vm908_vm5 = vcmp.eq.f32.partialorder %v907_v16, 8.507059e+37 }
 0xe90   :  { %v917_v60 = vadd.f32 %v1329_v46, %v916_v50 }
 0xe92   :  { %v921_v52 = vsel %vm920_vm14, %v1329_v46, %v917_v60  ;;  %vm182_vm14 = vcmask 253952  }
 0xe93   :  { %v1333_v48 = vpop.eup %1332  ;;  %v926_v57 = vsel %vm923_vm15, %v925_v63, %v921_v52  ;;  %vm183_vm15 = vsmask.f32 256 }
 0xe94   :  { %v899_v6 = vmul.f32 %v1333_v48, %v896_v56  ;;  %vm904_vm2 = vweird.f32 %v1333_v48  ;;  %v931_v24 = vmul.f32 %v926_v57, %v1591_v54 }
 0xe95   :  { %vm905_vm4 = vmor %vm903_vm3, %vm904_vm2  ;;  %vm446_vm3 = vcmask 254977  }
 0xe96   :  { %v900_v9 = vsub.f32 1.0, %v899_v6  ;;  %vm1670_vm2 = vmand %vm182_vm14, %vm183_vm15 }
 0xe98   :  { %v901_v11 = vmul.f32 %v1333_v48, %v900_v9 }
 0xe9a   :  { %v902_v14 = vadd.f32 %v1333_v48, %v901_v11 }
 0xe9c   :  { %v906_v4 = vsel %vm905_vm4, %v1333_v48, %v902_v14  ;;  %vm447_vm4 = vsmask.f32 1280 }
 0xe9d   :  { %v911_v19 = vsel %vm908_vm5, %v910_v17, %v906_v4  ;;  %vm1685_vm5 = vmand %vm446_vm3, %vm447_vm4 }
 0xe9e   :  { %v930_v21 = vmul.f32 %v911_v19, %v1586_v58 }
 0xed9   :  { %v937_v3 = vpop.permute.xlu2 %936 }
 0xeda   :  { %v941_v5 = vmul.f32 %v937_v3, %v926_v57 }
 0xedc   :  { %946 = vrot.lane.b32.xlu1 %v941_v5, %s1383_s2 }
 0xeef   :  { %v935_v18 = vpop.permute.xlu0 %934 }
 0xef0   :  { %v940_v20 = vmul.f32 %v935_v18, %v911_v19 }
 0xef2   :  { %944 = vrot.lane.b32.xlu2 %v940_v20, %s1383_s2 }
 0xf4c   :  { %v945_v22 = vpop.permute.xlu2 %944 }
 0xf4d   :  { %v1615_v23 = vadd.f32 %v945_v22, %v930_v21 }
 0xf4e   :  { %v947_v26 = vpop.permute.xlu1 %946 }
 0xf4f   :  { %1334 = vtanh.f32 %v1615_v23  ;;  %v1619_v27 = vadd.f32 %v947_v26, %v931_v24 }
 0xf51   :  { %1336 = vtanh.f32 %v1619_v27 }
 0xf55   :  { %v1335_v28 = vpop.eup %1334 }
 0xf56   :  { %956 = vrot.lane.b32.xlu1 %v1335_v28, %s1381_s26 }
 0xf57   :  { %v1337_v30 = vpop.eup %1336 }
 0xf58   :  { %958 = vrot.lane.b32.xlu0 %v1337_v30, %s1381_s26 }
 0xfc8   :  { %v957_v31 = vpop.permute.xlu1 %956 }
 0xfc9   :  { %v962_v58 = vmul.f32 %v957_v31, %v911_v19 }
 0xfca   :  { %v959_v32 = vpop.permute.xlu0 %958 }
 0xfcb   :  { %v1624_v33 = vpack.c.bf16 %v962_v58, %v962_v58  ;;  %v963_v34 = vmul.f32 %v959_v32, %v926_v57 }
 0xfcd   :  { %v1626_v54 = vpack.c.bf16 %v963_v34, %v963_v34  ;;  %v987_v35 = vunpack.c.l.b16 %v1624_v33 }
 0xfcf   :  { %v988_v36 = vunpack.c.l.b16 %v1626_v54  ;;  %v1194_v38 = vunpack.i.l.s16 %v987_v35  ;;  %v439_v35 = vrot.slane %v1510_v1, 7  ;;  %v703_v1 = vrot.slane %v1566_v10, 6 }
 0xfd1   :  { %v1195_v37 = vunpack.i.l.s16 %v988_v36  ;;  %v968_v36 = vrot.slane %v1624_v33, 5 }
 0xfd3   :  { %v993_v39 = vrot.slane %v1195_v37, 7 }
 0xfd5   :  { %v994_v40 = vsel %vm200_vm10, %v993_v39, %v1194_v38 }
 0xfd6   :  { %v995_v41 = vpack.c.b16 %v994_v40, %v994_v40 }
 0xfd8   :  { %996 = vrot.lane.b32.xlu2 %v995_v41, %s1383_s2  ;;  %v452_v41 = vld [vmem:[%s1837_s4 + $0x4] sm:$0x2] }
0x1032   :  { %v997_v42 = vpop.permute.xlu2 %996 }
0x1033   :  { %1196 = vmatmul.msk.bf16.vlgmr.msrb.gmra.mxu3 %vm67_vm1, %v997_v42  ;;  %v438_v42 = vrot.slane %v1508_v62, 7  ;;  %v979_v62 = vld [vmem:[%s1837_s4] sm:$0x8] }
0x10b6   :  { %v1010_v45 = vpop.f32.mrf.mxu3 }
0x10b7   :  { %v1015_v46 = vrot.slane %v1010_v45, 1  ;;  %v1018_v47 = vadd.f32 %v1010_v45, %v985_v43 }
0x10b9   :  { %v1019_v49 = vadd.f32 %v1015_v46, %v986_v44  ;;  %1338 = vtanh.f32 %v1018_v47  ;;  %v1197_v60 = vmul.f32 -1.442695, %v1018_v47 }
0x10bb   :  { %1340 = vtanh.f32 %v1019_v49  ;;  %v1198_v53 = vmul.f32 -1.442695, %v1019_v49 }
0x10bc   :  { %1342 = vpow2.f32 %v1197_v60 }
0x10bd   :  { %1344 = vpow2.f32 %v1198_v53 }
0x10be   :  { %v1012_v51 = vpop.f32.mrf.mxu3 }
0x10bf   :  { %v1339_v56 = vpop.eup %1338 }
0x10c0   :  { %1064 = vrot.lane.b32.xlu0 %v1339_v56, %s1381_s26 }
0x10c1   :  { %v1341_v50 = vpop.eup %1340 }
0x10c2   :  { %1066 = vrot.lane.b32.xlu1 %v1341_v50, %s1381_s26  ;;  %v1343_v61 = vpop.eup %1342 }
0x10c3   :  { %v1345_v52 = vpop.eup %1344  ;;  %v1026_v63 = vadd.f32 1.0, %v1343_v61 }
0x10c4   :  { %v1027_v48 = vadd.f32 1.0, %v1345_v52 }
0x10c5   :  { %1346 = vrcp.f32 %v1026_v63  ;;  %v1039_v4 = vand.u32 2147483648, %v1026_v63  ;;  %vm1033_vm6 = vweird.f32 %v1026_v63  ;;  %v1037_v17 = vand.u32 2147483647, %v1026_v63 }
0x10c6   :  { %1348 = vrcp.f32 %v1027_v48  ;;  %v1054_v20 = vand.u32 2147483648, %v1027_v48  ;;  %vm1048_vm9 = vweird.f32 %v1027_v48  ;;  %v1052_v22 = vand.u32 2147483647, %v1027_v48 }
0x10c7   :  { %v1040_v21 = vor.u32 1.1754944e-38, %v1039_v4  ;;  %vm1038_vm11 = vcmp.eq.f32.partialorder %v1037_v17, 8.507059e+37 }
0x10c8   :  { %v1055_v31 = vor.u32 1.1754944e-38, %v1054_v20  ;;  %vm1053_vm13 = vcmp.eq.f32.partialorder %v1052_v22, 8.507059e+37  ;;  %v717_v22 = vld [vmem:[%s1837_s4 + $0x4] sm:$0x4] }
0x10cb   :  { %v1347_v3 = vpop.eup %1346 }
0x10cc   :  { %v1349_v57 = vpop.eup %1348  ;;  %v1029_v5 = vmul.f32 %v1347_v3, %v1026_v63  ;;  %vm1034_vm1 = vweird.f32 %v1347_v3 }
0x10cd   :  { %v1044_v6 = vmul.f32 %v1349_v57, %v1027_v48  ;;  %vm1035_vm7 = vmor %vm1033_vm6, %vm1034_vm1  ;;  %vm1049_vm8 = vweird.f32 %v1349_v57  ;;  %vm976_vm1 = vcmask 257027   ;;  %vm977_vm6 = vsmask.f32 3328 }
0x10ce   :  { %v1030_v9 = vsub.f32 1.0, %v1029_v5  ;;  %vm1050_vm12 = vmor %vm1048_vm9, %vm1049_vm8  ;;  %vm580_vm8 = vsmask.f32 7942 }
0x10cf   :  { %v1045_v11 = vsub.f32 1.0, %v1044_v6  ;;  %vm1720_vm9 = vmand %vm446_vm3, %vm580_vm8  ;;  %vm1110_vm3 = vsmask.f32 7950 }
0x10d0   :  { %v1031_v14 = vmul.f32 %v1347_v3, %v1030_v9  ;;  %vm1111_vm4 = vmand %vm976_vm1, %vm1110_vm3 }
0x10d1   :  { %v1046_v15 = vmul.f32 %v1349_v57, %v1045_v11 }
0x10d2   :  { %v1032_v16 = vadd.f32 %v1347_v3, %v1031_v14  ;;  %v449_v14 = vld [vmem:[%s1837_s4] sm:$0x2] }
0x10d3   :  { %v1047_v18 = vadd.f32 %v1349_v57, %v1046_v15 }
0x10d4   :  { %v1036_v19 = vsel %vm1035_vm7, %v1347_v3, %v1032_v16  ;;  %vm1704_vm7 = vmand %vm976_vm1, %vm977_vm6 }
0x10d5   :  { %v1641_v26 = vsel %vm1038_vm11, %v1040_v21, %v1036_v19  ;;  %v1051_v28 = vsel %vm1050_vm12, %v1349_v57, %v1047_v18  ;;  %vm711_vm11 = vcmask 256002   ;;  %vm712_vm12 = vsmask.f32 2304  ;;  %v714_v19 = vld [vmem:[%s1837_s4] sm:$0x4] }
0x10d6   :  { %v1644_v32 = vsel %vm1053_vm13, %v1055_v31, %v1051_v28  ;;  %v1060_v37 = vmul.f32 %v1641_v26, %v1615_v23  ;;  %v969_v23 = vrot.slane %v1626_v54, 5  ;;  %vm315_vm13 = vsmask.f32 7938 }
0x10d7   :  { %v1061_v7 = vmul.f32 %v1644_v32, %v1619_v27  ;;  %vm316_vm15 = vmand %vm182_vm14, %vm315_vm13 }
0x1132   :  { %v1065_v24 = vpop.permute.xlu0 %1064 }
0x1133   :  { %v1070_v30 = vmul.f32 %v1065_v24, %v1641_v26 }
0x1134   :  { %v1067_v58 = vpop.permute.xlu1 %1066 }
0x1135   :  { %1074 = vrot.lane.b32.xlu2 %v1070_v30, %s1383_s2  ;;  %v1071_v34 = vmul.f32 %v1067_v58, %v1644_v32  ;;  %v982_v58 = vld [vmem:[%s1837_s4 + $0x4] sm:$0x8] }
0x1137   :  { %1076 = vrot.lane.b32.xlu0 %v1071_v34, %s1383_s2 }
0x113f   :  { %176 = vrot.lane.b32.xlu0 %v1457_v0, %s1383_s2 }
0x1147   :  { %442 = vrot.lane.b32.xlu0 %v439_v35, %s1383_s2 }
0x114f   :  { %970 = vrot.lane.b32.xlu0 %v968_v36, %s1383_s2 }
0x1157   :  { %1212 = vrot.lane.b32.xlu0 %v1211_v12, %s1383_s2 }
0x118f   :  { %v1075_v38 = vpop.permute.xlu2 %1074 }
0x1190   :  { %v1080_v39 = vadd.f32 %v1075_v38, %v1060_v37 }
0x1192   :  { %1350 = vtanh.f32 %v1080_v39 }
0x1198   :  { %v1351_v0 = vpop.eup %1350 }
0x1199   :  { %1086 = vrot.lane.b32.xlu1 %v1351_v0, %s1381_s26 }
0x11a1   :  { %178 = vrot.lane.b32.xlu1 %v1454_v59, %s1383_s2  ;;  %v185_v59 = vld [vmem:[%s1837_s4] sm:$0x1] }
0x11a9   :  { %705 = vrot.lane.b32.xlu1 %v703_v1, %s1383_s2  ;;  %v1077_v8 = vpop.permute.xlu0 %1076 }
0x11aa   :  { %v1081_v12 = vadd.f32 %v1077_v8, %v1061_v7 }
0x11ac   :  { %1352 = vtanh.f32 %v1081_v12  ;;  %v1129_v45 = vrot.slane %v1081_v12, 7 }
0x11ae   :  { %v1130_v25 = vsel %vm200_vm10, %v1129_v45, %v1080_v39 }
0x11b1   :  { %972 = vrot.lane.b32.xlu1 %v969_v23, %s1383_s2  ;;  %v177_v10 = vpop.permute.xlu0 %176 }
0x11b2   :  { %v1353_v27 = vpop.eup %1352  ;;  %v186_v40 = vsel %vm1670_vm2, %v177_v10, %v185_v59 }
0x11b3   :  { %187 = vst [vmem:[%s1837_s4] sm:$0x1] %v186_v40  ;;  %1088 = vrot.lane.b32.xlu2 %v1353_v27, %s1381_s26 }
0x11b9   :  { %1217 = vrot.lane.b32.xlu1 %v1216_v29, %s1383_s2  ;;  %v443_v43 = vpop.permute.xlu0 %442 }
0x11ba   :  { %v453_v44 = vsel %vm1685_vm5, %v443_v43, %v452_v41  ;;  %v317_v38 = vld [vmem:[%s1837_s4] sm:$0x1] }
0x11bb   :  { %454 = vst [vmem:[%s1837_s4 + $0x4] sm:$0x2] %v453_v44  ;;  %440 = vrot.lane.b32.xlu2 %v438_v42, %s1383_s2 }
0x11c1   :  { %1131 = vrot.lane.b32.xlu1 %v1130_v25, %s1384_s21  ;;  %v971_v29 = vpop.permute.xlu0 %970 }
0x11c2   :  { %v980_v47 = vsel %vm1704_vm7, %v971_v29, %v979_v62  ;;  %v585_v13 = vld [vmem:[%s1837_s4 + $0x4] sm:$0x2] }
0x11c3   :  { %981 = vst [vmem:[%s1837_s4] sm:$0x8] %v980_v47  ;;  %707 = vrot.lane.b32.xlu2 %v704_v2, %s1383_s2 }
0x11c9   :  { %v1213_v51 = vpop.permute.xlu0 %1212 }
0x11ca   :  { %v1215_v56 = vunpack.i.h.bf16 %v1213_v51  ;;  %v1214_v24 = vunpack.i.l.bf16 %v1213_v51  ;;  %v1112_v42 = vld [vmem:[%s1837_s4] sm:$0x8] }
0x11cb   :  { %1207 = vrot.lane.b32.xlu2 %v1483_v55, %s1383_s2  ;;  %v188_v55 = vld [vmem:[%s1837_s4 + $0x4] sm:$0x1] }
0x11cc   :  { %v586_v50 = vsel %vm1720_vm9, %v1215_v56, %v585_v13 }
0x11cd   :  { %587 = vst [vmem:[%s1837_s4 + $0x4] sm:$0x2] %v586_v50 }
0x120b   :  { %v1087_v60 = vpop.permute.xlu1 %1086 }
0x120c   :  { %v1092_v53 = vmul.f32 %v1087_v60, %v1641_v26 }
0x120d   :  { %v1089_v52 = vpop.permute.xlu2 %1088 }
0x120e   :  { %v1094_v61 = vpack.c.bf16 %v1092_v53, %v1092_v53  ;;  %v1093_v63 = vmul.f32 %v1089_v52, %v1644_v32 }
0x1210   :  { %v1097_v48 = vshll.u32 %v1094_v61, 16  ;;  %v1095_v3 = vpack.c.bf16 %v1093_v63, %v1093_v63  ;;  %v1120_v57 = vrot.slane %v1093_v63, 7 }
0x1212   :  { %v1101_v5 = vshll.u32 %v1095_v3, 16  ;;  %v1121_v9 = vsel %vm200_vm10, %v1120_v57, %v1092_v53  ;;  %v1099_v15 = vrot.slane %v1097_v48, 5  ;;  %vm713_vm10 = vmand %vm711_vm11, %vm712_vm12 }
0x1213   :  { %v179_v6 = vpop.permute.xlu1 %178  ;;  %1122 = vrot.lane.b32.xlu0 %v1121_v9, %s1383_s2 }
0x1214   :  { %v189_v11 = vsel %vm1670_vm2, %v179_v6, %v188_v55  ;;  %v1103_v16 = vrot.slane %v1101_v5, 5  ;;  %vm845_vm2 = vsmask.f32 7946 }
0x1215   :  { %190 = vst [vmem:[%s1837_s4 + $0x4] sm:$0x1] %v189_v11  ;;  %v441_v4 = vpop.permute.xlu2 %440  ;;  %vm846_vm14 = vmand %vm711_vm11, %vm845_vm2 }
0x1216   :  { %v450_v17 = vsel %vm1685_vm5, %v441_v4, %v449_v14  ;;  %v1221_v18 = vpack.i.bf16 %v1103_v16, %v1099_v15 }
0x1217   :  { %451 = vst [vmem:[%s1837_s4] sm:$0x2] %v450_v17 }
0x1218   :  { %1222 = vrot.lane.b32.xlu2 %v1221_v18, %s1383_s2 }
0x121b   :  { %v706_v20 = vpop.permute.xlu1 %705 }
0x121c   :  { %v715_v21 = vsel %vm713_vm10, %v706_v20, %v714_v19  ;;  %v320_v39 = vld [vmem:[%s1837_s4 + $0x4] sm:$0x1] }
0x121d   :  { %716 = vst [vmem:[%s1837_s4] sm:$0x4] %v715_v21  ;;  %v708_v26 = vpop.permute.xlu2 %707 }
0x121e   :  { %v582_v28 = vld [vmem:[%s1837_s4] sm:$0x2]  ;;  %v718_v30 = vsel %vm713_vm10, %v708_v26, %v717_v22 }
0x121f   :  { %v583_v31 = vsel %vm1720_vm9, %v1214_v24, %v582_v28  ;;  %719 = vst [vmem:[%s1837_s4 + $0x4] sm:$0x4] %v718_v30 }
0x1220   :  { %584 = vst [vmem:[%s1837_s4] sm:$0x2] %v583_v31 }
0x1223   :  { %v973_v32 = vpop.permute.xlu1 %972 }
0x1224   :  { %v983_v34 = vsel %vm1704_vm7, %v973_v32, %v982_v58  ;;  %v847_v23 = vld [vmem:[%s1837_s4] sm:$0x4] }
0x1225   :  { %984 = vst [vmem:[%s1837_s4 + $0x4] sm:$0x8] %v983_v34  ;;  %v1208_v35 = vpop.permute.xlu2 %1207 }
0x1226   :  { %v1210_v36 = vunpack.i.h.bf16 %v1208_v35  ;;  %v1209_v37 = vunpack.i.l.bf16 %v1208_v35  ;;  %v850_v33 = vld [vmem:[%s1837_s4 + $0x4] sm:$0x4] }
0x1228   :  { %v321_v0 = vsel %vm316_vm15, %v1210_v36, %v320_v39  ;;  %v318_v1 = vsel %vm316_vm15, %v1209_v37, %v317_v38 }
0x1229   :  { %322 = vst [vmem:[%s1837_s4 + $0x4] sm:$0x1] %v321_v0 }
0x122a   :  { %319 = vst [vmem:[%s1837_s4] sm:$0x1] %v318_v1 }
0x122b   :  { %v1218_v7 = vpop.permute.xlu1 %1217 }
0x122c   :  { %v1220_v8 = vunpack.i.h.bf16 %v1218_v7  ;;  %v1219_v12 = vunpack.i.l.bf16 %v1218_v7  ;;  %v1115_v43 = vld [vmem:[%s1837_s4 + $0x4] sm:$0x8] }
0x122e   :  { %v848_v59 = vsel %vm846_vm14, %v1219_v12, %v847_v23  ;;  %v851_v10 = vsel %vm846_vm14, %v1220_v8, %v850_v33 }
0x122f   :  { %849 = vst [vmem:[%s1837_s4] sm:$0x4] %v848_v59 }
0x1230   :  { %852 = vst [vmem:[%s1837_s4 + $0x4] sm:$0x4] %v851_v10 }
0x1233   :  { %v1132_v27 = vpop.permute.xlu1 %1131 }
0x1234   :  { %1134 = vst.msk [vmem:[#allocation3] sm:$0x3] %vm42_vm0, %v1132_v27 }
0x1235   :  { %1139 = vst.msk [vmem:[%s1839_s6] sm:$0x3] %vm42_vm0, %v1132_v27 }
0x1272   :  { %v1223_v40 = vpop.permute.xlu2 %1222 }
0x1273   :  { %v1225_v54 = vunpack.i.h.bf16 %v1223_v40  ;;  %v1224_v41 = vunpack.i.l.bf16 %v1223_v40 }
0x1275   :  { %v1116_v44 = vsel %vm1111_vm4, %v1225_v54, %v1115_v43  ;;  %v1113_v45 = vsel %vm1111_vm4, %v1224_v41, %v1112_v42 }
0x1276   :  { %1117 = vst [vmem:[%s1837_s4 + $0x4] sm:$0x8] %v1116_v44 }
0x1277   :  { %1114 = vst [vmem:[%s1837_s4] sm:$0x8] %v1113_v45 }
0x1285   :  { %v1123_v46 = vpop.permute.xlu0 %1122 }
0x1286   :  { %1126 = vst.msk [vmem:[#allocation2] sm:$0x3] %vm42_vm0, %v1123_v46 }
0x1287   :  { %1138 = vst.msk [vmem:[%s1838_s5] sm:$0x3] %vm42_vm0, %v1123_v46 }
0x1288   :  { %1152 = vsyncpa [#allocation5], 1 }

// kernel: forward.8
= control target key start
LH: loop header
LB: loop body
LE: loop exit
PB: predicated region body
PF: predicated region fallthrough
CT: control target
= control target key end

     0   :  { %vm26_vm0 = vcmask 254976   ;;  %vm51_vm1 = vcmask 261120   ;;  %s1336_s7 = smov 64   ;;  %vm184_vm10 = vcmask 1041409   ;;  %s1337_s19 = smov 96   ;;  %s1787_s1 = inlined_call_operand.vmem [shape: bf16[32,128], index: 1, kind: input, shape index: {}]   ;;  %s1788_s2 = inlined_call_operand.vmem [shape: f32[2,32], index: 2, kind: input, shape index: {}]   ;;  %s1789_s3 = inlined_call_operand.vmem [shape: f32[2,32], index: 3, kind: input, shape index: {}]   ;;  %s1790_s0 = inlined_call_operand.vmem [shape: f32[2,8,128], index: 0, kind: input, shape index: {}]   ;;  %s1791_s4 = inlined_call_operand.vmem [shape: bf16[2,8,32], index: 4, kind: output, shape index: {0}]   ;;  %s1792_s6 = inlined_call_operand.vmem [shape: f32[2,32], index: 6, kind: output, shape index: {2}]   ;;  %s1793_s5 = inlined_call_operand.vmem [shape: f32[2,32], index: 5, kind: output, shape index: {1}]  }
   0x1   :  { %v1183_v0 = vld [vmem:[%s1787_s1 + $0x8] sm:$0xff]  ;;  %v25_v1 = vld [vmem:[%s1788_s2] sm:$0x3] }
   0x2   :  { %27 = vst.msk [vmem:[#allocation2] sm:$0x3] %vm26_vm0, %v25_v1  ;;  %v28_v2 = vld [vmem:[%s1789_s3] sm:$0x3]  ;;  %61 = vmatpush.bf16.msra.mxu0 %v1183_v0  ;;  %198 = vmatpush.bf16.msra.mxu1 %v1183_v0  ;;  %v37_v8 = vld [vmem:[%s1790_s0 + $0x8] sm:$0x1] }
   0x3   :  { %v1182_v3 = vld [vmem:[%s1787_s1] sm:$0xff]  ;;  %29 = vst.msk [vmem:[#allocation3] sm:$0x3] %vm26_vm0, %v28_v2  ;;  %331 = vmatpush.bf16.msra.mxu2 %v1183_v0  ;;  %461 = vmatpush.bf16.msra.mxu3 %v1183_v0  ;;  %s1335_s1 = smov 32  }
   0x4   :  { %v36_v12 = vld [vmem:[%s1790_s0] sm:$0x1] }
   0x6   :  { %62 = vmatpush.bf16.msra.mxu0 %v1182_v3  ;;  %199 = vmatpush.bf16.msra.mxu1 %v1182_v3 }
   0x7   :  { %332 = vmatpush.bf16.msra.mxu2 %v1182_v3  ;;  %462 = vmatpush.bf16.msra.mxu3 %v1182_v3 }
   0x9   :  { %v34_v4 = vld [vmem:[#allocation2] sm:$0x3] }
   0xa   :  { %596 = vmatpush.bf16.msrb.mxu0 %v1183_v0  ;;  %726 = vmatpush.bf16.msrb.mxu1 %v1183_v0  ;;  %v38_v5 = vpack.c.bf16 %v34_v4, %v34_v4  ;;  %v35_v6 = vld [vmem:[#allocation3] sm:$0x3] }
   0xb   :  { %861 = vmatpush.bf16.msrb.mxu2 %v1183_v0  ;;  %991 = vmatpush.bf16.msrb.mxu3 %v1183_v0  ;;  %v115_v7 = vrot.slane %v35_v6, 1 }
   0xc   :  { %1144 = vmatmul.msk.bf16.vlgmr.msra.gmra.mxu0 %vm51_vm1, %v38_v5 }
   0xd   :  { %118 = vrot.lane.b32.xlu1 %v115_v7, %s1335_s1  ;;  %v175_v7 = vld [vmem:[%s1790_s0 + $0x1] sm:$0x1] }
   0xe   :  { %597 = vmatpush.bf16.msrb.mxu0 %v1182_v3  ;;  %727 = vmatpush.bf16.msrb.mxu1 %v1182_v3 }
   0xf   :  { %862 = vmatpush.bf16.msrb.mxu2 %v1182_v3  ;;  %992 = vmatpush.bf16.msrb.mxu3 %v1182_v3 }
  0x15   :  { %116 = vrot.lane.b32.xlu1 %v35_v6, %s1335_s1 }
  0x7f   :  { %v119_v47 = vpop.permute.xlu1 %118 }
  0x87   :  { %v117_v51 = vpop.permute.xlu1 %116 }
  0x89   :  { %v64_v9 = vpop.f32.mrf.mxu0 }
  0x8a   :  { %v69_v10 = vrot.slane %v64_v9, 1  ;;  %v72_v14 = vadd.f32 %v64_v9, %v36_v12 }
  0x8c   :  { %v73_v11 = vadd.f32 %v69_v10, %v37_v8  ;;  %v1145_v18 = vmul.f32 -1.442695, %v72_v14  ;;  %v176_v8 = vld [vmem:[%s1790_s0 + $0x9] sm:$0x1] }
  0x8e   :  { %1207 = vtanh.f32 %v73_v11  ;;  %v1146_v17 = vmul.f32 -1.442695, %v73_v11 }
  0x8f   :  { %1209 = vtanh.f32 %v72_v14 }
  0x90   :  { %1211 = vpow2.f32 %v1146_v17 }
  0x91   :  { %v66_v13 = vpop.f32.mrf.mxu0  ;;  %1213 = vpow2.f32 %v1145_v18 }
  0x94   :  { %v1208_v15 = vpop.eup %1207 }
  0x95   :  { %128 = vrot.lane.b32.xlu0 %v1208_v15, %s1336_s7  ;;  %v1210_v16 = vpop.eup %1209 }
  0x96   :  { %v1212_v19 = vpop.eup %1211 }
  0x97   :  { %v81_v20 = vadd.f32 1.0, %v1212_v19  ;;  %v1214_v21 = vpop.eup %1213 }
  0x98   :  { %v80_v22 = vadd.f32 1.0, %v1214_v21 }
  0x99   :  { %1215 = vrcp.f32 %v81_v20  ;;  %v108_v31 = vand.u32 2147483648, %v81_v20  ;;  %vm102_vm3 = vweird.f32 %v81_v20  ;;  %v106_v32 = vand.u32 2147483647, %v81_v20 }
  0x9a   :  { %1217 = vrcp.f32 %v80_v22  ;;  %v93_v40 = vand.u32 2147483648, %v80_v22  ;;  %vm87_vm7 = vweird.f32 %v80_v22  ;;  %v91_v41 = vand.u32 2147483647, %v80_v22 }
  0x9b   :  { %v109_v35 = vor.u32 1.1754944e-38, %v108_v31  ;;  %vm107_vm5 = vcmp.eq.f32.partialorder %v106_v32, 8.507059e+37 }
  0x9c   :  { %v94_v43 = vor.u32 1.1754944e-38, %v93_v40  ;;  %vm92_vm9 = vcmp.eq.f32.partialorder %v91_v41, 8.507059e+37 }
  0x9d   :  { %126 = vrot.lane.b32.xlu0 %v1210_v16, %s1336_s7 }
  0x9f   :  { %v1216_v23 = vpop.eup %1215 }
  0xa0   :  { %v98_v24 = vmul.f32 %v1216_v23, %v81_v20  ;;  %v1218_v26 = vpop.eup %1217  ;;  %vm103_vm2 = vweird.f32 %v1216_v23 }
  0xa1   :  { %v83_v28 = vmul.f32 %v1218_v26, %v80_v22  ;;  %vm104_vm4 = vmor %vm102_vm3, %vm103_vm2  ;;  %vm88_vm6 = vweird.f32 %v1218_v26 }
  0xa2   :  { %v99_v25 = vsub.f32 1.0, %v98_v24  ;;  %vm89_vm8 = vmor %vm87_vm7, %vm88_vm6 }
  0xa3   :  { %v84_v30 = vsub.f32 1.0, %v83_v28 }
  0xa4   :  { %v100_v27 = vmul.f32 %v1216_v23, %v99_v25 }
  0xa5   :  { %v85_v34 = vmul.f32 %v1218_v26, %v84_v30 }
  0xa6   :  { %v101_v29 = vadd.f32 %v1216_v23, %v100_v27 }
  0xa7   :  { %v86_v38 = vadd.f32 %v1218_v26, %v85_v34 }
  0xa8   :  { %v105_v33 = vsel %vm104_vm4, %v1216_v23, %v101_v29 }
  0xa9   :  { %v110_v36 = vsel %vm107_vm5, %v109_v35, %v105_v33  ;;  %v90_v42 = vsel %vm89_vm8, %v1218_v26, %v86_v38 }
  0xaa   :  { %v95_v44 = vsel %vm92_vm9, %v94_v43, %v90_v42  ;;  %v123_v48 = vmul.f32 %v119_v47, %v110_v36 }
  0xab   :  { %v122_v52 = vmul.f32 %v117_v51, %v95_v44 }
 0x107   :  { %v129_v37 = vpop.permute.xlu0 %128 }
 0x108   :  { %v133_v39 = vmul.f32 %v129_v37, %v110_v36 }
 0x10a   :  { %138 = vrot.lane.b32.xlu2 %v133_v39, %s1335_s1 }
 0x10f   :  { %v127_v45 = vpop.permute.xlu0 %126 }
 0x110   :  { %v132_v46 = vmul.f32 %v127_v45, %v95_v44 }
 0x112   :  { %136 = vrot.lane.b32.xlu2 %v132_v46, %s1335_s1 }
 0x164   :  { %v139_v49 = vpop.permute.xlu2 %138 }
 0x165   :  { %v1400_v50 = vadd.f32 %v139_v49, %v123_v48 }
 0x167   :  { %1219 = vtanh.f32 %v1400_v50 }
 0x16c   :  { %v137_v53 = vpop.permute.xlu2 %136 }
 0x16d   :  { %v1220_v54 = vpop.eup %1219  ;;  %v1403_v55 = vadd.f32 %v137_v53, %v122_v52 }
 0x16e   :  { %150 = vrot.lane.b32.xlu0 %v1220_v54, %s1336_s7 }
 0x16f   :  { %1221 = vtanh.f32 %v1403_v55 }
 0x175   :  { %v1222_v56 = vpop.eup %1221 }
 0x176   :  { %148 = vrot.lane.b32.xlu1 %v1222_v56, %s1336_s7 }
 0x1e0   :  { %v151_v57 = vpop.permute.xlu0 %150 }
 0x1e1   :  { %v155_v58 = vmul.f32 %v151_v57, %v110_v36 }
 0x1e3   :  { %v1408_v59 = vpack.c.bf16 %v155_v58, %v155_v58 }
 0x1e5   :  { %v178_v60 = vunpack.c.l.b16 %v1408_v59 }
 0x1e7   :  { %v1148_v63 = vunpack.i.l.s16 %v178_v60 }
 0x1e8   :  { %v149_v61 = vpop.permute.xlu1 %148 }
 0x1e9   :  { %v154_v62 = vmul.f32 %v149_v61, %v95_v44  ;;  %v183_v2 = vrot.slane %v1148_v63, 7 }
 0x1eb   :  { %v1411_v0 = vpack.c.bf16 %v154_v62, %v154_v62 }
 0x1ed   :  { %v177_v1 = vunpack.c.l.b16 %v1411_v0 }
 0x1ef   :  { %v1147_v3 = vunpack.i.l.s16 %v177_v1 }
 0x1f1   :  { %v185_v4 = vsel %vm184_vm10, %v183_v2, %v1147_v3 }
 0x1f2   :  { %v186_v5 = vpack.c.b16 %v185_v4, %v185_v4 }
 0x1f4   :  { %187 = vrot.lane.b32.xlu2 %v186_v5, %s1335_s1 }
 0x24e   :  { %v188_v6 = vpop.permute.xlu2 %187 }
 0x24f   :  { %1149 = vmatmul.msk.bf16.vlgmr.msra.gmra.mxu1 %vm51_vm1, %v188_v6 }
 0x2cc   :  { %v201_v9 = vpop.f32.mrf.mxu1 }
 0x2cd   :  { %v206_v10 = vrot.slane %v201_v9, 1  ;;  %v209_v11 = vadd.f32 %v201_v9, %v175_v7  ;;  %v307_v9 = vld [vmem:[%s1790_s0 + $0x2] sm:$0x1] }
 0x2cf   :  { %v210_v12 = vadd.f32 %v206_v10, %v176_v8  ;;  %1223 = vtanh.f32 %v209_v11  ;;  %v1150_v16 = vmul.f32 -1.442695, %v209_v11  ;;  %v308_v10 = vld [vmem:[%s1790_s0 + $0xa] sm:$0x1] }
 0x2d1   :  { %1225 = vtanh.f32 %v210_v12  ;;  %v1151_v17 = vmul.f32 -1.442695, %v210_v12 }
 0x2d2   :  { %1227 = vpow2.f32 %v1150_v16 }
 0x2d3   :  { %1229 = vpow2.f32 %v1151_v17 }
 0x2d4   :  { %v203_v13 = vpop.f32.mrf.mxu1 }
 0x2d5   :  { %v1224_v14 = vpop.eup %1223 }
 0x2d6   :  { %255 = vrot.lane.b32.xlu1 %v1224_v14, %s1336_s7 }
 0x2d7   :  { %v1226_v15 = vpop.eup %1225 }
 0x2d8   :  { %257 = vrot.lane.b32.xlu0 %v1226_v15, %s1336_s7  ;;  %v1228_v18 = vpop.eup %1227 }
 0x2d9   :  { %v1230_v19 = vpop.eup %1229  ;;  %v217_v20 = vadd.f32 1.0, %v1228_v18 }
 0x2da   :  { %v218_v21 = vadd.f32 1.0, %v1230_v19 }
 0x2db   :  { %1231 = vrcp.f32 %v217_v20  ;;  %v230_v31 = vand.u32 2147483648, %v217_v20  ;;  %vm224_vm12 = vweird.f32 %v217_v20  ;;  %v228_v32 = vand.u32 2147483647, %v217_v20 }
 0x2dc   :  { %1233 = vrcp.f32 %v218_v21  ;;  %v245_v35 = vand.u32 2147483648, %v218_v21  ;;  %vm239_vm15 = vweird.f32 %v218_v21  ;;  %v243_v37 = vand.u32 2147483647, %v218_v21 }
 0x2dd   :  { %v231_v36 = vor.u32 1.1754944e-38, %v230_v31  ;;  %vm229_vm2 = vcmp.eq.f32.partialorder %v228_v32, 8.507059e+37 }
 0x2de   :  { %v246_v42 = vor.u32 1.1754944e-38, %v245_v35  ;;  %vm244_vm4 = vcmp.eq.f32.partialorder %v243_v37, 8.507059e+37 }
 0x2e1   :  { %v1232_v22 = vpop.eup %1231 }
 0x2e2   :  { %v1234_v23 = vpop.eup %1233  ;;  %v220_v24 = vmul.f32 %v1232_v22, %v217_v20  ;;  %vm225_vm11 = vweird.f32 %v1232_v22 }
 0x2e3   :  { %v235_v25 = vmul.f32 %v1234_v23, %v218_v21  ;;  %vm226_vm13 = vmor %vm224_vm12, %vm225_vm11  ;;  %vm240_vm14 = vweird.f32 %v1234_v23 }
 0x2e4   :  { %v221_v26 = vsub.f32 1.0, %v220_v24  ;;  %vm241_vm3 = vmor %vm239_vm15, %vm240_vm14 }
 0x2e5   :  { %v236_v27 = vsub.f32 1.0, %v235_v25 }
 0x2e6   :  { %v222_v28 = vmul.f32 %v1232_v22, %v221_v26 }
 0x2e7   :  { %v237_v29 = vmul.f32 %v1234_v23, %v236_v27 }
 0x2e8   :  { %v223_v30 = vadd.f32 %v1232_v22, %v222_v28 }
 0x2e9   :  { %v238_v33 = vadd.f32 %v1234_v23, %v237_v29 }
 0x2ea   :  { %v227_v34 = vsel %vm226_vm13, %v1232_v22, %v223_v30 }
 0x2eb   :  { %v232_v39 = vsel %vm229_vm2, %v231_v36, %v227_v34  ;;  %v242_v40 = vsel %vm241_vm3, %v1234_v23, %v238_v33 }
 0x2ec   :  { %v247_v44 = vsel %vm244_vm4, %v246_v42, %v242_v40  ;;  %v251_v51 = vmul.f32 %v232_v39, %v1403_v55 }
 0x2ed   :  { %v252_v46 = vmul.f32 %v247_v44, %v1400_v50 }
 0x348   :  { %v256_v38 = vpop.permute.xlu1 %255 }
 0x349   :  { %v261_v41 = vmul.f32 %v256_v38, %v232_v39 }
 0x34a   :  { %v258_v43 = vpop.permute.xlu0 %257 }
 0x34b   :  { %265 = vrot.lane.b32.xlu0 %v261_v41, %s1335_s1  ;;  %v262_v45 = vmul.f32 %v258_v43, %v247_v44 }
 0x34d   :  { %267 = vrot.lane.b32.xlu2 %v262_v45, %s1335_s1 }
 0x3a7   :  { %v268_v47 = vpop.permute.xlu2 %267 }
 0x3a8   :  { %v1428_v48 = vadd.f32 %v268_v47, %v252_v46 }
 0x3aa   :  { %1235 = vtanh.f32 %v1428_v48 }
 0x3b0   :  { %v1236_v49 = vpop.eup %1235 }
 0x3b1   :  { %279 = vrot.lane.b32.xlu1 %v1236_v49, %s1336_s7 }
 0x3bd   :  { %v266_v52 = vpop.permute.xlu0 %265 }
 0x3be   :  { %v1433_v53 = vadd.f32 %v266_v52, %v251_v51 }
 0x3c0   :  { %1237 = vtanh.f32 %v1433_v53 }
 0x3c6   :  { %v1238_v54 = vpop.eup %1237 }
 0x3c7   :  { %277 = vrot.lane.b32.xlu2 %v1238_v54, %s1336_s7 }
 0x421   :  { %v278_v56 = vpop.permute.xlu2 %277 }
 0x422   :  { %v283_v50 = vmul.f32 %v278_v56, %v232_v39 }
 0x423   :  { %v280_v57 = vpop.permute.xlu1 %279 }
 0x424   :  { %v285_v58 = vpack.c.bf16 %v283_v50, %v283_v50  ;;  %v284_v60 = vmul.f32 %v280_v57, %v247_v44 }
 0x426   :  { %v286_v61 = vpack.c.bf16 %v284_v60, %v284_v60  ;;  %v288_v62 = vshll.u32 %v285_v58, 16  ;;  %v311_v63 = vunpack.c.l.b16 %v285_v58 }
 0x428   :  { %v291_v1 = vshll.u32 %v286_v61, 16  ;;  %v312_v2 = vunpack.c.l.b16 %v286_v61  ;;  %v1152_v4 = vunpack.i.l.s16 %v311_v63 }
 0x42a   :  { %v1153_v3 = vunpack.i.l.s16 %v312_v2  ;;  %v1437_v55 = vpack.i.bf16 %v291_v1, %v288_v62 }
 0x42c   :  { %v317_v5 = vrot.slane %v1153_v3, 7 }
 0x42e   :  { %v318_v6 = vsel %vm184_vm10, %v317_v5, %v1152_v4 }
 0x42f   :  { %v319_v7 = vpack.c.b16 %v318_v6, %v318_v6 }
 0x431   :  { %320 = vrot.lane.b32.xlu0 %v319_v7, %s1335_s1 }
 0x4a3   :  { %v321_v8 = vpop.permute.xlu0 %320 }
 0x4a4   :  { %1154 = vmatmul.msk.bf16.vlgmr.msra.gmra.mxu2 %vm51_vm1, %v321_v8 }
 0x527   :  { %v334_v11 = vpop.f32.mrf.mxu2 }
 0x528   :  { %v339_v12 = vrot.slane %v334_v11, 1  ;;  %v342_v13 = vadd.f32 %v334_v11, %v307_v9  ;;  %v439_v9 = vld [vmem:[%s1790_s0 + $0x3] sm:$0x1] }
 0x52a   :  { %v343_v14 = vadd.f32 %v339_v12, %v308_v10  ;;  %1239 = vtanh.f32 %v342_v13  ;;  %v1155_v18 = vmul.f32 -1.442695, %v342_v13  ;;  %v440_v10 = vld [vmem:[%s1790_s0 + $0xb] sm:$0x1] }
 0x52c   :  { %1241 = vtanh.f32 %v343_v14  ;;  %v1156_v23 = vmul.f32 -1.442695, %v343_v14 }
 0x52d   :  { %1243 = vpow2.f32 %v1155_v18 }
 0x52f   :  { %v336_v15 = vpop.f32.mrf.mxu2 }
 0x530   :  { %v1240_v16 = vpop.eup %1239 }
 0x531   :  { %388 = vrot.lane.b32.xlu2 %v1240_v16, %s1336_s7 }
 0x532   :  { %v1242_v17 = vpop.eup %1241 }
 0x533   :  { %390 = vrot.lane.b32.xlu1 %v1242_v17, %s1336_s7  ;;  %v1244_v19 = vpop.eup %1243 }
 0x534   :  { %v350_v20 = vadd.f32 1.0, %v1244_v19 }
 0x536   :  { %1245 = vrcp.f32 %v350_v20  ;;  %v363_v28 = vand.u32 2147483648, %v350_v20  ;;  %vm357_vm6 = vweird.f32 %v350_v20  ;;  %v361_v30 = vand.u32 2147483647, %v350_v20 }
 0x537   :  { %1247 = vpow2.f32 %v1156_v23 }
 0x538   :  { %v364_v32 = vor.u32 1.1754944e-38, %v363_v28  ;;  %vm362_vm8 = vcmp.eq.f32.partialorder %v361_v30, 8.507059e+37 }
 0x53c   :  { %v1246_v21 = vpop.eup %1245 }
 0x53d   :  { %v353_v22 = vmul.f32 %v1246_v21, %v350_v20  ;;  %v1248_v26 = vpop.eup %1247  ;;  %vm358_vm5 = vweird.f32 %v1246_v21 }
 0x53e   :  { %v351_v29 = vadd.f32 1.0, %v1248_v26  ;;  %vm359_vm7 = vmor %vm357_vm6, %vm358_vm5 }
 0x53f   :  { %v354_v24 = vsub.f32 1.0, %v353_v22 }
 0x540   :  { %1249 = vrcp.f32 %v351_v29  ;;  %v378_v41 = vand.u32 2147483648, %v351_v29  ;;  %vm372_vm11 = vweird.f32 %v351_v29  ;;  %v376_v42 = vand.u32 2147483647, %v351_v29 }
 0x541   :  { %v355_v25 = vmul.f32 %v1246_v21, %v354_v24 }
 0x542   :  { %v379_v44 = vor.u32 1.1754944e-38, %v378_v41  ;;  %vm377_vm13 = vcmp.eq.f32.partialorder %v376_v42, 8.507059e+37 }
 0x543   :  { %v356_v27 = vadd.f32 %v1246_v21, %v355_v25 }
 0x545   :  { %v360_v31 = vsel %vm359_vm7, %v1246_v21, %v356_v27 }
 0x546   :  { %v365_v34 = vsel %vm362_vm8, %v364_v32, %v360_v31  ;;  %v1250_v36 = vpop.eup %1249 }
 0x547   :  { %v368_v37 = vmul.f32 %v1250_v36, %v351_v29  ;;  %vm373_vm9 = vweird.f32 %v1250_v36  ;;  %v384_v49 = vmul.f32 %v365_v34, %v1433_v53 }
 0x548   :  { %vm374_vm12 = vmor %vm372_vm11, %vm373_vm9 }
 0x549   :  { %v369_v38 = vsub.f32 1.0, %v368_v37 }
 0x54b   :  { %v370_v39 = vmul.f32 %v1250_v36, %v369_v38 }
 0x54d   :  { %v371_v40 = vadd.f32 %v1250_v36, %v370_v39 }
 0x54f   :  { %v375_v43 = vsel %vm374_vm12, %v1250_v36, %v371_v40 }
 0x550   :  { %v380_v46 = vsel %vm377_vm13, %v379_v44, %v375_v43 }
 0x551   :  { %v385_v56 = vmul.f32 %v380_v46, %v1428_v48 }
 0x58b   :  { %v389_v33 = vpop.permute.xlu2 %388 }
 0x58c   :  { %v394_v35 = vmul.f32 %v389_v33, %v365_v34 }
 0x58e   :  { %398 = vrot.lane.b32.xlu1 %v394_v35, %s1335_s1 }
 0x5a5   :  { %v391_v45 = vpop.permute.xlu1 %390 }
 0x5a6   :  { %v395_v47 = vmul.f32 %v391_v45, %v380_v46 }
 0x5a8   :  { %400 = vrot.lane.b32.xlu0 %v395_v47, %s1335_s1 }
 0x600   :  { %v399_v51 = vpop.permute.xlu1 %398 }
 0x601   :  { %v1453_v52 = vadd.f32 %v399_v51, %v384_v49 }
 0x603   :  { %1251 = vtanh.f32 %v1453_v52 }
 0x609   :  { %v1252_v54 = vpop.eup %1251 }
 0x60a   :  { %410 = vrot.lane.b32.xlu0 %v1252_v54, %s1336_s7 }
 0x61a   :  { %v401_v50 = vpop.permute.xlu0 %400 }
 0x61b   :  { %v1458_v57 = vadd.f32 %v401_v50, %v385_v56 }
 0x61d   :  { %1253 = vtanh.f32 %v1458_v57 }
 0x623   :  { %v1254_v58 = vpop.eup %1253 }
 0x624   :  { %412 = vrot.lane.b32.xlu2 %v1254_v58, %s1336_s7 }
 0x67c   :  { %v411_v60 = vpop.permute.xlu0 %410 }
 0x67d   :  { %v416_v53 = vmul.f32 %v411_v60, %v365_v34 }
 0x67e   :  { %v413_v61 = vpop.permute.xlu2 %412 }
 0x67f   :  { %v1462_v62 = vpack.c.bf16 %v416_v53, %v416_v53  ;;  %v417_v63 = vmul.f32 %v413_v61, %v380_v46 }
 0x681   :  { %v1464_v1 = vpack.c.bf16 %v417_v63, %v417_v63  ;;  %v441_v2 = vunpack.c.l.b16 %v1462_v62 }
 0x683   :  { %v442_v48 = vunpack.c.l.b16 %v1464_v1  ;;  %v1157_v4 = vunpack.i.l.s16 %v441_v2 }
 0x685   :  { %v1158_v3 = vunpack.i.l.s16 %v442_v48 }
 0x687   :  { %v447_v5 = vrot.slane %v1158_v3, 7 }
 0x689   :  { %v448_v6 = vsel %vm184_vm10, %v447_v5, %v1157_v4 }
 0x68a   :  { %v449_v7 = vpack.c.b16 %v448_v6, %v448_v6 }
 0x68c   :  { %450 = vrot.lane.b32.xlu1 %v449_v7, %s1335_s1 }
 0x6fe   :  { %v451_v8 = vpop.permute.xlu1 %450 }
 0x6ff   :  { %1159 = vmatmul.msk.bf16.vlgmr.msra.gmra.mxu3 %vm51_vm1, %v451_v8 }
 0x782   :  { %v464_v11 = vpop.f32.mrf.mxu3 }
 0x783   :  { %v469_v12 = vrot.slane %v464_v11, 1  ;;  %v472_v13 = vadd.f32 %v464_v11, %v439_v9 }
 0x785   :  { %v473_v14 = vadd.f32 %v469_v12, %v440_v10  ;;  %1255 = vtanh.f32 %v472_v13  ;;  %v1160_v21 = vmul.f32 -1.442695, %v472_v13 }
 0x787   :  { %1257 = vtanh.f32 %v473_v14  ;;  %v1161_v18 = vmul.f32 -1.442695, %v473_v14 }
 0x789   :  { %1259 = vpow2.f32 %v1161_v18 }
 0x78a   :  { %v466_v15 = vpop.f32.mrf.mxu3 }
 0x78b   :  { %v1256_v16 = vpop.eup %1255 }
 0x78c   :  { %518 = vrot.lane.b32.xlu0 %v1256_v16, %s1336_s7  ;;  %v572_v16 = vld [vmem:[%s1790_s0 + $0x4] sm:$0x1] }
 0x78d   :  { %v1258_v17 = vpop.eup %1257 }
 0x78e   :  { %520 = vrot.lane.b32.xlu2 %v1258_v17, %s1336_s7  ;;  %v573_v17 = vld [vmem:[%s1790_s0 + $0xc] sm:$0x1] }
 0x78f   :  { %v1260_v19 = vpop.eup %1259 }
 0x790   :  { %v481_v20 = vadd.f32 1.0, %v1260_v19 }
 0x792   :  { %1261 = vrcp.f32 %v481_v20  ;;  %v508_v29 = vand.u32 2147483648, %v481_v20  ;;  %vm502_vm15 = vweird.f32 %v481_v20  ;;  %v506_v30 = vand.u32 2147483647, %v481_v20 }
 0x793   :  { %1263 = vpow2.f32 %v1160_v21 }
 0x794   :  { %v509_v32 = vor.u32 1.1754944e-38, %v508_v29  ;;  %vm507_vm3 = vcmp.eq.f32.partialorder %v506_v30, 8.507059e+37 }
 0x798   :  { %v1262_v22 = vpop.eup %1261 }
 0x799   :  { %v498_v23 = vmul.f32 %v1262_v22, %v481_v20  ;;  %v1264_v25 = vpop.eup %1263  ;;  %vm503_vm14 = vweird.f32 %v1262_v22 }
 0x79a   :  { %v480_v26 = vadd.f32 1.0, %v1264_v25  ;;  %vm504_vm2 = vmor %vm502_vm15, %vm503_vm14 }
 0x79b   :  { %v499_v24 = vsub.f32 1.0, %v498_v23 }
 0x79c   :  { %1265 = vrcp.f32 %v480_v26  ;;  %v493_v41 = vand.u32 2147483648, %v480_v26  ;;  %vm487_vm5 = vweird.f32 %v480_v26  ;;  %v491_v42 = vand.u32 2147483647, %v480_v26 }
 0x79d   :  { %v500_v27 = vmul.f32 %v1262_v22, %v499_v24 }
 0x79e   :  { %v494_v44 = vor.u32 1.1754944e-38, %v493_v41  ;;  %vm492_vm7 = vcmp.eq.f32.partialorder %v491_v42, 8.507059e+37 }
 0x79f   :  { %v501_v28 = vadd.f32 %v1262_v22, %v500_v27 }
 0x7a1   :  { %v505_v31 = vsel %vm504_vm2, %v1262_v22, %v501_v28 }
 0x7a2   :  { %v1266_v33 = vpop.eup %1265  ;;  %v510_v35 = vsel %vm507_vm3, %v509_v32, %v505_v31 }
 0x7a3   :  { %v483_v37 = vmul.f32 %v1266_v33, %v480_v26  ;;  %vm488_vm4 = vweird.f32 %v1266_v33  ;;  %v515_v56 = vmul.f32 %v510_v35, %v1458_v57 }
 0x7a4   :  { %vm489_vm6 = vmor %vm487_vm5, %vm488_vm4 }
 0x7a5   :  { %v484_v38 = vsub.f32 1.0, %v483_v37 }
 0x7a7   :  { %v485_v39 = vmul.f32 %v1266_v33, %v484_v38 }
 0x7a9   :  { %v486_v40 = vadd.f32 %v1266_v33, %v485_v39 }
 0x7ab   :  { %v490_v43 = vsel %vm489_vm6, %v1266_v33, %v486_v40 }
 0x7ac   :  { %v495_v46 = vsel %vm492_vm7, %v494_v44, %v490_v43 }
 0x7ad   :  { %v514_v49 = vmul.f32 %v495_v46, %v1453_v52 }
 0x7e8   :  { %v521_v34 = vpop.permute.xlu2 %520 }
 0x7e9   :  { %v525_v36 = vmul.f32 %v521_v34, %v510_v35 }
 0x7eb   :  { %530 = vrot.lane.b32.xlu1 %v525_v36, %s1335_s1 }
 0x7fe   :  { %v519_v45 = vpop.permute.xlu0 %518 }
 0x7ff   :  { %v524_v47 = vmul.f32 %v519_v45, %v495_v46 }
 0x801   :  { %528 = vrot.lane.b32.xlu2 %v524_v47, %s1335_s1 }
 0x85b   :  { %v529_v51 = vpop.permute.xlu2 %528 }
 0x85c   :  { %v1482_v54 = vadd.f32 %v529_v51, %v514_v49 }
 0x85d   :  { %v531_v50 = vpop.permute.xlu1 %530 }
 0x85e   :  { %1267 = vtanh.f32 %v1482_v54  ;;  %v1486_v58 = vadd.f32 %v531_v50, %v515_v56 }
 0x860   :  { %1269 = vtanh.f32 %v1486_v58 }
 0x864   :  { %v1268_v60 = vpop.eup %1267 }
 0x865   :  { %540 = vrot.lane.b32.xlu1 %v1268_v60, %s1336_s7 }
 0x866   :  { %v1270_v53 = vpop.eup %1269 }
 0x867   :  { %542 = vrot.lane.b32.xlu0 %v1270_v53, %s1336_s7 }
 0x8d7   :  { %v541_v61 = vpop.permute.xlu1 %540 }
 0x8d8   :  { %v546_v52 = vmul.f32 %v541_v61, %v495_v46 }
 0x8d9   :  { %v543_v2 = vpop.permute.xlu0 %542 }
 0x8da   :  { %v548_v63 = vpack.c.bf16 %v546_v52, %v546_v52  ;;  %v547_v48 = vmul.f32 %v543_v2, %v510_v35 }
 0x8dc   :  { %v551_v3 = vshll.u32 %v548_v63, 16  ;;  %v549_v57 = vpack.c.bf16 %v547_v48, %v547_v48  ;;  %v576_v4 = vunpack.c.l.b16 %v548_v63 }
 0x8de   :  { %v555_v5 = vshll.u32 %v549_v57, 16  ;;  %v577_v6 = vunpack.c.l.b16 %v549_v57  ;;  %v1491_v7 = vrot.slane %v551_v3, 7  ;;  %v1162_v10 = vunpack.i.l.s16 %v576_v4 }
 0x8e0   :  { %v1493_v8 = vrot.slane %v555_v5, 7  ;;  %v1163_v9 = vunpack.i.l.s16 %v577_v6 }
 0x8e2   :  { %v582_v11 = vrot.slane %v1163_v9, 7  ;;  %v1192_v12 = vpack.i.bf16 %v1493_v8, %v1491_v7 }
 0x8e4   :  { %v583_v13 = vsel %vm184_vm10, %v582_v11, %v1162_v10 }
 0x8e5   :  { %v584_v14 = vpack.c.b16 %v583_v13, %v583_v13 }
 0x8e7   :  { %585 = vrot.lane.b32.xlu2 %v584_v14, %s1335_s1 }
 0x941   :  { %v586_v15 = vpop.permute.xlu2 %585 }
 0x942   :  { %1164 = vmatmul.msk.bf16.vlgmr.msrb.gmra.mxu0 %vm51_vm1, %v586_v15 }
 0x9bf   :  { %v599_v18 = vpop.f32.mrf.mxu0 }
 0x9c0   :  { %v604_v19 = vrot.slane %v599_v18, 1  ;;  %v607_v20 = vadd.f32 %v599_v18, %v572_v16 }
 0x9c2   :  { %v608_v21 = vadd.f32 %v604_v19, %v573_v17  ;;  %1271 = vtanh.f32 %v607_v20  ;;  %v1165_v25 = vmul.f32 -1.442695, %v607_v20 }
 0x9c4   :  { %1273 = vtanh.f32 %v608_v21  ;;  %v1166_v26 = vmul.f32 -1.442695, %v608_v21  ;;  %v704_v21 = vld [vmem:[%s1790_s0 + $0x5] sm:$0x1] }
 0x9c5   :  { %1275 = vpow2.f32 %v1165_v25 }
 0x9c6   :  { %1277 = vpow2.f32 %v1166_v26 }
 0x9c7   :  { %v601_v22 = vpop.f32.mrf.mxu0 }
 0x9c8   :  { %v1272_v23 = vpop.eup %1271  ;;  %v705_v22 = vld [vmem:[%s1790_s0 + $0xd] sm:$0x1] }
 0x9c9   :  { %653 = vrot.lane.b32.xlu1 %v1272_v23, %s1336_s7 }
 0x9ca   :  { %v1274_v24 = vpop.eup %1273 }
 0x9cb   :  { %655 = vrot.lane.b32.xlu0 %v1274_v24, %s1336_s7  ;;  %v1276_v27 = vpop.eup %1275 }
 0x9cc   :  { %v1278_v28 = vpop.eup %1277  ;;  %v615_v29 = vadd.f32 1.0, %v1276_v27 }
 0x9cd   :  { %v616_v30 = vadd.f32 1.0, %v1278_v28 }
 0x9ce   :  { %1279 = vrcp.f32 %v615_v29  ;;  %v628_v40 = vand.u32 2147483648, %v615_v29  ;;  %vm622_vm9 = vweird.f32 %v615_v29  ;;  %v626_v41 = vand.u32 2147483647, %v615_v29 }
 0x9cf   :  { %1281 = vrcp.f32 %v616_v30  ;;  %v643_v44 = vand.u32 2147483648, %v616_v30  ;;  %vm637_vm13 = vweird.f32 %v616_v30  ;;  %v641_v46 = vand.u32 2147483647, %v616_v30 }
 0x9d0   :  { %v629_v45 = vor.u32 1.1754944e-38, %v628_v40  ;;  %vm627_vm14 = vcmp.eq.f32.partialorder %v626_v41, 8.507059e+37 }
 0x9d1   :  { %v644_v50 = vor.u32 1.1754944e-38, %v643_v44  ;;  %vm642_vm2 = vcmp.eq.f32.partialorder %v641_v46, 8.507059e+37 }
 0x9d4   :  { %v1280_v31 = vpop.eup %1279 }
 0x9d5   :  { %v1282_v32 = vpop.eup %1281  ;;  %v618_v33 = vmul.f32 %v1280_v31, %v615_v29  ;;  %vm623_vm8 = vweird.f32 %v1280_v31 }
 0x9d6   :  { %v633_v34 = vmul.f32 %v1282_v32, %v616_v30  ;;  %vm624_vm11 = vmor %vm622_vm9, %vm623_vm8  ;;  %vm638_vm12 = vweird.f32 %v1282_v32 }
 0x9d7   :  { %v619_v35 = vsub.f32 1.0, %v618_v33  ;;  %vm639_vm15 = vmor %vm637_vm13, %vm638_vm12 }
 0x9d8   :  { %v634_v36 = vsub.f32 1.0, %v633_v34 }
 0x9d9   :  { %v620_v37 = vmul.f32 %v1280_v31, %v619_v35 }
 0x9da   :  { %v635_v38 = vmul.f32 %v1282_v32, %v634_v36 }
 0x9db   :  { %v621_v39 = vadd.f32 %v1280_v31, %v620_v37 }
 0x9dc   :  { %v636_v42 = vadd.f32 %v1282_v32, %v635_v38 }
 0x9dd   :  { %v625_v43 = vsel %vm624_vm11, %v1280_v31, %v621_v39 }
 0x9de   :  { %v630_v49 = vsel %vm627_vm14, %v629_v45, %v625_v43  ;;  %v640_v51 = vsel %vm639_vm15, %v1282_v32, %v636_v42 }
 0x9df   :  { %v645_v53 = vsel %vm642_vm2, %v644_v50, %v640_v51  ;;  %v649_v3 = vmul.f32 %v630_v49, %v1482_v54 }
 0x9e0   :  { %v650_v52 = vmul.f32 %v645_v53, %v1486_v58 }
 0xa3b   :  { %v654_v47 = vpop.permute.xlu1 %653 }
 0xa3c   :  { %v659_v56 = vmul.f32 %v654_v47, %v630_v49 }
 0xa3d   :  { %v656_v60 = vpop.permute.xlu0 %655 }
 0xa3e   :  { %663 = vrot.lane.b32.xlu0 %v659_v56, %s1335_s1  ;;  %v660_v61 = vmul.f32 %v656_v60, %v645_v53 }
 0xa40   :  { %665 = vrot.lane.b32.xlu2 %v660_v61, %s1335_s1 }
 0xa9a   :  { %v666_v63 = vpop.permute.xlu2 %665 }
 0xa9b   :  { %v1511_v2 = vadd.f32 %v666_v63, %v650_v52 }
 0xa9d   :  { %1283 = vtanh.f32 %v1511_v2 }
 0xaa3   :  { %v1284_v48 = vpop.eup %1283 }
 0xaa4   :  { %677 = vrot.lane.b32.xlu1 %v1284_v48, %s1336_s7 }
 0xab0   :  { %v664_v57 = vpop.permute.xlu0 %663 }
 0xab1   :  { %v1516_v4 = vadd.f32 %v664_v57, %v649_v3 }
 0xab3   :  { %1285 = vtanh.f32 %v1516_v4 }
 0xab9   :  { %v1286_v5 = vpop.eup %1285 }
 0xaba   :  { %675 = vrot.lane.b32.xlu2 %v1286_v5, %s1336_s7 }
 0xb14   :  { %v676_v6 = vpop.permute.xlu2 %675 }
 0xb15   :  { %v681_v58 = vmul.f32 %v676_v6, %v630_v49 }
 0xb16   :  { %v678_v9 = vpop.permute.xlu1 %677 }
 0xb17   :  { %v1520_v10 = vpack.c.bf16 %v681_v58, %v681_v58  ;;  %v682_v11 = vmul.f32 %v678_v9, %v645_v53 }
 0xb19   :  { %v1522_v13 = vpack.c.bf16 %v682_v11, %v682_v11  ;;  %v706_v14 = vunpack.c.l.b16 %v1520_v10 }
 0xb1b   :  { %v707_v54 = vunpack.c.l.b16 %v1522_v13  ;;  %v1167_v16 = vunpack.i.l.s16 %v706_v14 }
 0xb1d   :  { %v1168_v15 = vunpack.i.l.s16 %v707_v54 }
 0xb1f   :  { %v712_v17 = vrot.slane %v1168_v15, 7 }
 0xb21   :  { %v713_v18 = vsel %vm184_vm10, %v712_v17, %v1167_v16 }
 0xb22   :  { %v714_v19 = vpack.c.b16 %v713_v18, %v713_v18 }
 0xb24   :  { %715 = vrot.lane.b32.xlu0 %v714_v19, %s1335_s1 }
 0xb96   :  { %v716_v20 = vpop.permute.xlu0 %715 }
 0xb97   :  { %1169 = vmatmul.msk.bf16.vlgmr.msrb.gmra.mxu1 %vm51_vm1, %v716_v20 }
 0xc14   :  { %v729_v23 = vpop.f32.mrf.mxu1 }
 0xc15   :  { %v734_v24 = vrot.slane %v729_v23, 1  ;;  %v737_v25 = vadd.f32 %v729_v23, %v704_v21 }
 0xc17   :  { %v738_v26 = vadd.f32 %v734_v24, %v705_v22  ;;  %1287 = vtanh.f32 %v737_v25  ;;  %v1170_v30 = vmul.f32 -1.442695, %v737_v25 }
 0xc19   :  { %1289 = vtanh.f32 %v738_v26  ;;  %v1171_v35 = vmul.f32 -1.442695, %v738_v26 }
 0xc1a   :  { %1291 = vpow2.f32 %v1170_v30 }
 0xc1c   :  { %v731_v27 = vpop.f32.mrf.mxu1 }
 0xc1d   :  { %v1288_v28 = vpop.eup %1287 }
 0xc1e   :  { %783 = vrot.lane.b32.xlu2 %v1288_v28, %s1336_s7 }
 0xc1f   :  { %v1290_v29 = vpop.eup %1289 }
 0xc20   :  { %785 = vrot.lane.b32.xlu1 %v1290_v29, %s1336_s7  ;;  %v1292_v31 = vpop.eup %1291 }
 0xc21   :  { %v745_v32 = vadd.f32 1.0, %v1292_v31 }
 0xc23   :  { %1293 = vrcp.f32 %v745_v32  ;;  %v758_v40 = vand.u32 2147483648, %v745_v32  ;;  %vm752_vm4 = vweird.f32 %v745_v32  ;;  %v756_v42 = vand.u32 2147483647, %v745_v32 }
 0xc24   :  { %1295 = vpow2.f32 %v1171_v35 }
 0xc25   :  { %v759_v44 = vor.u32 1.1754944e-38, %v758_v40  ;;  %vm757_vm6 = vcmp.eq.f32.partialorder %v756_v42, 8.507059e+37 }
 0xc29   :  { %v1294_v33 = vpop.eup %1293 }
 0xc2a   :  { %v748_v34 = vmul.f32 %v1294_v33, %v745_v32  ;;  %v1296_v38 = vpop.eup %1295  ;;  %vm753_vm3 = vweird.f32 %v1294_v33 }
 0xc2b   :  { %v746_v41 = vadd.f32 1.0, %v1296_v38  ;;  %vm754_vm5 = vmor %vm752_vm4, %vm753_vm3 }
 0xc2c   :  { %v749_v36 = vsub.f32 1.0, %v748_v34  ;;  %v838_v34 = vld [vmem:[%s1790_s0 + $0xe] sm:$0x1] }
 0xc2d   :  { %1297 = vrcp.f32 %v746_v41  ;;  %v773_v53 = vand.u32 2147483648, %v746_v41  ;;  %vm767_vm8 = vweird.f32 %v746_v41  ;;  %v771_v61 = vand.u32 2147483647, %v746_v41 }
 0xc2e   :  { %v750_v37 = vmul.f32 %v1294_v33, %v749_v36 }
 0xc2f   :  { %v774_v63 = vor.u32 1.1754944e-38, %v773_v53  ;;  %vm772_vm11 = vcmp.eq.f32.partialorder %v771_v61, 8.507059e+37 }
 0xc30   :  { %v751_v39 = vadd.f32 %v1294_v33, %v750_v37 }
 0xc32   :  { %v755_v43 = vsel %vm754_vm5, %v1294_v33, %v751_v39  ;;  %v837_v33 = vld [vmem:[%s1790_s0 + $0x6] sm:$0x1] }
 0xc33   :  { %v760_v46 = vsel %vm757_vm6, %v759_v44, %v755_v43  ;;  %v1298_v49 = vpop.eup %1297 }
 0xc34   :  { %v763_v51 = vmul.f32 %v1298_v49, %v746_v41  ;;  %vm768_vm7 = vweird.f32 %v1298_v49  ;;  %v779_v5 = vmul.f32 %v760_v46, %v1516_v4 }
 0xc35   :  { %vm769_vm9 = vmor %vm767_vm8, %vm768_vm7 }
 0xc36   :  { %v764_v56 = vsub.f32 1.0, %v763_v51 }
 0xc38   :  { %v765_v50 = vmul.f32 %v1298_v49, %v764_v56 }
 0xc3a   :  { %v766_v60 = vadd.f32 %v1298_v49, %v765_v50 }
 0xc3c   :  { %v770_v52 = vsel %vm769_vm9, %v1298_v49, %v766_v60 }
 0xc3d   :  { %v775_v3 = vsel %vm772_vm11, %v774_v63, %v770_v52 }
 0xc3e   :  { %v780_v11 = vmul.f32 %v775_v3, %v1511_v2 }
 0xc78   :  { %v784_v45 = vpop.permute.xlu2 %783 }
 0xc79   :  { %v789_v47 = vmul.f32 %v784_v45, %v760_v46 }
 0xc7b   :  { %793 = vrot.lane.b32.xlu1 %v789_v47, %s1335_s1 }
 0xc92   :  { %v786_v48 = vpop.permute.xlu1 %785 }
 0xc93   :  { %v790_v57 = vmul.f32 %v786_v48, %v775_v3 }
 0xc95   :  { %795 = vrot.lane.b32.xlu0 %v790_v57, %s1335_s1 }
 0xced   :  { %v794_v6 = vpop.permute.xlu1 %793 }
 0xcee   :  { %v1540_v58 = vadd.f32 %v794_v6, %v779_v5 }
 0xcf0   :  { %1299 = vtanh.f32 %v1540_v58 }
 0xcf6   :  { %v1300_v9 = vpop.eup %1299 }
 0xcf7   :  { %805 = vrot.lane.b32.xlu0 %v1300_v9, %s1336_s7 }
 0xd07   :  { %v796_v14 = vpop.permute.xlu0 %795 }
 0xd08   :  { %v1545_v54 = vadd.f32 %v796_v14, %v780_v11 }
 0xd0a   :  { %1301 = vtanh.f32 %v1545_v54 }
 0xd10   :  { %v1302_v15 = vpop.eup %1301 }
 0xd11   :  { %807 = vrot.lane.b32.xlu2 %v1302_v15, %s1336_s7 }
 0xd69   :  { %v806_v16 = vpop.permute.xlu0 %805 }
 0xd6a   :  { %v811_v4 = vmul.f32 %v806_v16, %v760_v46 }
 0xd6b   :  { %v808_v18 = vpop.permute.xlu2 %807 }
 0xd6c   :  { %v813_v17 = vpack.c.bf16 %v811_v4, %v811_v4  ;;  %v812_v19 = vmul.f32 %v808_v18, %v775_v3 }
 0xd6e   :  { %v816_v20 = vshll.u32 %v813_v17, 16  ;;  %v814_v21 = vpack.c.bf16 %v812_v19, %v812_v19  ;;  %v841_v22 = vunpack.c.l.b16 %v813_v17 }
 0xd70   :  { %v820_v23 = vshll.u32 %v814_v21, 16  ;;  %v842_v24 = vunpack.c.l.b16 %v814_v21  ;;  %v1549_v25 = vrot.slane %v816_v20, 6  ;;  %v1172_v27 = vunpack.i.l.s16 %v841_v22 }
 0xd72   :  { %v1551_v2 = vrot.slane %v820_v23, 6  ;;  %v1173_v26 = vunpack.i.l.s16 %v842_v24 }
 0xd74   :  { %v847_v28 = vrot.slane %v1173_v26, 7  ;;  %v1197_v29 = vpack.i.bf16 %v1551_v2, %v1549_v25  ;;  %v688_v2 = vrot.slane %v1522_v13, 6 }
 0xd76   :  { %v848_v30 = vsel %vm184_vm10, %v847_v28, %v1172_v27 }
 0xd77   :  { %v849_v31 = vpack.c.b16 %v848_v30, %v848_v30 }
 0xd79   :  { %850 = vrot.lane.b32.xlu1 %v849_v31, %s1335_s1 }
 0xdeb   :  { %v851_v32 = vpop.permute.xlu1 %850 }
 0xdec   :  { %1174 = vmatmul.msk.bf16.vlgmr.msrb.gmra.mxu2 %vm51_vm1, %v851_v32 }
 0xe6f   :  { %v864_v35 = vpop.f32.mrf.mxu2 }
 0xe70   :  { %v869_v36 = vrot.slane %v864_v35, 1  ;;  %v872_v37 = vadd.f32 %v864_v35, %v837_v33 }
 0xe72   :  { %v873_v38 = vadd.f32 %v869_v36, %v838_v34  ;;  %1303 = vtanh.f32 %v872_v37  ;;  %v1175_v45 = vmul.f32 -1.442695, %v872_v37 }
 0xe74   :  { %1305 = vtanh.f32 %v873_v38  ;;  %v1176_v42 = vmul.f32 -1.442695, %v873_v38 }
 0xe76   :  { %1307 = vpow2.f32 %v1176_v42 }
 0xe77   :  { %v866_v39 = vpop.f32.mrf.mxu2 }
 0xe78   :  { %v1304_v40 = vpop.eup %1303 }
 0xe79   :  { %918 = vrot.lane.b32.xlu0 %v1304_v40, %s1336_s7 }
 0xe7a   :  { %v1306_v41 = vpop.eup %1305 }
 0xe7b   :  { %920 = vrot.lane.b32.xlu2 %v1306_v41, %s1336_s7 }
 0xe7c   :  { %v1308_v43 = vpop.eup %1307 }
 0xe7d   :  { %v881_v44 = vadd.f32 1.0, %v1308_v43  ;;  %v969_v43 = vld [vmem:[%s1790_s0 + $0x7] sm:$0x1] }
 0xe7f   :  { %1309 = vrcp.f32 %v881_v44  ;;  %v908_v53 = vand.u32 2147483648, %v881_v44  ;;  %vm902_vm13 = vweird.f32 %v881_v44  ;;  %v906_v61 = vand.u32 2147483647, %v881_v44 }
 0xe80   :  { %1311 = vpow2.f32 %v1175_v45 }
 0xe81   :  { %v909_v63 = vor.u32 1.1754944e-38, %v908_v53  ;;  %vm907_vm15 = vcmp.eq.f32.partialorder %v906_v61, 8.507059e+37 }
 0xe85   :  { %v1310_v46 = vpop.eup %1309 }
 0xe86   :  { %v898_v47 = vmul.f32 %v1310_v46, %v881_v44  ;;  %v1312_v51 = vpop.eup %1311  ;;  %vm903_vm12 = vweird.f32 %v1310_v46  ;;  %v970_v44 = vld [vmem:[%s1790_s0 + $0xf] sm:$0x1] }
 0xe87   :  { %v880_v56 = vadd.f32 1.0, %v1312_v51  ;;  %vm904_vm14 = vmor %vm902_vm13, %vm903_vm12 }
 0xe88   :  { %v899_v49 = vsub.f32 1.0, %v898_v47 }
 0xe89   :  { %1313 = vrcp.f32 %v880_v56  ;;  %v893_v15 = vand.u32 2147483648, %v880_v56  ;;  %vm887_vm3 = vweird.f32 %v880_v56  ;;  %v891_v16 = vand.u32 2147483647, %v880_v56 }
 0xe8a   :  { %v900_v50 = vmul.f32 %v1310_v46, %v899_v49 }
 0xe8b   :  { %v894_v17 = vor.u32 1.1754944e-38, %v893_v15  ;;  %vm892_vm5 = vcmp.eq.f32.partialorder %v891_v16, 8.507059e+37 }
 0xe8c   :  { %v901_v60 = vadd.f32 %v1310_v46, %v900_v50 }
 0xe8e   :  { %v905_v52 = vsel %vm904_vm14, %v1310_v46, %v901_v60  ;;  %vm166_vm14 = vcmask 253952  }
 0xe8f   :  { %v1314_v48 = vpop.eup %1313  ;;  %v910_v57 = vsel %vm907_vm15, %v909_v63, %v905_v52  ;;  %vm167_vm15 = vsmask.f32 256 }
 0xe90   :  { %v883_v6 = vmul.f32 %v1314_v48, %v880_v56  ;;  %vm888_vm2 = vweird.f32 %v1314_v48  ;;  %v915_v24 = vmul.f32 %v910_v57, %v1545_v54 }
 0xe91   :  { %vm889_vm4 = vmor %vm887_vm3, %vm888_vm2  ;;  %vm430_vm3 = vcmask 254977  }
 0xe92   :  { %v884_v9 = vsub.f32 1.0, %v883_v6  ;;  %vm1624_vm2 = vmand %vm166_vm14, %vm167_vm15 }
 0xe94   :  { %v885_v11 = vmul.f32 %v1314_v48, %v884_v9 }
 0xe96   :  { %v886_v14 = vadd.f32 %v1314_v48, %v885_v11 }
 0xe98   :  { %v890_v4 = vsel %vm889_vm4, %v1314_v48, %v886_v14  ;;  %vm431_vm4 = vsmask.f32 1280 }
 0xe99   :  { %v895_v19 = vsel %vm892_vm5, %v894_v17, %v890_v4  ;;  %vm1639_vm5 = vmand %vm430_vm3, %vm431_vm4 }
 0xe9a   :  { %v914_v21 = vmul.f32 %v895_v19, %v1540_v58 }
 0xed5   :  { %v921_v3 = vpop.permute.xlu2 %920 }
 0xed6   :  { %v925_v5 = vmul.f32 %v921_v3, %v910_v57 }
 0xed8   :  { %930 = vrot.lane.b32.xlu1 %v925_v5, %s1335_s1 }
 0xeeb   :  { %v919_v18 = vpop.permute.xlu0 %918 }
 0xeec   :  { %v924_v20 = vmul.f32 %v919_v18, %v895_v19 }
 0xeee   :  { %928 = vrot.lane.b32.xlu2 %v924_v20, %s1335_s1 }
 0xf48   :  { %v929_v22 = vpop.permute.xlu2 %928 }
 0xf49   :  { %v1569_v23 = vadd.f32 %v929_v22, %v914_v21 }
 0xf4a   :  { %v931_v26 = vpop.permute.xlu1 %930 }
 0xf4b   :  { %1315 = vtanh.f32 %v1569_v23  ;;  %v1573_v27 = vadd.f32 %v931_v26, %v915_v24 }
 0xf4d   :  { %1317 = vtanh.f32 %v1573_v27 }
 0xf51   :  { %v1316_v28 = vpop.eup %1315 }
 0xf52   :  { %940 = vrot.lane.b32.xlu1 %v1316_v28, %s1336_s7 }
 0xf53   :  { %v1318_v30 = vpop.eup %1317 }
 0xf54   :  { %942 = vrot.lane.b32.xlu0 %v1318_v30, %s1336_s7 }
 0xfc4   :  { %v941_v31 = vpop.permute.xlu1 %940 }
 0xfc5   :  { %v946_v58 = vmul.f32 %v941_v31, %v895_v19 }
 0xfc6   :  { %v943_v32 = vpop.permute.xlu0 %942 }
 0xfc7   :  { %v1578_v33 = vpack.c.bf16 %v946_v58, %v946_v58  ;;  %v947_v34 = vmul.f32 %v943_v32, %v910_v57 }
 0xfc9   :  { %v1580_v54 = vpack.c.bf16 %v947_v34, %v947_v34  ;;  %v971_v35 = vunpack.c.l.b16 %v1578_v33 }
 0xfcb   :  { %v972_v36 = vunpack.c.l.b16 %v1580_v54  ;;  %v1177_v38 = vunpack.i.l.s16 %v971_v35  ;;  %v423_v35 = vrot.slane %v1464_v1, 7  ;;  %v687_v1 = vrot.slane %v1520_v10, 6 }
 0xfcd   :  { %v1178_v37 = vunpack.i.l.s16 %v972_v36  ;;  %v952_v36 = vrot.slane %v1578_v33, 5 }
 0xfcf   :  { %v977_v39 = vrot.slane %v1178_v37, 7 }
 0xfd1   :  { %v978_v40 = vsel %vm184_vm10, %v977_v39, %v1177_v38 }
 0xfd2   :  { %v979_v41 = vpack.c.b16 %v978_v40, %v978_v40 }
 0xfd4   :  { %980 = vrot.lane.b32.xlu2 %v979_v41, %s1335_s1  ;;  %v436_v41 = vld [vmem:[%s1791_s4 + $0x4] sm:$0x2] }
0x102e   :  { %v981_v42 = vpop.permute.xlu2 %980 }
0x102f   :  { %1179 = vmatmul.msk.bf16.vlgmr.msrb.gmra.mxu3 %vm51_vm1, %v981_v42  ;;  %v422_v42 = vrot.slane %v1462_v62, 7  ;;  %v963_v62 = vld [vmem:[%s1791_s4] sm:$0x8] }
0x10b2   :  { %v994_v45 = vpop.f32.mrf.mxu3 }
0x10b3   :  { %v999_v46 = vrot.slane %v994_v45, 1  ;;  %v1002_v47 = vadd.f32 %v994_v45, %v969_v43 }
0x10b5   :  { %v1003_v49 = vadd.f32 %v999_v46, %v970_v44  ;;  %1319 = vtanh.f32 %v1002_v47  ;;  %v1180_v60 = vmul.f32 -1.442695, %v1002_v47 }
0x10b7   :  { %1321 = vtanh.f32 %v1003_v49  ;;  %v1181_v53 = vmul.f32 -1.442695, %v1003_v49 }
0x10b8   :  { %1323 = vpow2.f32 %v1180_v60 }
0x10b9   :  { %1325 = vpow2.f32 %v1181_v53 }
0x10ba   :  { %v996_v51 = vpop.f32.mrf.mxu3 }
0x10bb   :  { %v1320_v56 = vpop.eup %1319 }
0x10bc   :  { %1048 = vrot.lane.b32.xlu0 %v1320_v56, %s1336_s7 }
0x10bd   :  { %v1322_v50 = vpop.eup %1321 }
0x10be   :  { %1050 = vrot.lane.b32.xlu1 %v1322_v50, %s1336_s7  ;;  %v1324_v61 = vpop.eup %1323 }
0x10bf   :  { %v1326_v52 = vpop.eup %1325  ;;  %v1010_v63 = vadd.f32 1.0, %v1324_v61 }
0x10c0   :  { %v1011_v48 = vadd.f32 1.0, %v1326_v52 }
0x10c1   :  { %1327 = vrcp.f32 %v1010_v63  ;;  %v1023_v4 = vand.u32 2147483648, %v1010_v63  ;;  %vm1017_vm6 = vweird.f32 %v1010_v63  ;;  %v1021_v17 = vand.u32 2147483647, %v1010_v63 }
0x10c2   :  { %1329 = vrcp.f32 %v1011_v48  ;;  %v1038_v20 = vand.u32 2147483648, %v1011_v48  ;;  %vm1032_vm9 = vweird.f32 %v1011_v48  ;;  %v1036_v22 = vand.u32 2147483647, %v1011_v48 }
0x10c3   :  { %v1024_v21 = vor.u32 1.1754944e-38, %v1023_v4  ;;  %vm1022_vm11 = vcmp.eq.f32.partialorder %v1021_v17, 8.507059e+37 }
0x10c4   :  { %v1039_v31 = vor.u32 1.1754944e-38, %v1038_v20  ;;  %vm1037_vm13 = vcmp.eq.f32.partialorder %v1036_v22, 8.507059e+37  ;;  %v701_v22 = vld [vmem:[%s1791_s4 + $0x4] sm:$0x4] }
0x10c7   :  { %v1328_v3 = vpop.eup %1327 }
0x10c8   :  { %v1330_v57 = vpop.eup %1329  ;;  %v1013_v5 = vmul.f32 %v1328_v3, %v1010_v63  ;;  %vm1018_vm1 = vweird.f32 %v1328_v3 }
0x10c9   :  { %v1028_v6 = vmul.f32 %v1330_v57, %v1011_v48  ;;  %vm1019_vm7 = vmor %vm1017_vm6, %vm1018_vm1  ;;  %vm1033_vm8 = vweird.f32 %v1330_v57  ;;  %vm960_vm1 = vcmask 257027   ;;  %vm961_vm6 = vsmask.f32 3328 }
0x10ca   :  { %v1014_v9 = vsub.f32 1.0, %v1013_v5  ;;  %vm1034_vm12 = vmor %vm1032_vm9, %vm1033_vm8  ;;  %vm564_vm8 = vsmask.f32 7942 }
0x10cb   :  { %v1029_v11 = vsub.f32 1.0, %v1028_v6  ;;  %vm1674_vm9 = vmand %vm430_vm3, %vm564_vm8  ;;  %vm1094_vm3 = vsmask.f32 7950 }
0x10cc   :  { %v1015_v14 = vmul.f32 %v1328_v3, %v1014_v9  ;;  %vm1095_vm4 = vmand %vm960_vm1, %vm1094_vm3 }
0x10cd   :  { %v1030_v15 = vmul.f32 %v1330_v57, %v1029_v11 }
0x10ce   :  { %v1016_v16 = vadd.f32 %v1328_v3, %v1015_v14  ;;  %v433_v14 = vld [vmem:[%s1791_s4] sm:$0x2] }
0x10cf   :  { %v1031_v18 = vadd.f32 %v1330_v57, %v1030_v15 }
0x10d0   :  { %v1020_v19 = vsel %vm1019_vm7, %v1328_v3, %v1016_v16  ;;  %vm1658_vm7 = vmand %vm960_vm1, %vm961_vm6 }
0x10d1   :  { %v1595_v26 = vsel %vm1022_vm11, %v1024_v21, %v1020_v19  ;;  %v1035_v28 = vsel %vm1034_vm12, %v1330_v57, %v1031_v18  ;;  %vm695_vm11 = vcmask 256002   ;;  %vm696_vm12 = vsmask.f32 2304  ;;  %v698_v19 = vld [vmem:[%s1791_s4] sm:$0x4] }
0x10d2   :  { %v1598_v32 = vsel %vm1037_vm13, %v1039_v31, %v1035_v28  ;;  %v1044_v37 = vmul.f32 %v1595_v26, %v1569_v23  ;;  %v953_v23 = vrot.slane %v1580_v54, 5  ;;  %vm299_vm13 = vsmask.f32 7938 }
0x10d3   :  { %v1045_v7 = vmul.f32 %v1598_v32, %v1573_v27  ;;  %vm300_vm15 = vmand %vm166_vm14, %vm299_vm13 }
0x112e   :  { %v1049_v24 = vpop.permute.xlu0 %1048 }
0x112f   :  { %v1054_v30 = vmul.f32 %v1049_v24, %v1595_v26 }
0x1130   :  { %v1051_v58 = vpop.permute.xlu1 %1050 }
0x1131   :  { %1058 = vrot.lane.b32.xlu2 %v1054_v30, %s1335_s1  ;;  %v1055_v34 = vmul.f32 %v1051_v58, %v1598_v32  ;;  %v966_v58 = vld [vmem:[%s1791_s4 + $0x4] sm:$0x8] }
0x1133   :  { %1060 = vrot.lane.b32.xlu0 %v1055_v34, %s1335_s1 }
0x113b   :  { %160 = vrot.lane.b32.xlu0 %v1411_v0, %s1335_s1 }
0x1143   :  { %426 = vrot.lane.b32.xlu0 %v423_v35, %s1335_s1 }
0x114b   :  { %954 = vrot.lane.b32.xlu0 %v952_v36, %s1335_s1 }
0x1153   :  { %1193 = vrot.lane.b32.xlu0 %v1192_v12, %s1335_s1 }
0x118b   :  { %v1059_v38 = vpop.permute.xlu2 %1058 }
0x118c   :  { %v1064_v39 = vadd.f32 %v1059_v38, %v1044_v37 }
0x118e   :  { %1331 = vtanh.f32 %v1064_v39 }
0x1194   :  { %v1332_v0 = vpop.eup %1331 }
0x1195   :  { %1070 = vrot.lane.b32.xlu1 %v1332_v0, %s1336_s7 }
0x119d   :  { %162 = vrot.lane.b32.xlu1 %v1408_v59, %s1335_s1  ;;  %v169_v59 = vld [vmem:[%s1791_s4] sm:$0x1] }
0x11a5   :  { %689 = vrot.lane.b32.xlu1 %v687_v1, %s1335_s1  ;;  %v1061_v8 = vpop.permute.xlu0 %1060 }
0x11a6   :  { %v1065_v12 = vadd.f32 %v1061_v8, %v1045_v7 }
0x11a8   :  { %1333 = vtanh.f32 %v1065_v12  ;;  %v1113_v45 = vrot.slane %v1065_v12, 7 }
0x11aa   :  { %v1114_v25 = vsel %vm184_vm10, %v1113_v45, %v1064_v39 }
0x11ad   :  { %956 = vrot.lane.b32.xlu1 %v953_v23, %s1335_s1  ;;  %v161_v10 = vpop.permute.xlu0 %160 }
0x11ae   :  { %v1334_v27 = vpop.eup %1333  ;;  %v170_v40 = vsel %vm1624_vm2, %v161_v10, %v169_v59 }
0x11af   :  { %171 = vst [vmem:[%s1791_s4] sm:$0x1] %v170_v40  ;;  %1072 = vrot.lane.b32.xlu2 %v1334_v27, %s1336_s7 }
0x11b5   :  { %1198 = vrot.lane.b32.xlu1 %v1197_v29, %s1335_s1  ;;  %v427_v43 = vpop.permute.xlu0 %426 }
0x11b6   :  { %v437_v44 = vsel %vm1639_vm5, %v427_v43, %v436_v41  ;;  %v301_v38 = vld [vmem:[%s1791_s4] sm:$0x1] }
0x11b7   :  { %438 = vst [vmem:[%s1791_s4 + $0x4] sm:$0x2] %v437_v44  ;;  %424 = vrot.lane.b32.xlu2 %v422_v42, %s1335_s1 }
0x11bd   :  { %1115 = vrot.lane.b32.xlu1 %v1114_v25, %s1337_s19  ;;  %v955_v29 = vpop.permute.xlu0 %954 }
0x11be   :  { %v964_v47 = vsel %vm1658_vm7, %v955_v29, %v963_v62  ;;  %v569_v13 = vld [vmem:[%s1791_s4 + $0x4] sm:$0x2] }
0x11bf   :  { %965 = vst [vmem:[%s1791_s4] sm:$0x8] %v964_v47  ;;  %691 = vrot.lane.b32.xlu2 %v688_v2, %s1335_s1 }
0x11c5   :  { %v1194_v51 = vpop.permute.xlu0 %1193 }
0x11c6   :  { %v1196_v56 = vunpack.i.h.bf16 %v1194_v51  ;;  %v1195_v24 = vunpack.i.l.bf16 %v1194_v51  ;;  %v1096_v42 = vld [vmem:[%s1791_s4] sm:$0x8] }
0x11c7   :  { %1188 = vrot.lane.b32.xlu2 %v1437_v55, %s1335_s1  ;;  %v172_v55 = vld [vmem:[%s1791_s4 + $0x4] sm:$0x1] }
0x11c8   :  { %v570_v50 = vsel %vm1674_vm9, %v1196_v56, %v569_v13 }
0x11c9   :  { %571 = vst [vmem:[%s1791_s4 + $0x4] sm:$0x2] %v570_v50 }
0x1207   :  { %v1071_v60 = vpop.permute.xlu1 %1070 }
0x1208   :  { %v1076_v53 = vmul.f32 %v1071_v60, %v1595_v26 }
0x1209   :  { %v1073_v52 = vpop.permute.xlu2 %1072 }
0x120a   :  { %v1078_v61 = vpack.c.bf16 %v1076_v53, %v1076_v53  ;;  %v1077_v63 = vmul.f32 %v1073_v52, %v1598_v32 }
0x120c   :  { %v1081_v48 = vshll.u32 %v1078_v61, 16  ;;  %v1079_v3 = vpack.c.bf16 %v1077_v63, %v1077_v63  ;;  %v1104_v57 = vrot.slane %v1077_v63, 7 }
0x120e   :  { %v1085_v5 = vshll.u32 %v1079_v3, 16  ;;  %v1105_v9 = vsel %vm184_vm10, %v1104_v57, %v1076_v53  ;;  %v1083_v15 = vrot.slane %v1081_v48, 5  ;;  %vm697_vm10 = vmand %vm695_vm11, %vm696_vm12 }
0x120f   :  { %v163_v6 = vpop.permute.xlu1 %162  ;;  %1106 = vrot.lane.b32.xlu0 %v1105_v9, %s1335_s1 }
0x1210   :  { %v173_v11 = vsel %vm1624_vm2, %v163_v6, %v172_v55  ;;  %v1087_v16 = vrot.slane %v1085_v5, 5  ;;  %vm829_vm2 = vsmask.f32 7946 }
0x1211   :  { %174 = vst [vmem:[%s1791_s4 + $0x4] sm:$0x1] %v173_v11  ;;  %v425_v4 = vpop.permute.xlu2 %424  ;;  %vm830_vm14 = vmand %vm695_vm11, %vm829_vm2 }
0x1212   :  { %v434_v17 = vsel %vm1639_vm5, %v425_v4, %v433_v14  ;;  %v1202_v18 = vpack.i.bf16 %v1087_v16, %v1083_v15 }
0x1213   :  { %435 = vst [vmem:[%s1791_s4] sm:$0x2] %v434_v17 }
0x1214   :  { %1203 = vrot.lane.b32.xlu2 %v1202_v18, %s1335_s1 }
0x1217   :  { %v690_v20 = vpop.permute.xlu1 %689 }
0x1218   :  { %v699_v21 = vsel %vm697_vm10, %v690_v20, %v698_v19  ;;  %v304_v39 = vld [vmem:[%s1791_s4 + $0x4] sm:$0x1] }
0x1219   :  { %700 = vst [vmem:[%s1791_s4] sm:$0x4] %v699_v21  ;;  %v692_v26 = vpop.permute.xlu2 %691 }
0x121a   :  { %v566_v28 = vld [vmem:[%s1791_s4] sm:$0x2]  ;;  %v702_v30 = vsel %vm697_vm10, %v692_v26, %v701_v22 }
0x121b   :  { %v567_v31 = vsel %vm1674_vm9, %v1195_v24, %v566_v28  ;;  %703 = vst [vmem:[%s1791_s4 + $0x4] sm:$0x4] %v702_v30 }
0x121c   :  { %568 = vst [vmem:[%s1791_s4] sm:$0x2] %v567_v31 }
0x121f   :  { %v957_v32 = vpop.permute.xlu1 %956 }
0x1220   :  { %v967_v34 = vsel %vm1658_vm7, %v957_v32, %v966_v58  ;;  %v831_v23 = vld [vmem:[%s1791_s4] sm:$0x4] }
0x1221   :  { %968 = vst [vmem:[%s1791_s4 + $0x4] sm:$0x8] %v967_v34  ;;  %v1189_v35 = vpop.permute.xlu2 %1188 }
0x1222   :  { %v1191_v36 = vunpack.i.h.bf16 %v1189_v35  ;;  %v1190_v37 = vunpack.i.l.bf16 %v1189_v35  ;;  %v834_v33 = vld [vmem:[%s1791_s4 + $0x4] sm:$0x4] }
0x1224   :  { %v305_v0 = vsel %vm300_vm15, %v1191_v36, %v304_v39  ;;  %v302_v1 = vsel %vm300_vm15, %v1190_v37, %v301_v38 }
0x1225   :  { %306 = vst [vmem:[%s1791_s4 + $0x4] sm:$0x1] %v305_v0 }
0x1226   :  { %303 = vst [vmem:[%s1791_s4] sm:$0x1] %v302_v1 }
0x1227   :  { %v1199_v7 = vpop.permute.xlu1 %1198 }
0x1228   :  { %v1201_v8 = vunpack.i.h.bf16 %v1199_v7  ;;  %v1200_v12 = vunpack.i.l.bf16 %v1199_v7  ;;  %v1099_v43 = vld [vmem:[%s1791_s4 + $0x4] sm:$0x8] }
0x122a   :  { %v835_v59 = vsel %vm830_vm14, %v1201_v8, %v834_v33  ;;  %v832_v10 = vsel %vm830_vm14, %v1200_v12, %v831_v23 }
0x122b   :  { %836 = vst [vmem:[%s1791_s4 + $0x4] sm:$0x4] %v835_v59 }
0x122c   :  { %833 = vst [vmem:[%s1791_s4] sm:$0x4] %v832_v10 }
0x122f   :  { %v1116_v27 = vpop.permute.xlu1 %1115 }
0x1230   :  { %1118 = vst.msk [vmem:[#allocation3] sm:$0x3] %vm26_vm0, %v1116_v27 }
0x1231   :  { %1123 = vst.msk [vmem:[%s1792_s6] sm:$0x3] %vm26_vm0, %v1116_v27 }
0x126e   :  { %v1204_v40 = vpop.permute.xlu2 %1203 }
0x126f   :  { %v1206_v54 = vunpack.i.h.bf16 %v1204_v40  ;;  %v1205_v41 = vunpack.i.l.bf16 %v1204_v40 }
0x1271   :  { %v1097_v44 = vsel %vm1095_vm4, %v1205_v41, %v1096_v42  ;;  %v1100_v45 = vsel %vm1095_vm4, %v1206_v54, %v1099_v43 }
0x1272   :  { %1098 = vst [vmem:[%s1791_s4] sm:$0x8] %v1097_v44 }
0x1273   :  { %1101 = vst [vmem:[%s1791_s4 + $0x4] sm:$0x8] %v1100_v45 }
0x1281   :  { %v1107_v46 = vpop.permute.xlu0 %1106 }
0x1282   :  { %1110 = vst.msk [vmem:[#allocation2] sm:$0x3] %vm26_vm0, %v1107_v46 }
0x1283   :  { %1122 = vst.msk [vmem:[%s1793_s5] sm:$0x3] %vm26_vm0, %v1107_v46 }

</bundles_post_ra>
